<compile_context>
chip_gen: v7x
topology: tpu7x:2x2x1
jax: 0.10.0
libtpu: 0.0.40
codegen_flags: <defaults>
</compile_context>

<pallas_src>
import functools
import math

import numpy as np

import jax
import jax.numpy as jnp
from jax import lax
from jax.experimental import pallas as pl
from jax.experimental.pallas import tpu as pltpu


# ----------------------------------------------------------------------------
# Host-side sorting-network builders (verbatim ports of the PyTorch module).
# ----------------------------------------------------------------------------
def bitonic_network(n):
    IDENTITY_MAP_FACTOR = 0.5
    num_blocks = math.ceil(np.log2(n))
    assert n <= 2 ** num_blocks
    network = []
    for block_idx in range(num_blocks):
        for layer_idx in range(block_idx + 1):
            m = 2 ** (block_idx - layer_idx)
            split_a, split_b = np.zeros((n, 2 ** num_blocks)), np.zeros((n, 2 ** num_blocks))
            combine_min, combine_max = np.zeros((2 ** num_blocks, n)), np.zeros((2 ** num_blocks, n))
            count = 0
            for i in range(0, 2 ** num_blocks, 2 * m):
                for j in range(m):
                    ix = i + j
                    a, b = ix, ix + m
                    if a >= 2 ** num_blocks - n and b >= 2 ** num_blocks - n:
                        split_a[count, a], split_b[count, b] = 1, 1
                        if ix // 2 ** (block_idx + 1) % 2 == 1:
                            a, b = b, a
                        combine_min[a, count], combine_max[b, count] = 1, 1
                        count += 1
                    elif a < 2 ** num_blocks - n and b < 2 ** num_blocks - n:
                        pass
                    elif a >= 2 ** num_blocks - n and b < 2 ** num_blocks - n:
                        split_a[count, a], split_b[count, a] = 1, 1
                        combine_min[a, count] = IDENTITY_MAP_FACTOR
                        combine_max[a, count] = IDENTITY_MAP_FACTOR
                        count += 1
                    elif a < 2 ** num_blocks - n and b >= 2 ** num_blocks - n:
                        split_a[count, b], split_b[count, b] = 1, 1
                        combine_min[b, count] = IDENTITY_MAP_FACTOR
                        combine_max[b, count] = IDENTITY_MAP_FACTOR
                        count += 1
                    else:
                        assert False
            split_a = split_a[:count, 2 ** num_blocks - n:]
            split_b = split_b[:count, 2 ** num_blocks - n:]
            combine_min = combine_min[2 ** num_blocks - n:, :count]
            combine_max = combine_max[2 ** num_blocks - n:, :count]
            network.append((split_a, split_b, combine_min, combine_max))
    return network


def odd_even_network(n):
    layers = n
    network = []
    shifted = False
    even = n % 2 == 0
    for _layer in range(layers):
        if even:
            k = n // 2 + shifted
        else:
            k = n // 2 + 1
        split_a, split_b = np.zeros((k, n)), np.zeros((k, n))
        combine_min, combine_max = np.zeros((n, k)), np.zeros((n, k))
        count = 0
        for i in range(int(shifted), n - 1, 2):
            a, b = i, i + 1
            split_a[count, a], split_b[count, b] = 1, 1
            combine_min[a, count], combine_max[b, count] = 1, 1
            count += 1
        if even and shifted:
            a, b = 0, 0
            split_a[count, a], split_b[count, b] = 1, 1
            combine_min[a, count], combine_max[b, count] = 0.5, 0.5
            count += 1
            a, b = n - 1, n - 1
            split_a[count, a], split_b[count, b] = 1, 1
            combine_min[a, count], combine_max[b, count] = 0.5, 0.5
            count += 1
        elif not even:
            if shifted:
                a, b = 0, 0
            else:
                a, b = n - 1, n - 1
            split_a[count, a], split_b[count, b] = 1, 1
            combine_min[a, count], combine_max[b, count] = 0.5, 0.5
            count += 1
        assert count == k
        network.append((split_a, split_b, combine_min, combine_max))
        shifted = not shifted
    return network


def get_sorting_network(network_type, n):
    if network_type == "bitonic":
        return bitonic_network(n)
    if network_type == "odd_even":
        return odd_even_network(n)
    raise NotImplementedError("Sorting network `{}` unknown.".format(network_type))


def _stack_network(network):
    """Stack per-layer matrices over layers, zero-padding comparators to K.

    Matrices are pre-transposed so every in-kernel contraction is a plain
    row-major 2-D matmul (lhs contracts on its last dim, rhs on its first).
    Zero padding is mathematically inert (padded comparator columns of the
    combine matrices are zero).
    """
    n_layers = len(network)
    n = network[0][0].shape[1]
    K = max(sa.shape[0] for sa, _, _, _ in network)
    sa_t = np.zeros((n_layers, n, K), np.float32)
    sb_t = np.zeros((n_layers, n, K), np.float32)
    cmin_t = np.zeros((n_layers, K, n), np.float32)
    cmax_t = np.zeros((n_layers, K, n), np.float32)
    for l, (sa, sb, cmin, cmax) in enumerate(network):
        k = sa.shape[0]
        sa_t[l, :, :k] = sa.T
        sb_t[l, :, :k] = sb.T
        cmin_t[l, :k, :] = cmin.T
        cmax_t[l, :k, :] = cmax.T
    return sa_t, sb_t, cmin_t, cmax_t


# ----------------------------------------------------------------------------
# In-kernel elementary helpers (VPU/EUP-friendly ops only).
# ----------------------------------------------------------------------------
_TAN_3PI_8 = 2.414213562373095
_TAN_PI_8 = 0.41421356237309503


def _atan_f32(v):
    """float32 arctan from add/mul/div/select only (Cephes-style reduction)."""
    sgn = jnp.where(v < 0.0, -1.0, 1.0).astype(v.dtype)
    x = jnp.abs(v)
    big = x > _TAN_3PI_8
    mid = jnp.logical_and(x > _TAN_PI_8, jnp.logical_not(big))
    x_big = -1.0 / jnp.where(big, x, 1.0)
    x_mid = (x - 1.0) / (x + 1.0)
    xr = jnp.where(big, x_big, jnp.where(mid, x_mid, x))
    y0 = jnp.where(big, math.pi / 2.0, jnp.where(mid, math.pi / 4.0, 0.0))
    z = xr * xr
    p = ((((8.05374449538e-2 * z - 1.38776856032e-1) * z + 1.99777106478e-1) * z
          - 3.33329491539e-1) * z * xr + xr)
    return sgn * (y0 + p)


def _s_best(x):
    return (jnp.clip(x, -0.25, 0.25) + 0.5 +
            ((x > 0.25).astype(x.dtype) - (x < -0.25).astype(x.dtype)) *
            (0.25 - 1.0 / 16.0 / (jnp.abs(x) + 1e-10)))


# ----------------------------------------------------------------------------
# Pallas kernel: one batch tile runs the full sorting network.
# ----------------------------------------------------------------------------
def _diffsort_kernel(sa_ref, sb_ref, cmin_ref, cmax_ref, vec_ref,
                     x_out_ref, perm_out_ref, *,
                     n_layers, bt, n, k, steepness, distribution):
    x0 = vec_ref[...]                                            # (bt, n)
    row = lax.broadcasted_iota(jnp.int32, (bt, n, n), 1)
    col = lax.broadcasted_iota(jnp.int32, (bt, n, n), 2)
    # Identity permutation, carried flattened as (bt*n, n) so all contractions
    # stay 2-D and the final store is one contiguous slab.
    perm0 = jnp.where(row == col, 1.0, 0.0).astype(jnp.float32).reshape(bt * n, n)

    def alpha_fn(v):
        if distribution == "cauchy":
            return _atan_f32(v) * (1.0 / math.pi) + 0.5
        if distribution == "reciprocal":
            return 0.5 * (v / (2.0 + jnp.abs(v)) + 1.0)
        if distribution == "logistic":
            return 1.0 / (1.0 + jnp.exp(-v))
        if distribution == "optimal":
            return _s_best(v)
        raise NotImplementedError(distribution)

    def layer(l, carry):
        x, perm = carry                                          # (bt,n), (bt*n,n)
        sa_t = sa_ref[l]                                         # (n, k)  = split_a.T
        sb_t = sb_ref[l]                                         # (n, k)  = split_b.T
        cmin_t = cmin_ref[l]                                     # (k, n)  = combine_min.T
        cmax_t = cmax_ref[l]                                     # (k, n)  = combine_max.T

        a = jnp.dot(x, sa_t, preferred_element_type=jnp.float32)        # (bt, k)
        b = jnp.dot(x, sb_t, preferred_element_type=jnp.float32)
        alpha = alpha_fn(steepness * (b - a))                           # (bt, k)

        a_cols = jnp.dot(perm, sa_t, preferred_element_type=jnp.float32)  # (bt*n, k)
        b_cols = jnp.dot(perm, sb_t, preferred_element_type=jnp.float32)
        alpha_r = jnp.broadcast_to(alpha[:, None, :], (bt, n, k)).reshape(bt * n, k)
        w_min = alpha_r * a_cols + (1.0 - alpha_r) * b_cols
        w_max = a_cols + b_cols - w_min        # == (1-alpha)*a_cols + alpha*b_cols
        perm_new = (jnp.dot(w_max, cmax_t, preferred_element_type=jnp.float32)
                    + jnp.dot(w_min, cmin_t, preferred_element_type=jnp.float32))

        s_min = alpha * a + (1.0 - alpha) * b
        s_max = a + b - s_min
        x_new = (jnp.dot(s_min, cmin_t, preferred_element_type=jnp.float32)
                 + jnp.dot(s_max, cmax_t, preferred_element_type=jnp.float32))
        return x_new, perm_new

    x_fin, perm_fin = lax.fori_loop(0, n_layers, layer, (x0, perm0),
                                    unroll=n_layers <= 8)
    x_out_ref[...] = x_fin
    perm_out_ref[...] = perm_fin


def _pick_batch_tile(batch, n, net_bytes, budget_bytes=24 << 20):
    """Largest batch tile whose live set fits a budget safe for v7x (64 MiB VMEM)."""
    per_row = 6 * n * n * 4   # ~6 live f32 (n, n) slabs per batch row in flight
    cap = max(1, (budget_bytes - net_bytes) // per_row)
    if batch <= cap:
        return batch
    start = min(cap, batch)
    start -= start % 8        # keep the second-to-last block dim (8,·)-aligned
    for bt in range(start, 0, -8):
        if batch % bt == 0:
            return bt
    return batch              # fall back to a single whole-batch block


def _diff_sort_pallas(vectors, stacked, steepness, distribution):
    vectors = jnp.asarray(vectors, jnp.float32)
    batch, n = vectors.shape
    sa_t, sb_t, cmin_t, cmax_t = (jnp.asarray(m, jnp.float32) for m in stacked)
    n_layers, _, k = sa_t.shape
    net_bytes = 4 * n_layers * n * k * 4
    bt = _pick_batch_tile(batch, n, net_bytes)
    grid = (batch // bt,)

    kernel = functools.partial(
        _diffsort_kernel, n_layers=int(n_layers), bt=int(bt), n=int(n), k=int(k),
        steepness=float(steepness), distribution=distribution)

    net_spec_split = pl.BlockSpec((n_layers, n, k), lambda b: (0, 0, 0))
    net_spec_combine = pl.BlockSpec((n_layers, k, n), lambda b: (0, 0, 0))

    x_sorted, perm_flat = pl.pallas_call(
        kernel,
        grid=grid,
        in_specs=[net_spec_split, net_spec_split,
                  net_spec_combine, net_spec_combine,
                  pl.BlockSpec((bt, n), lambda b: (b, 0))],
        out_specs=(pl.BlockSpec((bt, n), lambda b: (b, 0)),
                   pl.BlockSpec((bt * n, n), lambda b: (b, 0))),
        out_shape=(jax.ShapeDtypeStruct((batch, n), jnp.float32),
                   jax.ShapeDtypeStruct((batch * n, n), jnp.float32)),
        compiler_params=pltpu.CompilerParams(
            dimension_semantics=("parallel",),        # megacore-shard batch tiles
            vmem_limit_bytes=64 * 1024 * 1024),       # above 32 MiB scoped default
    )(sa_t, sb_t, cmin_t, cmax_t, vectors)
    return x_sorted, perm_flat.reshape(batch, n, n)


class DiffSortNet:
    """JAX/Pallas port of the PyTorch DiffSortNet forward pass."""

    _SUPPORTED = ("cauchy", "reciprocal", "logistic", "optimal")

    def __init__(self, sorting_network_type, size, steepness=100.0,
                 art_lambda=0.25, interpolation_type=None, distribution="cauchy"):
        if interpolation_type is not None:
            distribution = interpolation_type
        if distribution not in self._SUPPORTED:
            # TODO(synk): 'gaussian' (erf) and 'logistic_phi' (fractional pow)
            # interpolations are not lowered in-kernel yet.
            raise NotImplementedError(distribution)
        self.size = size
        self.steepness = steepness
        self.art_lambda = art_lambda
        self.distribution = distribution
        self.sorting_network = get_sorting_network(sorting_network_type, size)
        self._stacked = _stack_network(self.sorting_network)

    def __call__(self, vectors):
        assert vectors.ndim == 2 and vectors.shape[1] == self.size
        return _diff_sort_pallas(vectors, self._stacked,
                                 self.steepness, self.distribution)


# ----------------------------------------------------------------------------
# Pure-JAX reference mirroring execute_sort() in the PyTorch module.
# ----------------------------------------------------------------------------
def _diffsort_ref(network, vectors, steepness=10.0, distribution="cauchy"):
    with jax.default_matmul_precision("float32"):
        x = jnp.asarray(vectors, jnp.float32)
        bsz, n = x.shape
        X = jnp.broadcast_to(jnp.eye(n, dtype=jnp.float32), (bsz, n, n))
        for sa, sb, cmin, cmax in network:
            sa = jnp.asarray(sa, jnp.float32)
            sb = jnp.asarray(sb, jnp.float32)
            cmin = jnp.asarray(cmin, jnp.float32)
            cmax = jnp.asarray(cmax, jnp.float32)
            a = x @ sa.T
            b = x @ sb.T
            v = steepness * (b - a)
            if distribution == "cauchy":
                alpha = jnp.arctan(v) / math.pi + 0.5
            elif distribution == "reciprocal":
                alpha = 0.5 * (v / (2.0 + jnp.abs(v)) + 1.0)
            elif distribution == "logistic":
                alpha = jax.nn.sigmoid(v)
            elif distribution == "optimal":
                alpha = _s_best(v)
            else:
                raise NotImplementedError(distribution)
            aX = X @ sa.T
            bX = X @ sb.T
            w_min = alpha[:, None, :] * aX + (1.0 - alpha)[:, None, :] * bX
            w_max = (1.0 - alpha)[:, None, :] * aX + alpha[:, None, :] * bX
            X = w_max @ cmax.T + w_min @ cmin.T
            x = ((alpha * a + (1.0 - alpha) * b) @ cmin.T
                 + ((1.0 - alpha) * a + alpha * b) @ cmax.T)
        return x, X


if __name__ == "__main__":
    batch, n = 2, 8
    steepness = 100.0

    key = jax.random.PRNGKey(0)
    vectors = jax.random.normal(key, (batch, n), dtype=jnp.float32)

    sorter = DiffSortNet("odd_even", n, steepness=steepness, distribution="cauchy")
    x_sorted, perm = sorter(vectors)
    x_sorted, perm = jax.block_until_ready((x_sorted, perm))

    x_ref, perm_ref = _diffsort_ref(sorter.sorting_network, vectors,
                                    steepness=steepness, distribution="cauchy")

    assert x_sorted.shape == (batch, n)
    assert perm.shape == (batch, n, n)
    # Tolerance covers MXU f32 matmul-pass differences and the in-kernel
    # polynomial arctan (~1e-6), amplified by steepness near ties.
    assert jnp.allclose(x_sorted, x_ref, atol=2e-3, rtol=2e-3), "sorted values mismatch"
    assert jnp.allclose(perm, perm_ref, atol=2e-3, rtol=2e-3), "permutation mismatch"
    # Invariant of the algorithm: vectors contracted with the relaxed
    # permutation reproduce the soft-sorted values.
    applied = jnp.einsum("bi,bim->bm", vectors, perm,
                         precision=jax.lax.Precision.HIGHEST)
    assert jnp.allclose(applied, x_sorted, atol=5e-3, rtol=5e-3), "perm/x inconsistency"

    print("KERNEL_OK")
</pallas_src>

<mosaic_0001>
module attributes {stable_mosaic.version = 11 : i64} {
  func.func @_diffsort_kernel(%arg0: i32, %arg1: memref<8x8x5xf32, #tpu.memory_space<vmem>>, %arg2: memref<8x8x5xf32, #tpu.memory_space<vmem>>, %arg3: memref<8x5x8xf32, #tpu.memory_space<vmem>>, %arg4: memref<8x5x8xf32, #tpu.memory_space<vmem>>, %arg5: memref<2x8xf32, #tpu.memory_space<vmem>>, %arg6: memref<2x8xf32, #tpu.memory_space<vmem>>, %arg7: memref<16x8xf32, #tpu.memory_space<vmem>>) attributes {dimension_semantics = [#tpu.dimension_semantics<parallel>], iteration_bounds = array<i64: 1>, scalar_prefetch = 0 : i64, scratch_operands = 0 : i64, tpu.core_type = #tpu.core_type<tc>, window_params = [{pipeline_mode = #tpu.pipeline_mode<synchronous>, transform_indices = @transform_0, window_bounds = array<i64: 8, 8, 5>}, {pipeline_mode = #tpu.pipeline_mode<synchronous>, transform_indices = @transform_1, window_bounds = array<i64: 8, 8, 5>}, {pipeline_mode = #tpu.pipeline_mode<synchronous>, transform_indices = @transform_2, window_bounds = array<i64: 8, 5, 8>}, {pipeline_mode = #tpu.pipeline_mode<synchronous>, transform_indices = @transform_3, window_bounds = array<i64: 8, 5, 8>}, {transform_indices = @transform_4, window_bounds = array<i64: 2, 8>}, {transform_indices = @transform_5, window_bounds = array<i64: 2, 8>}, {transform_indices = @transform_6, window_bounds = array<i64: 16, 8>}]} {
    %c0 = arith.constant 0 : index
    %c0_0 = arith.constant 0 : index
    %0 = vector.load %arg5[%c0, %c0_0] : memref<2x8xf32, #tpu.memory_space<vmem>>, vector<2x8xf32>
    %1 = tpu.iota {dimensions = array<i32: 1>} : vector<2x8x8xi32>
    %2 = tpu.iota {dimensions = array<i32: 2>} : vector<2x8x8xi32>
    %3 = arith.cmpi eq, %1, %2 : vector<2x8x8xi32>
    %cst = arith.constant 1.000000e+00 : f32
    %cst_1 = arith.constant 0.000000e+00 : f32
    %4 = vector.broadcast %cst : f32 to vector<2x8x8xf32>
    %5 = vector.broadcast %cst_1 : f32 to vector<2x8x8xf32>
    %6 = arith.select %3, %4, %5 : vector<2x8x8xi1>, vector<2x8x8xf32>
    %7 = vector.shape_cast %6 : vector<2x8x8xf32> to vector<16x8xf32>
    %c0_i32 = arith.constant 0 : i32
    %8 = arith.index_cast %c0_i32 : i32 to index
    %c0_2 = arith.constant 0 : index
    %c0_3 = arith.constant 0 : index
    %9 = vector.load %arg1[%8, %c0_2, %c0_3] : memref<8x8x5xf32, #tpu.memory_space<vmem>>, vector<1x8x5xf32>
    %10 = vector.shape_cast %9 : vector<1x8x5xf32> to vector<8x5xf32>
    %11 = arith.index_cast %c0_i32 : i32 to index
    %c0_4 = arith.constant 0 : index
    %c0_5 = arith.constant 0 : index
    %12 = vector.load %arg2[%11, %c0_4, %c0_5] : memref<8x8x5xf32, #tpu.memory_space<vmem>>, vector<1x8x5xf32>
    %13 = vector.shape_cast %12 : vector<1x8x5xf32> to vector<8x5xf32>
    %14 = arith.index_cast %c0_i32 : i32 to index
    %c0_6 = arith.constant 0 : index
    %c0_7 = arith.constant 0 : index
    %15 = vector.load %arg3[%14, %c0_6, %c0_7] : memref<8x5x8xf32, #tpu.memory_space<vmem>>, vector<1x5x8xf32>
    %16 = vector.shape_cast %15 : vector<1x5x8xf32> to vector<5x8xf32>
    %17 = arith.index_cast %c0_i32 : i32 to index
    %c0_8 = arith.constant 0 : index
    %c0_9 = arith.constant 0 : index
    %18 = vector.load %arg4[%17, %c0_8, %c0_9] : memref<8x5x8xf32, #tpu.memory_space<vmem>>, vector<1x5x8xf32>
    %19 = vector.shape_cast %18 : vector<1x5x8xf32> to vector<5x8xf32>
    %cst_10 = arith.constant dense<0.000000e+00> : vector<2x5xf32>
    %20 = tpu.matmul %0, %10, %cst_10 {dimension_numbers = #tpu.dot_dimension_numbers<[1], [0], [0], [1], [0, 0, 1, 1], [], []>} : vector<2x8xf32>, vector<8x5xf32>, vector<2x5xf32> -> vector<2x5xf32>
    %cst_11 = arith.constant dense<0.000000e+00> : vector<2x5xf32>
    %21 = tpu.matmul %0, %13, %cst_11 {dimension_numbers = #tpu.dot_dimension_numbers<[1], [0], [0], [1], [0, 0, 1, 1], [], []>} : vector<2x8xf32>, vector<8x5xf32>, vector<2x5xf32> -> vector<2x5xf32>
    %22 = arith.subf %21, %20 : vector<2x5xf32>
    %cst_12 = arith.constant 1.000000e+02 : f32
    %23 = vector.broadcast %cst_12 : f32 to vector<2x5xf32>
    %24 = arith.mulf %23, %22 : vector<2x5xf32>
    %cst_13 = arith.constant 0.000000e+00 : f32
    %25 = vector.broadcast %cst_13 : f32 to vector<2x5xf32>
    %26 = arith.cmpf olt, %24, %25 : vector<2x5xf32>
    %cst_14 = arith.constant -1.000000e+00 : f32
    %cst_15 = arith.constant 1.000000e+00 : f32
    %27 = vector.broadcast %cst_14 : f32 to vector<2x5xf32>
    %28 = vector.broadcast %cst_15 : f32 to vector<2x5xf32>
    %29 = arith.select %26, %27, %28 : vector<2x5xi1>, vector<2x5xf32>
    %30 = math.absf %24 : vector<2x5xf32>
    %cst_16 = arith.constant 2.41421366 : f32
    %31 = vector.broadcast %cst_16 : f32 to vector<2x5xf32>
    %32 = arith.cmpf ogt, %30, %31 : vector<2x5xf32>
    %cst_17 = arith.constant 0.414213568 : f32
    %33 = vector.broadcast %cst_17 : f32 to vector<2x5xf32>
    %34 = arith.cmpf ogt, %30, %33 : vector<2x5xf32>
    %cst_18 = arith.constant dense<true> : vector<2x5xi1>
    %35 = arith.xori %32, %cst_18 : vector<2x5xi1>
    %36 = arith.andi %34, %35 : vector<2x5xi1>
    %cst_19 = arith.constant 1.000000e+00 : f32
    %37 = vector.broadcast %cst_19 : f32 to vector<2x5xf32>
    %38 = arith.select %32, %30, %37 : vector<2x5xi1>, vector<2x5xf32>
    %cst_20 = arith.constant -1.000000e+00 : f32
    %39 = vector.broadcast %cst_20 : f32 to vector<2x5xf32>
    %40 = arith.divf %39, %38 : vector<2x5xf32>
    %cst_21 = arith.constant 1.000000e+00 : f32
    %41 = vector.broadcast %cst_21 : f32 to vector<2x5xf32>
    %42 = arith.subf %30, %41 : vector<2x5xf32>
    %cst_22 = arith.constant 1.000000e+00 : f32
    %43 = vector.broadcast %cst_22 : f32 to vector<2x5xf32>
    %44 = arith.addf %30, %43 : vector<2x5xf32>
    %45 = arith.divf %42, %44 : vector<2x5xf32>
    %46 = arith.select %36, %45, %30 : vector<2x5xi1>, vector<2x5xf32>
    %47 = arith.select %32, %40, %46 : vector<2x5xi1>, vector<2x5xf32>
    %cst_23 = arith.constant 0.785398185 : f32
    %cst_24 = arith.constant 0.000000e+00 : f32
    %48 = vector.broadcast %cst_23 : f32 to vector<2x5xf32>
    %49 = vector.broadcast %cst_24 : f32 to vector<2x5xf32>
    %50 = arith.select %36, %48, %49 : vector<2x5xi1>, vector<2x5xf32>
    %cst_25 = arith.constant 1.57079637 : f32
    %51 = vector.broadcast %cst_25 : f32 to vector<2x5xf32>
    %52 = arith.select %32, %51, %50 : vector<2x5xi1>, vector<2x5xf32>
    %53 = arith.mulf %47, %47 : vector<2x5xf32>
    %cst_26 = arith.constant 0.0805374458 : f32
    %54 = vector.broadcast %cst_26 : f32 to vector<2x5xf32>
    %55 = arith.mulf %54, %53 : vector<2x5xf32>
    %cst_27 = arith.constant 0.138776854 : f32
    %56 = vector.broadcast %cst_27 : f32 to vector<2x5xf32>
    %57 = arith.subf %55, %56 : vector<2x5xf32>
    %58 = arith.mulf %57, %53 : vector<2x5xf32>
    %cst_28 = arith.constant 0.199777111 : f32
    %59 = vector.broadcast %cst_28 : f32 to vector<2x5xf32>
    %60 = arith.addf %58, %59 : vector<2x5xf32>
    %61 = arith.mulf %60, %53 : vector<2x5xf32>
    %cst_29 = arith.constant 0.333329499 : f32
    %62 = vector.broadcast %cst_29 : f32 to vector<2x5xf32>
    %63 = arith.subf %61, %62 : vector<2x5xf32>
    %64 = arith.mulf %63, %53 : vector<2x5xf32>
    %65 = arith.mulf %64, %47 : vector<2x5xf32>
    %66 = arith.addf %65, %47 : vector<2x5xf32>
    %67 = arith.addf %52, %66 : vector<2x5xf32>
    %68 = arith.mulf %29, %67 : vector<2x5xf32>
    %cst_30 = arith.constant 0.318309873 : f32
    %69 = vector.broadcast %cst_30 : f32 to vector<2x5xf32>
    %70 = arith.mulf %68, %69 : vector<2x5xf32>
    %cst_31 = arith.constant 5.000000e-01 : f32
    %71 = vector.broadcast %cst_31 : f32 to vector<2x5xf32>
    %72 = arith.addf %70, %71 : vector<2x5xf32>
    %cst_32 = arith.constant dense<0.000000e+00> : vector<16x5xf32>
    %73 = tpu.matmul %7, %10, %cst_32 {dimension_numbers = #tpu.dot_dimension_numbers<[1], [0], [0], [1], [0, 0, 1, 1], [], []>} : vector<16x8xf32>, vector<8x5xf32>, vector<16x5xf32> -> vector<16x5xf32>
    %cst_33 = arith.constant dense<0.000000e+00> : vector<16x5xf32>
    %74 = tpu.matmul %7, %13, %cst_33 {dimension_numbers = #tpu.dot_dimension_numbers<[1], [0], [0], [1], [0, 0, 1, 1], [], []>} : vector<16x8xf32>, vector<8x5xf32>, vector<16x5xf32> -> vector<16x5xf32>
    %75 = vector.shape_cast %72 : vector<2x5xf32> to vector<2x1x5xf32>
    %76 = vector.shape_cast %75 : vector<2x1x5xf32> to vector<2x1x5xf32>
    %77 = vector.broadcast %76 : vector<2x1x5xf32> to vector<2x8x5xf32>
    %78 = vector.shape_cast %77 : vector<2x8x5xf32> to vector<16x5xf32>
    %79 = arith.mulf %78, %73 : vector<16x5xf32>
    %cst_34 = arith.constant 1.000000e+00 : f32
    %80 = vector.broadcast %cst_34 : f32 to vector<16x5xf32>
    %81 = arith.subf %80, %78 : vector<16x5xf32>
    %82 = arith.mulf %81, %74 : vector<16x5xf32>
    %83 = arith.addf %79, %82 : vector<16x5xf32>
    %84 = arith.addf %73, %74 : vector<16x5xf32>
    %85 = arith.subf %84, %83 : vector<16x5xf32>
    %cst_35 = arith.constant dense<0.000000e+00> : vector<16x8xf32>
    %86 = tpu.matmul %85, %19, %cst_35 {dimension_numbers = #tpu.dot_dimension_numbers<[1], [0], [0], [1], [0, 0, 1, 1], [], []>} : vector<16x5xf32>, vector<5x8xf32>, vector<16x8xf32> -> vector<16x8xf32>
    %cst_36 = arith.constant dense<0.000000e+00> : vector<16x8xf32>
    %87 = tpu.matmul %83, %16, %cst_36 {dimension_numbers = #tpu.dot_dimension_numbers<[1], [0], [0], [1], [0, 0, 1, 1], [], []>} : vector<16x5xf32>, vector<5x8xf32>, vector<16x8xf32> -> vector<16x8xf32>
    %88 = arith.addf %86, %87 : vector<16x8xf32>
    %89 = arith.mulf %72, %20 : vector<2x5xf32>
    %cst_37 = arith.constant 1.000000e+00 : f32
    %90 = vector.broadcast %cst_37 : f32 to vector<2x5xf32>
    %91 = arith.subf %90, %72 : vector<2x5xf32>
    %92 = arith.mulf %91, %21 : vector<2x5xf32>
    %93 = arith.addf %89, %92 : vector<2x5xf32>
    %94 = arith.addf %20, %21 : vector<2x5xf32>
    %95 = arith.subf %94, %93 : vector<2x5xf32>
    %cst_38 = arith.constant dense<0.000000e+00> : vector<2x8xf32>
    %96 = tpu.matmul %93, %16, %cst_38 {dimension_numbers = #tpu.dot_dimension_numbers<[1], [0], [0], [1], [0, 0, 1, 1], [], []>} : vector<2x5xf32>, vector<5x8xf32>, vector<2x8xf32> -> vector<2x8xf32>
    %cst_39 = arith.constant dense<0.000000e+00> : vector<2x8xf32>
    %97 = tpu.matmul %95, %19, %cst_39 {dimension_numbers = #tpu.dot_dimension_numbers<[1], [0], [0], [1], [0, 0, 1, 1], [], []>} : vector<2x5xf32>, vector<5x8xf32>, vector<2x8xf32> -> vector<2x8xf32>
    %98 = arith.addf %96, %97 : vector<2x8xf32>
    %c1_i32 = arith.constant 1 : i32
    %99 = arith.index_cast %c1_i32 : i32 to index
    %c0_40 = arith.constant 0 : index
    %c0_41 = arith.constant 0 : index
    %100 = vector.load %arg1[%99, %c0_40, %c0_41] : memref<8x8x5xf32, #tpu.memory_space<vmem>>, vector<1x8x5xf32>
    %101 = vector.shape_cast %100 : vector<1x8x5xf32> to vector<8x5xf32>
    %102 = arith.index_cast %c1_i32 : i32 to index
    %c0_42 = arith.constant 0 : index
    %c0_43 = arith.constant 0 : index
    %103 = vector.load %arg2[%102, %c0_42, %c0_43] : memref<8x8x5xf32, #tpu.memory_space<vmem>>, vector<1x8x5xf32>
    %104 = vector.shape_cast %103 : vector<1x8x5xf32> to vector<8x5xf32>
    %105 = arith.index_cast %c1_i32 : i32 to index
    %c0_44 = arith.constant 0 : index
    %c0_45 = arith.constant 0 : index
    %106 = vector.load %arg3[%105, %c0_44, %c0_45] : memref<8x5x8xf32, #tpu.memory_space<vmem>>, vector<1x5x8xf32>
    %107 = vector.shape_cast %106 : vector<1x5x8xf32> to vector<5x8xf32>
    %108 = arith.index_cast %c1_i32 : i32 to index
    %c0_46 = arith.constant 0 : index
    %c0_47 = arith.constant 0 : index
    %109 = vector.load %arg4[%108, %c0_46, %c0_47] : memref<8x5x8xf32, #tpu.memory_space<vmem>>, vector<1x5x8xf32>
    %110 = vector.shape_cast %109 : vector<1x5x8xf32> to vector<5x8xf32>
    %cst_48 = arith.constant dense<0.000000e+00> : vector<2x5xf32>
    %111 = tpu.matmul %98, %101, %cst_48 {dimension_numbers = #tpu.dot_dimension_numbers<[1], [0], [0], [1], [0, 0, 1, 1], [], []>} : vector<2x8xf32>, vector<8x5xf32>, vector<2x5xf32> -> vector<2x5xf32>
    %cst_49 = arith.constant dense<0.000000e+00> : vector<2x5xf32>
    %112 = tpu.matmul %98, %104, %cst_49 {dimension_numbers = #tpu.dot_dimension_numbers<[1], [0], [0], [1], [0, 0, 1, 1], [], []>} : vector<2x8xf32>, vector<8x5xf32>, vector<2x5xf32> -> vector<2x5xf32>
    %113 = arith.subf %112, %111 : vector<2x5xf32>
    %cst_50 = arith.constant 1.000000e+02 : f32
    %114 = vector.broadcast %cst_50 : f32 to vector<2x5xf32>
    %115 = arith.mulf %114, %113 : vector<2x5xf32>
    %cst_51 = arith.constant 0.000000e+00 : f32
    %116 = vector.broadcast %cst_51 : f32 to vector<2x5xf32>
    %117 = arith.cmpf olt, %115, %116 : vector<2x5xf32>
    %cst_52 = arith.constant -1.000000e+00 : f32
    %cst_53 = arith.constant 1.000000e+00 : f32
    %118 = vector.broadcast %cst_52 : f32 to vector<2x5xf32>
    %119 = vector.broadcast %cst_53 : f32 to vector<2x5xf32>
    %120 = arith.select %117, %118, %119 : vector<2x5xi1>, vector<2x5xf32>
    %121 = math.absf %115 : vector<2x5xf32>
    %cst_54 = arith.constant 2.41421366 : f32
    %122 = vector.broadcast %cst_54 : f32 to vector<2x5xf32>
    %123 = arith.cmpf ogt, %121, %122 : vector<2x5xf32>
    %cst_55 = arith.constant 0.414213568 : f32
    %124 = vector.broadcast %cst_55 : f32 to vector<2x5xf32>
    %125 = arith.cmpf ogt, %121, %124 : vector<2x5xf32>
    %cst_56 = arith.constant dense<true> : vector<2x5xi1>
    %126 = arith.xori %123, %cst_56 : vector<2x5xi1>
    %127 = arith.andi %125, %126 : vector<2x5xi1>
    %cst_57 = arith.constant 1.000000e+00 : f32
    %128 = vector.broadcast %cst_57 : f32 to vector<2x5xf32>
    %129 = arith.select %123, %121, %128 : vector<2x5xi1>, vector<2x5xf32>
    %cst_58 = arith.constant -1.000000e+00 : f32
    %130 = vector.broadcast %cst_58 : f32 to vector<2x5xf32>
    %131 = arith.divf %130, %129 : vector<2x5xf32>
    %cst_59 = arith.constant 1.000000e+00 : f32
    %132 = vector.broadcast %cst_59 : f32 to vector<2x5xf32>
    %133 = arith.subf %121, %132 : vector<2x5xf32>
    %cst_60 = arith.constant 1.000000e+00 : f32
    %134 = vector.broadcast %cst_60 : f32 to vector<2x5xf32>
    %135 = arith.addf %121, %134 : vector<2x5xf32>
    %136 = arith.divf %133, %135 : vector<2x5xf32>
    %137 = arith.select %127, %136, %121 : vector<2x5xi1>, vector<2x5xf32>
    %138 = arith.select %123, %131, %137 : vector<2x5xi1>, vector<2x5xf32>
    %cst_61 = arith.constant 0.785398185 : f32
    %cst_62 = arith.constant 0.000000e+00 : f32
    %139 = vector.broadcast %cst_61 : f32 to vector<2x5xf32>
    %140 = vector.broadcast %cst_62 : f32 to vector<2x5xf32>
    %141 = arith.select %127, %139, %140 : vector<2x5xi1>, vector<2x5xf32>
    %cst_63 = arith.constant 1.57079637 : f32
    %142 = vector.broadcast %cst_63 : f32 to vector<2x5xf32>
    %143 = arith.select %123, %142, %141 : vector<2x5xi1>, vector<2x5xf32>
    %144 = arith.mulf %138, %138 : vector<2x5xf32>
    %cst_64 = arith.constant 0.0805374458 : f32
    %145 = vector.broadcast %cst_64 : f32 to vector<2x5xf32>
    %146 = arith.mulf %145, %144 : vector<2x5xf32>
    %cst_65 = arith.constant 0.138776854 : f32
    %147 = vector.broadcast %cst_65 : f32 to vector<2x5xf32>
    %148 = arith.subf %146, %147 : vector<2x5xf32>
    %149 = arith.mulf %148, %144 : vector<2x5xf32>
    %cst_66 = arith.constant 0.199777111 : f32
    %150 = vector.broadcast %cst_66 : f32 to vector<2x5xf32>
    %151 = arith.addf %149, %150 : vector<2x5xf32>
    %152 = arith.mulf %151, %144 : vector<2x5xf32>
    %cst_67 = arith.constant 0.333329499 : f32
    %153 = vector.broadcast %cst_67 : f32 to vector<2x5xf32>
    %154 = arith.subf %152, %153 : vector<2x5xf32>
    %155 = arith.mulf %154, %144 : vector<2x5xf32>
    %156 = arith.mulf %155, %138 : vector<2x5xf32>
    %157 = arith.addf %156, %138 : vector<2x5xf32>
    %158 = arith.addf %143, %157 : vector<2x5xf32>
    %159 = arith.mulf %120, %158 : vector<2x5xf32>
    %cst_68 = arith.constant 0.318309873 : f32
    %160 = vector.broadcast %cst_68 : f32 to vector<2x5xf32>
    %161 = arith.mulf %159, %160 : vector<2x5xf32>
    %cst_69 = arith.constant 5.000000e-01 : f32
    %162 = vector.broadcast %cst_69 : f32 to vector<2x5xf32>
    %163 = arith.addf %161, %162 : vector<2x5xf32>
    %cst_70 = arith.constant dense<0.000000e+00> : vector<16x5xf32>
    %164 = tpu.matmul %88, %101, %cst_70 {dimension_numbers = #tpu.dot_dimension_numbers<[1], [0], [0], [1], [0, 0, 1, 1], [], []>} : vector<16x8xf32>, vector<8x5xf32>, vector<16x5xf32> -> vector<16x5xf32>
    %cst_71 = arith.constant dense<0.000000e+00> : vector<16x5xf32>
    %165 = tpu.matmul %88, %104, %cst_71 {dimension_numbers = #tpu.dot_dimension_numbers<[1], [0], [0], [1], [0, 0, 1, 1], [], []>} : vector<16x8xf32>, vector<8x5xf32>, vector<16x5xf32> -> vector<16x5xf32>
    %166 = vector.shape_cast %163 : vector<2x5xf32> to vector<2x1x5xf32>
    %167 = vector.shape_cast %166 : vector<2x1x5xf32> to vector<2x1x5xf32>
    %168 = vector.broadcast %167 : vector<2x1x5xf32> to vector<2x8x5xf32>
    %169 = vector.shape_cast %168 : vector<2x8x5xf32> to vector<16x5xf32>
    %170 = arith.mulf %169, %164 : vector<16x5xf32>
    %cst_72 = arith.constant 1.000000e+00 : f32
    %171 = vector.broadcast %cst_72 : f32 to vector<16x5xf32>
    %172 = arith.subf %171, %169 : vector<16x5xf32>
    %173 = arith.mulf %172, %165 : vector<16x5xf32>
    %174 = arith.addf %170, %173 : vector<16x5xf32>
    %175 = arith.addf %164, %165 : vector<16x5xf32>
    %176 = arith.subf %175, %174 : vector<16x5xf32>
    %cst_73 = arith.constant dense<0.000000e+00> : vector<16x8xf32>
    %177 = tpu.matmul %176, %110, %cst_73 {dimension_numbers = #tpu.dot_dimension_numbers<[1], [0], [0], [1], [0, 0, 1, 1], [], []>} : vector<16x5xf32>, vector<5x8xf32>, vector<16x8xf32> -> vector<16x8xf32>
    %cst_74 = arith.constant dense<0.000000e+00> : vector<16x8xf32>
    %178 = tpu.matmul %174, %107, %cst_74 {dimension_numbers = #tpu.dot_dimension_numbers<[1], [0], [0], [1], [0, 0, 1, 1], [], []>} : vector<16x5xf32>, vector<5x8xf32>, vector<16x8xf32> -> vector<16x8xf32>
    %179 = arith.addf %177, %178 : vector<16x8xf32>
    %180 = arith.mulf %163, %111 : vector<2x5xf32>
    %cst_75 = arith.constant 1.000000e+00 : f32
    %181 = vector.broadcast %cst_75 : f32 to vector<2x5xf32>
    %182 = arith.subf %181, %163 : vector<2x5xf32>
    %183 = arith.mulf %182, %112 : vector<2x5xf32>
    %184 = arith.addf %180, %183 : vector<2x5xf32>
    %185 = arith.addf %111, %112 : vector<2x5xf32>
    %186 = arith.subf %185, %184 : vector<2x5xf32>
    %cst_76 = arith.constant dense<0.000000e+00> : vector<2x8xf32>
    %187 = tpu.matmul %184, %107, %cst_76 {dimension_numbers = #tpu.dot_dimension_numbers<[1], [0], [0], [1], [0, 0, 1, 1], [], []>} : vector<2x5xf32>, vector<5x8xf32>, vector<2x8xf32> -> vector<2x8xf32>
    %cst_77 = arith.constant dense<0.000000e+00> : vector<2x8xf32>
    %188 = tpu.matmul %186, %110, %cst_77 {dimension_numbers = #tpu.dot_dimension_numbers<[1], [0], [0], [1], [0, 0, 1, 1], [], []>} : vector<2x5xf32>, vector<5x8xf32>, vector<2x8xf32> -> vector<2x8xf32>
    %189 = arith.addf %187, %188 : vector<2x8xf32>
    %c2_i32 = arith.constant 2 : i32
    %190 = arith.index_cast %c2_i32 : i32 to index
    %c0_78 = arith.constant 0 : index
    %c0_79 = arith.constant 0 : index
    %191 = vector.load %arg1[%190, %c0_78, %c0_79] : memref<8x8x5xf32, #tpu.memory_space<vmem>>, vector<1x8x5xf32>
    %192 = vector.shape_cast %191 : vector<1x8x5xf32> to vector<8x5xf32>
    %193 = arith.index_cast %c2_i32 : i32 to index
    %c0_80 = arith.constant 0 : index
    %c0_81 = arith.constant 0 : index
    %194 = vector.load %arg2[%193, %c0_80, %c0_81] : memref<8x8x5xf32, #tpu.memory_space<vmem>>, vector<1x8x5xf32>
    %195 = vector.shape_cast %194 : vector<1x8x5xf32> to vector<8x5xf32>
    %196 = arith.index_cast %c2_i32 : i32 to index
    %c0_82 = arith.constant 0 : index
    %c0_83 = arith.constant 0 : index
    %197 = vector.load %arg3[%196, %c0_82, %c0_83] : memref<8x5x8xf32, #tpu.memory_space<vmem>>, vector<1x5x8xf32>
    %198 = vector.shape_cast %197 : vector<1x5x8xf32> to vector<5x8xf32>
    %199 = arith.index_cast %c2_i32 : i32 to index
    %c0_84 = arith.constant 0 : index
    %c0_85 = arith.constant 0 : index
    %200 = vector.load %arg4[%199, %c0_84, %c0_85] : memref<8x5x8xf32, #tpu.memory_space<vmem>>, vector<1x5x8xf32>
    %201 = vector.shape_cast %200 : vector<1x5x8xf32> to vector<5x8xf32>
    %cst_86 = arith.constant dense<0.000000e+00> : vector<2x5xf32>
    %202 = tpu.matmul %189, %192, %cst_86 {dimension_numbers = #tpu.dot_dimension_numbers<[1], [0], [0], [1], [0, 0, 1, 1], [], []>} : vector<2x8xf32>, vector<8x5xf32>, vector<2x5xf32> -> vector<2x5xf32>
    %cst_87 = arith.constant dense<0.000000e+00> : vector<2x5xf32>
    %203 = tpu.matmul %189, %195, %cst_87 {dimension_numbers = #tpu.dot_dimension_numbers<[1], [0], [0], [1], [0, 0, 1, 1], [], []>} : vector<2x8xf32>, vector<8x5xf32>, vector<2x5xf32> -> vector<2x5xf32>
    %204 = arith.subf %203, %202 : vector<2x5xf32>
    %cst_88 = arith.constant 1.000000e+02 : f32
    %205 = vector.broadcast %cst_88 : f32 to vector<2x5xf32>
    %206 = arith.mulf %205, %204 : vector<2x5xf32>
    %cst_89 = arith.constant 0.000000e+00 : f32
    %207 = vector.broadcast %cst_89 : f32 to vector<2x5xf32>
    %208 = arith.cmpf olt, %206, %207 : vector<2x5xf32>
    %cst_90 = arith.constant -1.000000e+00 : f32
    %cst_91 = arith.constant 1.000000e+00 : f32
    %209 = vector.broadcast %cst_90 : f32 to vector<2x5xf32>
    %210 = vector.broadcast %cst_91 : f32 to vector<2x5xf32>
    %211 = arith.select %208, %209, %210 : vector<2x5xi1>, vector<2x5xf32>
    %212 = math.absf %206 : vector<2x5xf32>
    %cst_92 = arith.constant 2.41421366 : f32
    %213 = vector.broadcast %cst_92 : f32 to vector<2x5xf32>
    %214 = arith.cmpf ogt, %212, %213 : vector<2x5xf32>
    %cst_93 = arith.constant 0.414213568 : f32
    %215 = vector.broadcast %cst_93 : f32 to vector<2x5xf32>
    %216 = arith.cmpf ogt, %212, %215 : vector<2x5xf32>
    %cst_94 = arith.constant dense<true> : vector<2x5xi1>
    %217 = arith.xori %214, %cst_94 : vector<2x5xi1>
    %218 = arith.andi %216, %217 : vector<2x5xi1>
    %cst_95 = arith.constant 1.000000e+00 : f32
    %219 = vector.broadcast %cst_95 : f32 to vector<2x5xf32>
    %220 = arith.select %214, %212, %219 : vector<2x5xi1>, vector<2x5xf32>
    %cst_96 = arith.constant -1.000000e+00 : f32
    %221 = vector.broadcast %cst_96 : f32 to vector<2x5xf32>
    %222 = arith.divf %221, %220 : vector<2x5xf32>
    %cst_97 = arith.constant 1.000000e+00 : f32
    %223 = vector.broadcast %cst_97 : f32 to vector<2x5xf32>
    %224 = arith.subf %212, %223 : vector<2x5xf32>
    %cst_98 = arith.constant 1.000000e+00 : f32
    %225 = vector.broadcast %cst_98 : f32 to vector<2x5xf32>
    %226 = arith.addf %212, %225 : vector<2x5xf32>
    %227 = arith.divf %224, %226 : vector<2x5xf32>
    %228 = arith.select %218, %227, %212 : vector<2x5xi1>, vector<2x5xf32>
    %229 = arith.select %214, %222, %228 : vector<2x5xi1>, vector<2x5xf32>
    %cst_99 = arith.constant 0.785398185 : f32
    %cst_100 = arith.constant 0.000000e+00 : f32
    %230 = vector.broadcast %cst_99 : f32 to vector<2x5xf32>
    %231 = vector.broadcast %cst_100 : f32 to vector<2x5xf32>
    %232 = arith.select %218, %230, %231 : vector<2x5xi1>, vector<2x5xf32>
    %cst_101 = arith.constant 1.57079637 : f32
    %233 = vector.broadcast %cst_101 : f32 to vector<2x5xf32>
    %234 = arith.select %214, %233, %232 : vector<2x5xi1>, vector<2x5xf32>
    %235 = arith.mulf %229, %229 : vector<2x5xf32>
    %cst_102 = arith.constant 0.0805374458 : f32
    %236 = vector.broadcast %cst_102 : f32 to vector<2x5xf32>
    %237 = arith.mulf %236, %235 : vector<2x5xf32>
    %cst_103 = arith.constant 0.138776854 : f32
    %238 = vector.broadcast %cst_103 : f32 to vector<2x5xf32>
    %239 = arith.subf %237, %238 : vector<2x5xf32>
    %240 = arith.mulf %239, %235 : vector<2x5xf32>
    %cst_104 = arith.constant 0.199777111 : f32
    %241 = vector.broadcast %cst_104 : f32 to vector<2x5xf32>
    %242 = arith.addf %240, %241 : vector<2x5xf32>
    %243 = arith.mulf %242, %235 : vector<2x5xf32>
    %cst_105 = arith.constant 0.333329499 : f32
    %244 = vector.broadcast %cst_105 : f32 to vector<2x5xf32>
    %245 = arith.subf %243, %244 : vector<2x5xf32>
    %246 = arith.mulf %245, %235 : vector<2x5xf32>
    %247 = arith.mulf %246, %229 : vector<2x5xf32>
    %248 = arith.addf %247, %229 : vector<2x5xf32>
    %249 = arith.addf %234, %248 : vector<2x5xf32>
    %250 = arith.mulf %211, %249 : vector<2x5xf32>
    %cst_106 = arith.constant 0.318309873 : f32
    %251 = vector.broadcast %cst_106 : f32 to vector<2x5xf32>
    %252 = arith.mulf %250, %251 : vector<2x5xf32>
    %cst_107 = arith.constant 5.000000e-01 : f32
    %253 = vector.broadcast %cst_107 : f32 to vector<2x5xf32>
    %254 = arith.addf %252, %253 : vector<2x5xf32>
    %cst_108 = arith.constant dense<0.000000e+00> : vector<16x5xf32>
    %255 = tpu.matmul %179, %192, %cst_108 {dimension_numbers = #tpu.dot_dimension_numbers<[1], [0], [0], [1], [0, 0, 1, 1], [], []>} : vector<16x8xf32>, vector<8x5xf32>, vector<16x5xf32> -> vector<16x5xf32>
    %cst_109 = arith.constant dense<0.000000e+00> : vector<16x5xf32>
    %256 = tpu.matmul %179, %195, %cst_109 {dimension_numbers = #tpu.dot_dimension_numbers<[1], [0], [0], [1], [0, 0, 1, 1], [], []>} : vector<16x8xf32>, vector<8x5xf32>, vector<16x5xf32> -> vector<16x5xf32>
    %257 = vector.shape_cast %254 : vector<2x5xf32> to vector<2x1x5xf32>
    %258 = vector.shape_cast %257 : vector<2x1x5xf32> to vector<2x1x5xf32>
    %259 = vector.broadcast %258 : vector<2x1x5xf32> to vector<2x8x5xf32>
    %260 = vector.shape_cast %259 : vector<2x8x5xf32> to vector<16x5xf32>
    %261 = arith.mulf %260, %255 : vector<16x5xf32>
    %cst_110 = arith.constant 1.000000e+00 : f32
    %262 = vector.broadcast %cst_110 : f32 to vector<16x5xf32>
    %263 = arith.subf %262, %260 : vector<16x5xf32>
    %264 = arith.mulf %263, %256 : vector<16x5xf32>
    %265 = arith.addf %261, %264 : vector<16x5xf32>
    %266 = arith.addf %255, %256 : vector<16x5xf32>
    %267 = arith.subf %266, %265 : vector<16x5xf32>
    %cst_111 = arith.constant dense<0.000000e+00> : vector<16x8xf32>
    %268 = tpu.matmul %267, %201, %cst_111 {dimension_numbers = #tpu.dot_dimension_numbers<[1], [0], [0], [1], [0, 0, 1, 1], [], []>} : vector<16x5xf32>, vector<5x8xf32>, vector<16x8xf32> -> vector<16x8xf32>
    %cst_112 = arith.constant dense<0.000000e+00> : vector<16x8xf32>
    %269 = tpu.matmul %265, %198, %cst_112 {dimension_numbers = #tpu.dot_dimension_numbers<[1], [0], [0], [1], [0, 0, 1, 1], [], []>} : vector<16x5xf32>, vector<5x8xf32>, vector<16x8xf32> -> vector<16x8xf32>
    %270 = arith.addf %268, %269 : vector<16x8xf32>
    %271 = arith.mulf %254, %202 : vector<2x5xf32>
    %cst_113 = arith.constant 1.000000e+00 : f32
    %272 = vector.broadcast %cst_113 : f32 to vector<2x5xf32>
    %273 = arith.subf %272, %254 : vector<2x5xf32>
    %274 = arith.mulf %273, %203 : vector<2x5xf32>
    %275 = arith.addf %271, %274 : vector<2x5xf32>
    %276 = arith.addf %202, %203 : vector<2x5xf32>
    %277 = arith.subf %276, %275 : vector<2x5xf32>
    %cst_114 = arith.constant dense<0.000000e+00> : vector<2x8xf32>
    %278 = tpu.matmul %275, %198, %cst_114 {dimension_numbers = #tpu.dot_dimension_numbers<[1], [0], [0], [1], [0, 0, 1, 1], [], []>} : vector<2x5xf32>, vector<5x8xf32>, vector<2x8xf32> -> vector<2x8xf32>
    %cst_115 = arith.constant dense<0.000000e+00> : vector<2x8xf32>
    %279 = tpu.matmul %277, %201, %cst_115 {dimension_numbers = #tpu.dot_dimension_numbers<[1], [0], [0], [1], [0, 0, 1, 1], [], []>} : vector<2x5xf32>, vector<5x8xf32>, vector<2x8xf32> -> vector<2x8xf32>
    %280 = arith.addf %278, %279 : vector<2x8xf32>
    %c3_i32 = arith.constant 3 : i32
    %281 = arith.index_cast %c3_i32 : i32 to index
    %c0_116 = arith.constant 0 : index
    %c0_117 = arith.constant 0 : index
    %282 = vector.load %arg1[%281, %c0_116, %c0_117] : memref<8x8x5xf32, #tpu.memory_space<vmem>>, vector<1x8x5xf32>
    %283 = vector.shape_cast %282 : vector<1x8x5xf32> to vector<8x5xf32>
    %284 = arith.index_cast %c3_i32 : i32 to index
    %c0_118 = arith.constant 0 : index
    %c0_119 = arith.constant 0 : index
    %285 = vector.load %arg2[%284, %c0_118, %c0_119] : memref<8x8x5xf32, #tpu.memory_space<vmem>>, vector<1x8x5xf32>
    %286 = vector.shape_cast %285 : vector<1x8x5xf32> to vector<8x5xf32>
    %287 = arith.index_cast %c3_i32 : i32 to index
    %c0_120 = arith.constant 0 : index
    %c0_121 = arith.constant 0 : index
    %288 = vector.load %arg3[%287, %c0_120, %c0_121] : memref<8x5x8xf32, #tpu.memory_space<vmem>>, vector<1x5x8xf32>
    %289 = vector.shape_cast %288 : vector<1x5x8xf32> to vector<5x8xf32>
    %290 = arith.index_cast %c3_i32 : i32 to index
    %c0_122 = arith.constant 0 : index
    %c0_123 = arith.constant 0 : index
    %291 = vector.load %arg4[%290, %c0_122, %c0_123] : memref<8x5x8xf32, #tpu.memory_space<vmem>>, vector<1x5x8xf32>
    %292 = vector.shape_cast %291 : vector<1x5x8xf32> to vector<5x8xf32>
    %cst_124 = arith.constant dense<0.000000e+00> : vector<2x5xf32>
    %293 = tpu.matmul %280, %283, %cst_124 {dimension_numbers = #tpu.dot_dimension_numbers<[1], [0], [0], [1], [0, 0, 1, 1], [], []>} : vector<2x8xf32>, vector<8x5xf32>, vector<2x5xf32> -> vector<2x5xf32>
    %cst_125 = arith.constant dense<0.000000e+00> : vector<2x5xf32>
    %294 = tpu.matmul %280, %286, %cst_125 {dimension_numbers = #tpu.dot_dimension_numbers<[1], [0], [0], [1], [0, 0, 1, 1], [], []>} : vector<2x8xf32>, vector<8x5xf32>, vector<2x5xf32> -> vector<2x5xf32>
    %295 = arith.subf %294, %293 : vector<2x5xf32>
    %cst_126 = arith.constant 1.000000e+02 : f32
    %296 = vector.broadcast %cst_126 : f32 to vector<2x5xf32>
    %297 = arith.mulf %296, %295 : vector<2x5xf32>
    %cst_127 = arith.constant 0.000000e+00 : f32
    %298 = vector.broadcast %cst_127 : f32 to vector<2x5xf32>
    %299 = arith.cmpf olt, %297, %298 : vector<2x5xf32>
    %cst_128 = arith.constant -1.000000e+00 : f32
    %cst_129 = arith.constant 1.000000e+00 : f32
    %300 = vector.broadcast %cst_128 : f32 to vector<2x5xf32>
    %301 = vector.broadcast %cst_129 : f32 to vector<2x5xf32>
    %302 = arith.select %299, %300, %301 : vector<2x5xi1>, vector<2x5xf32>
    %303 = math.absf %297 : vector<2x5xf32>
    %cst_130 = arith.constant 2.41421366 : f32
    %304 = vector.broadcast %cst_130 : f32 to vector<2x5xf32>
    %305 = arith.cmpf ogt, %303, %304 : vector<2x5xf32>
    %cst_131 = arith.constant 0.414213568 : f32
    %306 = vector.broadcast %cst_131 : f32 to vector<2x5xf32>
    %307 = arith.cmpf ogt, %303, %306 : vector<2x5xf32>
    %cst_132 = arith.constant dense<true> : vector<2x5xi1>
    %308 = arith.xori %305, %cst_132 : vector<2x5xi1>
    %309 = arith.andi %307, %308 : vector<2x5xi1>
    %cst_133 = arith.constant 1.000000e+00 : f32
    %310 = vector.broadcast %cst_133 : f32 to vector<2x5xf32>
    %311 = arith.select %305, %303, %310 : vector<2x5xi1>, vector<2x5xf32>
    %cst_134 = arith.constant -1.000000e+00 : f32
    %312 = vector.broadcast %cst_134 : f32 to vector<2x5xf32>
    %313 = arith.divf %312, %311 : vector<2x5xf32>
    %cst_135 = arith.constant 1.000000e+00 : f32
    %314 = vector.broadcast %cst_135 : f32 to vector<2x5xf32>
    %315 = arith.subf %303, %314 : vector<2x5xf32>
    %cst_136 = arith.constant 1.000000e+00 : f32
    %316 = vector.broadcast %cst_136 : f32 to vector<2x5xf32>
    %317 = arith.addf %303, %316 : vector<2x5xf32>
    %318 = arith.divf %315, %317 : vector<2x5xf32>
    %319 = arith.select %309, %318, %303 : vector<2x5xi1>, vector<2x5xf32>
    %320 = arith.select %305, %313, %319 : vector<2x5xi1>, vector<2x5xf32>
    %cst_137 = arith.constant 0.785398185 : f32
    %cst_138 = arith.constant 0.000000e+00 : f32
    %321 = vector.broadcast %cst_137 : f32 to vector<2x5xf32>
    %322 = vector.broadcast %cst_138 : f32 to vector<2x5xf32>
    %323 = arith.select %309, %321, %322 : vector<2x5xi1>, vector<2x5xf32>
    %cst_139 = arith.constant 1.57079637 : f32
    %324 = vector.broadcast %cst_139 : f32 to vector<2x5xf32>
    %325 = arith.select %305, %324, %323 : vector<2x5xi1>, vector<2x5xf32>
    %326 = arith.mulf %320, %320 : vector<2x5xf32>
    %cst_140 = arith.constant 0.0805374458 : f32
    %327 = vector.broadcast %cst_140 : f32 to vector<2x5xf32>
    %328 = arith.mulf %327, %326 : vector<2x5xf32>
    %cst_141 = arith.constant 0.138776854 : f32
    %329 = vector.broadcast %cst_141 : f32 to vector<2x5xf32>
    %330 = arith.subf %328, %329 : vector<2x5xf32>
    %331 = arith.mulf %330, %326 : vector<2x5xf32>
    %cst_142 = arith.constant 0.199777111 : f32
    %332 = vector.broadcast %cst_142 : f32 to vector<2x5xf32>
    %333 = arith.addf %331, %332 : vector<2x5xf32>
    %334 = arith.mulf %333, %326 : vector<2x5xf32>
    %cst_143 = arith.constant 0.333329499 : f32
    %335 = vector.broadcast %cst_143 : f32 to vector<2x5xf32>
    %336 = arith.subf %334, %335 : vector<2x5xf32>
    %337 = arith.mulf %336, %326 : vector<2x5xf32>
    %338 = arith.mulf %337, %320 : vector<2x5xf32>
    %339 = arith.addf %338, %320 : vector<2x5xf32>
    %340 = arith.addf %325, %339 : vector<2x5xf32>
    %341 = arith.mulf %302, %340 : vector<2x5xf32>
    %cst_144 = arith.constant 0.318309873 : f32
    %342 = vector.broadcast %cst_144 : f32 to vector<2x5xf32>
    %343 = arith.mulf %341, %342 : vector<2x5xf32>
    %cst_145 = arith.constant 5.000000e-01 : f32
    %344 = vector.broadcast %cst_145 : f32 to vector<2x5xf32>
    %345 = arith.addf %343, %344 : vector<2x5xf32>
    %cst_146 = arith.constant dense<0.000000e+00> : vector<16x5xf32>
    %346 = tpu.matmul %270, %283, %cst_146 {dimension_numbers = #tpu.dot_dimension_numbers<[1], [0], [0], [1], [0, 0, 1, 1], [], []>} : vector<16x8xf32>, vector<8x5xf32>, vector<16x5xf32> -> vector<16x5xf32>
    %cst_147 = arith.constant dense<0.000000e+00> : vector<16x5xf32>
    %347 = tpu.matmul %270, %286, %cst_147 {dimension_numbers = #tpu.dot_dimension_numbers<[1], [0], [0], [1], [0, 0, 1, 1], [], []>} : vector<16x8xf32>, vector<8x5xf32>, vector<16x5xf32> -> vector<16x5xf32>
    %348 = vector.shape_cast %345 : vector<2x5xf32> to vector<2x1x5xf32>
    %349 = vector.shape_cast %348 : vector<2x1x5xf32> to vector<2x1x5xf32>
    %350 = vector.broadcast %349 : vector<2x1x5xf32> to vector<2x8x5xf32>
    %351 = vector.shape_cast %350 : vector<2x8x5xf32> to vector<16x5xf32>
    %352 = arith.mulf %351, %346 : vector<16x5xf32>
    %cst_148 = arith.constant 1.000000e+00 : f32
    %353 = vector.broadcast %cst_148 : f32 to vector<16x5xf32>
    %354 = arith.subf %353, %351 : vector<16x5xf32>
    %355 = arith.mulf %354, %347 : vector<16x5xf32>
    %356 = arith.addf %352, %355 : vector<16x5xf32>
    %357 = arith.addf %346, %347 : vector<16x5xf32>
    %358 = arith.subf %357, %356 : vector<16x5xf32>
    %cst_149 = arith.constant dense<0.000000e+00> : vector<16x8xf32>
    %359 = tpu.matmul %358, %292, %cst_149 {dimension_numbers = #tpu.dot_dimension_numbers<[1], [0], [0], [1], [0, 0, 1, 1], [], []>} : vector<16x5xf32>, vector<5x8xf32>, vector<16x8xf32> -> vector<16x8xf32>
    %cst_150 = arith.constant dense<0.000000e+00> : vector<16x8xf32>
    %360 = tpu.matmul %356, %289, %cst_150 {dimension_numbers = #tpu.dot_dimension_numbers<[1], [0], [0], [1], [0, 0, 1, 1], [], []>} : vector<16x5xf32>, vector<5x8xf32>, vector<16x8xf32> -> vector<16x8xf32>
    %361 = arith.addf %359, %360 : vector<16x8xf32>
    %362 = arith.mulf %345, %293 : vector<2x5xf32>
    %cst_151 = arith.constant 1.000000e+00 : f32
    %363 = vector.broadcast %cst_151 : f32 to vector<2x5xf32>
    %364 = arith.subf %363, %345 : vector<2x5xf32>
    %365 = arith.mulf %364, %294 : vector<2x5xf32>
    %366 = arith.addf %362, %365 : vector<2x5xf32>
    %367 = arith.addf %293, %294 : vector<2x5xf32>
    %368 = arith.subf %367, %366 : vector<2x5xf32>
    %cst_152 = arith.constant dense<0.000000e+00> : vector<2x8xf32>
    %369 = tpu.matmul %366, %289, %cst_152 {dimension_numbers = #tpu.dot_dimension_numbers<[1], [0], [0], [1], [0, 0, 1, 1], [], []>} : vector<2x5xf32>, vector<5x8xf32>, vector<2x8xf32> -> vector<2x8xf32>
    %cst_153 = arith.constant dense<0.000000e+00> : vector<2x8xf32>
    %370 = tpu.matmul %368, %292, %cst_153 {dimension_numbers = #tpu.dot_dimension_numbers<[1], [0], [0], [1], [0, 0, 1, 1], [], []>} : vector<2x5xf32>, vector<5x8xf32>, vector<2x8xf32> -> vector<2x8xf32>
    %371 = arith.addf %369, %370 : vector<2x8xf32>
    %c4_i32 = arith.constant 4 : i32
    %372 = arith.index_cast %c4_i32 : i32 to index
    %c0_154 = arith.constant 0 : index
    %c0_155 = arith.constant 0 : index
    %373 = vector.load %arg1[%372, %c0_154, %c0_155] : memref<8x8x5xf32, #tpu.memory_space<vmem>>, vector<1x8x5xf32>
    %374 = vector.shape_cast %373 : vector<1x8x5xf32> to vector<8x5xf32>
    %375 = arith.index_cast %c4_i32 : i32 to index
    %c0_156 = arith.constant 0 : index
    %c0_157 = arith.constant 0 : index
    %376 = vector.load %arg2[%375, %c0_156, %c0_157] : memref<8x8x5xf32, #tpu.memory_space<vmem>>, vector<1x8x5xf32>
    %377 = vector.shape_cast %376 : vector<1x8x5xf32> to vector<8x5xf32>
    %378 = arith.index_cast %c4_i32 : i32 to index
    %c0_158 = arith.constant 0 : index
    %c0_159 = arith.constant 0 : index
    %379 = vector.load %arg3[%378, %c0_158, %c0_159] : memref<8x5x8xf32, #tpu.memory_space<vmem>>, vector<1x5x8xf32>
    %380 = vector.shape_cast %379 : vector<1x5x8xf32> to vector<5x8xf32>
    %381 = arith.index_cast %c4_i32 : i32 to index
    %c0_160 = arith.constant 0 : index
    %c0_161 = arith.constant 0 : index
    %382 = vector.load %arg4[%381, %c0_160, %c0_161] : memref<8x5x8xf32, #tpu.memory_space<vmem>>, vector<1x5x8xf32>
    %383 = vector.shape_cast %382 : vector<1x5x8xf32> to vector<5x8xf32>
    %cst_162 = arith.constant dense<0.000000e+00> : vector<2x5xf32>
    %384 = tpu.matmul %371, %374, %cst_162 {dimension_numbers = #tpu.dot_dimension_numbers<[1], [0], [0], [1], [0, 0, 1, 1], [], []>} : vector<2x8xf32>, vector<8x5xf32>, vector<2x5xf32> -> vector<2x5xf32>
    %cst_163 = arith.constant dense<0.000000e+00> : vector<2x5xf32>
    %385 = tpu.matmul %371, %377, %cst_163 {dimension_numbers = #tpu.dot_dimension_numbers<[1], [0], [0], [1], [0, 0, 1, 1], [], []>} : vector<2x8xf32>, vector<8x5xf32>, vector<2x5xf32> -> vector<2x5xf32>
    %386 = arith.subf %385, %384 : vector<2x5xf32>
    %cst_164 = arith.constant 1.000000e+02 : f32
    %387 = vector.broadcast %cst_164 : f32 to vector<2x5xf32>
    %388 = arith.mulf %387, %386 : vector<2x5xf32>
    %cst_165 = arith.constant 0.000000e+00 : f32
    %389 = vector.broadcast %cst_165 : f32 to vector<2x5xf32>
    %390 = arith.cmpf olt, %388, %389 : vector<2x5xf32>
    %cst_166 = arith.constant -1.000000e+00 : f32
    %cst_167 = arith.constant 1.000000e+00 : f32
    %391 = vector.broadcast %cst_166 : f32 to vector<2x5xf32>
    %392 = vector.broadcast %cst_167 : f32 to vector<2x5xf32>
    %393 = arith.select %390, %391, %392 : vector<2x5xi1>, vector<2x5xf32>
    %394 = math.absf %388 : vector<2x5xf32>
    %cst_168 = arith.constant 2.41421366 : f32
    %395 = vector.broadcast %cst_168 : f32 to vector<2x5xf32>
    %396 = arith.cmpf ogt, %394, %395 : vector<2x5xf32>
    %cst_169 = arith.constant 0.414213568 : f32
    %397 = vector.broadcast %cst_169 : f32 to vector<2x5xf32>
    %398 = arith.cmpf ogt, %394, %397 : vector<2x5xf32>
    %cst_170 = arith.constant dense<true> : vector<2x5xi1>
    %399 = arith.xori %396, %cst_170 : vector<2x5xi1>
    %400 = arith.andi %398, %399 : vector<2x5xi1>
    %cst_171 = arith.constant 1.000000e+00 : f32
    %401 = vector.broadcast %cst_171 : f32 to vector<2x5xf32>
    %402 = arith.select %396, %394, %401 : vector<2x5xi1>, vector<2x5xf32>
    %cst_172 = arith.constant -1.000000e+00 : f32
    %403 = vector.broadcast %cst_172 : f32 to vector<2x5xf32>
    %404 = arith.divf %403, %402 : vector<2x5xf32>
    %cst_173 = arith.constant 1.000000e+00 : f32
    %405 = vector.broadcast %cst_173 : f32 to vector<2x5xf32>
    %406 = arith.subf %394, %405 : vector<2x5xf32>
    %cst_174 = arith.constant 1.000000e+00 : f32
    %407 = vector.broadcast %cst_174 : f32 to vector<2x5xf32>
    %408 = arith.addf %394, %407 : vector<2x5xf32>
    %409 = arith.divf %406, %408 : vector<2x5xf32>
    %410 = arith.select %400, %409, %394 : vector<2x5xi1>, vector<2x5xf32>
    %411 = arith.select %396, %404, %410 : vector<2x5xi1>, vector<2x5xf32>
    %cst_175 = arith.constant 0.785398185 : f32
    %cst_176 = arith.constant 0.000000e+00 : f32
    %412 = vector.broadcast %cst_175 : f32 to vector<2x5xf32>
    %413 = vector.broadcast %cst_176 : f32 to vector<2x5xf32>
    %414 = arith.select %400, %412, %413 : vector<2x5xi1>, vector<2x5xf32>
    %cst_177 = arith.constant 1.57079637 : f32
    %415 = vector.broadcast %cst_177 : f32 to vector<2x5xf32>
    %416 = arith.select %396, %415, %414 : vector<2x5xi1>, vector<2x5xf32>
    %417 = arith.mulf %411, %411 : vector<2x5xf32>
    %cst_178 = arith.constant 0.0805374458 : f32
    %418 = vector.broadcast %cst_178 : f32 to vector<2x5xf32>
    %419 = arith.mulf %418, %417 : vector<2x5xf32>
    %cst_179 = arith.constant 0.138776854 : f32
    %420 = vector.broadcast %cst_179 : f32 to vector<2x5xf32>
    %421 = arith.subf %419, %420 : vector<2x5xf32>
    %422 = arith.mulf %421, %417 : vector<2x5xf32>
    %cst_180 = arith.constant 0.199777111 : f32
    %423 = vector.broadcast %cst_180 : f32 to vector<2x5xf32>
    %424 = arith.addf %422, %423 : vector<2x5xf32>
    %425 = arith.mulf %424, %417 : vector<2x5xf32>
    %cst_181 = arith.constant 0.333329499 : f32
    %426 = vector.broadcast %cst_181 : f32 to vector<2x5xf32>
    %427 = arith.subf %425, %426 : vector<2x5xf32>
    %428 = arith.mulf %427, %417 : vector<2x5xf32>
    %429 = arith.mulf %428, %411 : vector<2x5xf32>
    %430 = arith.addf %429, %411 : vector<2x5xf32>
    %431 = arith.addf %416, %430 : vector<2x5xf32>
    %432 = arith.mulf %393, %431 : vector<2x5xf32>
    %cst_182 = arith.constant 0.318309873 : f32
    %433 = vector.broadcast %cst_182 : f32 to vector<2x5xf32>
    %434 = arith.mulf %432, %433 : vector<2x5xf32>
    %cst_183 = arith.constant 5.000000e-01 : f32
    %435 = vector.broadcast %cst_183 : f32 to vector<2x5xf32>
    %436 = arith.addf %434, %435 : vector<2x5xf32>
    %cst_184 = arith.constant dense<0.000000e+00> : vector<16x5xf32>
    %437 = tpu.matmul %361, %374, %cst_184 {dimension_numbers = #tpu.dot_dimension_numbers<[1], [0], [0], [1], [0, 0, 1, 1], [], []>} : vector<16x8xf32>, vector<8x5xf32>, vector<16x5xf32> -> vector<16x5xf32>
    %cst_185 = arith.constant dense<0.000000e+00> : vector<16x5xf32>
    %438 = tpu.matmul %361, %377, %cst_185 {dimension_numbers = #tpu.dot_dimension_numbers<[1], [0], [0], [1], [0, 0, 1, 1], [], []>} : vector<16x8xf32>, vector<8x5xf32>, vector<16x5xf32> -> vector<16x5xf32>
    %439 = vector.shape_cast %436 : vector<2x5xf32> to vector<2x1x5xf32>
    %440 = vector.shape_cast %439 : vector<2x1x5xf32> to vector<2x1x5xf32>
    %441 = vector.broadcast %440 : vector<2x1x5xf32> to vector<2x8x5xf32>
    %442 = vector.shape_cast %441 : vector<2x8x5xf32> to vector<16x5xf32>
    %443 = arith.mulf %442, %437 : vector<16x5xf32>
    %cst_186 = arith.constant 1.000000e+00 : f32
    %444 = vector.broadcast %cst_186 : f32 to vector<16x5xf32>
    %445 = arith.subf %444, %442 : vector<16x5xf32>
    %446 = arith.mulf %445, %438 : vector<16x5xf32>
    %447 = arith.addf %443, %446 : vector<16x5xf32>
    %448 = arith.addf %437, %438 : vector<16x5xf32>
    %449 = arith.subf %448, %447 : vector<16x5xf32>
    %cst_187 = arith.constant dense<0.000000e+00> : vector<16x8xf32>
    %450 = tpu.matmul %449, %383, %cst_187 {dimension_numbers = #tpu.dot_dimension_numbers<[1], [0], [0], [1], [0, 0, 1, 1], [], []>} : vector<16x5xf32>, vector<5x8xf32>, vector<16x8xf32> -> vector<16x8xf32>
    %cst_188 = arith.constant dense<0.000000e+00> : vector<16x8xf32>
    %451 = tpu.matmul %447, %380, %cst_188 {dimension_numbers = #tpu.dot_dimension_numbers<[1], [0], [0], [1], [0, 0, 1, 1], [], []>} : vector<16x5xf32>, vector<5x8xf32>, vector<16x8xf32> -> vector<16x8xf32>
    %452 = arith.addf %450, %451 : vector<16x8xf32>
    %453 = arith.mulf %436, %384 : vector<2x5xf32>
    %cst_189 = arith.constant 1.000000e+00 : f32
    %454 = vector.broadcast %cst_189 : f32 to vector<2x5xf32>
    %455 = arith.subf %454, %436 : vector<2x5xf32>
    %456 = arith.mulf %455, %385 : vector<2x5xf32>
    %457 = arith.addf %453, %456 : vector<2x5xf32>
    %458 = arith.addf %384, %385 : vector<2x5xf32>
    %459 = arith.subf %458, %457 : vector<2x5xf32>
    %cst_190 = arith.constant dense<0.000000e+00> : vector<2x8xf32>
    %460 = tpu.matmul %457, %380, %cst_190 {dimension_numbers = #tpu.dot_dimension_numbers<[1], [0], [0], [1], [0, 0, 1, 1], [], []>} : vector<2x5xf32>, vector<5x8xf32>, vector<2x8xf32> -> vector<2x8xf32>
    %cst_191 = arith.constant dense<0.000000e+00> : vector<2x8xf32>
    %461 = tpu.matmul %459, %383, %cst_191 {dimension_numbers = #tpu.dot_dimension_numbers<[1], [0], [0], [1], [0, 0, 1, 1], [], []>} : vector<2x5xf32>, vector<5x8xf32>, vector<2x8xf32> -> vector<2x8xf32>
    %462 = arith.addf %460, %461 : vector<2x8xf32>
    %c5_i32 = arith.constant 5 : i32
    %463 = arith.index_cast %c5_i32 : i32 to index
    %c0_192 = arith.constant 0 : index
    %c0_193 = arith.constant 0 : index
    %464 = vector.load %arg1[%463, %c0_192, %c0_193] : memref<8x8x5xf32, #tpu.memory_space<vmem>>, vector<1x8x5xf32>
    %465 = vector.shape_cast %464 : vector<1x8x5xf32> to vector<8x5xf32>
    %466 = arith.index_cast %c5_i32 : i32 to index
    %c0_194 = arith.constant 0 : index
    %c0_195 = arith.constant 0 : index
    %467 = vector.load %arg2[%466, %c0_194, %c0_195] : memref<8x8x5xf32, #tpu.memory_space<vmem>>, vector<1x8x5xf32>
    %468 = vector.shape_cast %467 : vector<1x8x5xf32> to vector<8x5xf32>
    %469 = arith.index_cast %c5_i32 : i32 to index
    %c0_196 = arith.constant 0 : index
    %c0_197 = arith.constant 0 : index
    %470 = vector.load %arg3[%469, %c0_196, %c0_197] : memref<8x5x8xf32, #tpu.memory_space<vmem>>, vector<1x5x8xf32>
    %471 = vector.shape_cast %470 : vector<1x5x8xf32> to vector<5x8xf32>
    %472 = arith.index_cast %c5_i32 : i32 to index
    %c0_198 = arith.constant 0 : index
    %c0_199 = arith.constant 0 : index
    %473 = vector.load %arg4[%472, %c0_198, %c0_199] : memref<8x5x8xf32, #tpu.memory_space<vmem>>, vector<1x5x8xf32>
    %474 = vector.shape_cast %473 : vector<1x5x8xf32> to vector<5x8xf32>
    %cst_200 = arith.constant dense<0.000000e+00> : vector<2x5xf32>
    %475 = tpu.matmul %462, %465, %cst_200 {dimension_numbers = #tpu.dot_dimension_numbers<[1], [0], [0], [1], [0, 0, 1, 1], [], []>} : vector<2x8xf32>, vector<8x5xf32>, vector<2x5xf32> -> vector<2x5xf32>
    %cst_201 = arith.constant dense<0.000000e+00> : vector<2x5xf32>
    %476 = tpu.matmul %462, %468, %cst_201 {dimension_numbers = #tpu.dot_dimension_numbers<[1], [0], [0], [1], [0, 0, 1, 1], [], []>} : vector<2x8xf32>, vector<8x5xf32>, vector<2x5xf32> -> vector<2x5xf32>
    %477 = arith.subf %476, %475 : vector<2x5xf32>
    %cst_202 = arith.constant 1.000000e+02 : f32
    %478 = vector.broadcast %cst_202 : f32 to vector<2x5xf32>
    %479 = arith.mulf %478, %477 : vector<2x5xf32>
    %cst_203 = arith.constant 0.000000e+00 : f32
    %480 = vector.broadcast %cst_203 : f32 to vector<2x5xf32>
    %481 = arith.cmpf olt, %479, %480 : vector<2x5xf32>
    %cst_204 = arith.constant -1.000000e+00 : f32
    %cst_205 = arith.constant 1.000000e+00 : f32
    %482 = vector.broadcast %cst_204 : f32 to vector<2x5xf32>
    %483 = vector.broadcast %cst_205 : f32 to vector<2x5xf32>
    %484 = arith.select %481, %482, %483 : vector<2x5xi1>, vector<2x5xf32>
    %485 = math.absf %479 : vector<2x5xf32>
    %cst_206 = arith.constant 2.41421366 : f32
    %486 = vector.broadcast %cst_206 : f32 to vector<2x5xf32>
    %487 = arith.cmpf ogt, %485, %486 : vector<2x5xf32>
    %cst_207 = arith.constant 0.414213568 : f32
    %488 = vector.broadcast %cst_207 : f32 to vector<2x5xf32>
    %489 = arith.cmpf ogt, %485, %488 : vector<2x5xf32>
    %cst_208 = arith.constant dense<true> : vector<2x5xi1>
    %490 = arith.xori %487, %cst_208 : vector<2x5xi1>
    %491 = arith.andi %489, %490 : vector<2x5xi1>
    %cst_209 = arith.constant 1.000000e+00 : f32
    %492 = vector.broadcast %cst_209 : f32 to vector<2x5xf32>
    %493 = arith.select %487, %485, %492 : vector<2x5xi1>, vector<2x5xf32>
    %cst_210 = arith.constant -1.000000e+00 : f32
    %494 = vector.broadcast %cst_210 : f32 to vector<2x5xf32>
    %495 = arith.divf %494, %493 : vector<2x5xf32>
    %cst_211 = arith.constant 1.000000e+00 : f32
    %496 = vector.broadcast %cst_211 : f32 to vector<2x5xf32>
    %497 = arith.subf %485, %496 : vector<2x5xf32>
    %cst_212 = arith.constant 1.000000e+00 : f32
    %498 = vector.broadcast %cst_212 : f32 to vector<2x5xf32>
    %499 = arith.addf %485, %498 : vector<2x5xf32>
    %500 = arith.divf %497, %499 : vector<2x5xf32>
    %501 = arith.select %491, %500, %485 : vector<2x5xi1>, vector<2x5xf32>
    %502 = arith.select %487, %495, %501 : vector<2x5xi1>, vector<2x5xf32>
    %cst_213 = arith.constant 0.785398185 : f32
    %cst_214 = arith.constant 0.000000e+00 : f32
    %503 = vector.broadcast %cst_213 : f32 to vector<2x5xf32>
    %504 = vector.broadcast %cst_214 : f32 to vector<2x5xf32>
    %505 = arith.select %491, %503, %504 : vector<2x5xi1>, vector<2x5xf32>
    %cst_215 = arith.constant 1.57079637 : f32
    %506 = vector.broadcast %cst_215 : f32 to vector<2x5xf32>
    %507 = arith.select %487, %506, %505 : vector<2x5xi1>, vector<2x5xf32>
    %508 = arith.mulf %502, %502 : vector<2x5xf32>
    %cst_216 = arith.constant 0.0805374458 : f32
    %509 = vector.broadcast %cst_216 : f32 to vector<2x5xf32>
    %510 = arith.mulf %509, %508 : vector<2x5xf32>
    %cst_217 = arith.constant 0.138776854 : f32
    %511 = vector.broadcast %cst_217 : f32 to vector<2x5xf32>
    %512 = arith.subf %510, %511 : vector<2x5xf32>
    %513 = arith.mulf %512, %508 : vector<2x5xf32>
    %cst_218 = arith.constant 0.199777111 : f32
    %514 = vector.broadcast %cst_218 : f32 to vector<2x5xf32>
    %515 = arith.addf %513, %514 : vector<2x5xf32>
    %516 = arith.mulf %515, %508 : vector<2x5xf32>
    %cst_219 = arith.constant 0.333329499 : f32
    %517 = vector.broadcast %cst_219 : f32 to vector<2x5xf32>
    %518 = arith.subf %516, %517 : vector<2x5xf32>
    %519 = arith.mulf %518, %508 : vector<2x5xf32>
    %520 = arith.mulf %519, %502 : vector<2x5xf32>
    %521 = arith.addf %520, %502 : vector<2x5xf32>
    %522 = arith.addf %507, %521 : vector<2x5xf32>
    %523 = arith.mulf %484, %522 : vector<2x5xf32>
    %cst_220 = arith.constant 0.318309873 : f32
    %524 = vector.broadcast %cst_220 : f32 to vector<2x5xf32>
    %525 = arith.mulf %523, %524 : vector<2x5xf32>
    %cst_221 = arith.constant 5.000000e-01 : f32
    %526 = vector.broadcast %cst_221 : f32 to vector<2x5xf32>
    %527 = arith.addf %525, %526 : vector<2x5xf32>
    %cst_222 = arith.constant dense<0.000000e+00> : vector<16x5xf32>
    %528 = tpu.matmul %452, %465, %cst_222 {dimension_numbers = #tpu.dot_dimension_numbers<[1], [0], [0], [1], [0, 0, 1, 1], [], []>} : vector<16x8xf32>, vector<8x5xf32>, vector<16x5xf32> -> vector<16x5xf32>
    %cst_223 = arith.constant dense<0.000000e+00> : vector<16x5xf32>
    %529 = tpu.matmul %452, %468, %cst_223 {dimension_numbers = #tpu.dot_dimension_numbers<[1], [0], [0], [1], [0, 0, 1, 1], [], []>} : vector<16x8xf32>, vector<8x5xf32>, vector<16x5xf32> -> vector<16x5xf32>
    %530 = vector.shape_cast %527 : vector<2x5xf32> to vector<2x1x5xf32>
    %531 = vector.shape_cast %530 : vector<2x1x5xf32> to vector<2x1x5xf32>
    %532 = vector.broadcast %531 : vector<2x1x5xf32> to vector<2x8x5xf32>
    %533 = vector.shape_cast %532 : vector<2x8x5xf32> to vector<16x5xf32>
    %534 = arith.mulf %533, %528 : vector<16x5xf32>
    %cst_224 = arith.constant 1.000000e+00 : f32
    %535 = vector.broadcast %cst_224 : f32 to vector<16x5xf32>
    %536 = arith.subf %535, %533 : vector<16x5xf32>
    %537 = arith.mulf %536, %529 : vector<16x5xf32>
    %538 = arith.addf %534, %537 : vector<16x5xf32>
    %539 = arith.addf %528, %529 : vector<16x5xf32>
    %540 = arith.subf %539, %538 : vector<16x5xf32>
    %cst_225 = arith.constant dense<0.000000e+00> : vector<16x8xf32>
    %541 = tpu.matmul %540, %474, %cst_225 {dimension_numbers = #tpu.dot_dimension_numbers<[1], [0], [0], [1], [0, 0, 1, 1], [], []>} : vector<16x5xf32>, vector<5x8xf32>, vector<16x8xf32> -> vector<16x8xf32>
    %cst_226 = arith.constant dense<0.000000e+00> : vector<16x8xf32>
    %542 = tpu.matmul %538, %471, %cst_226 {dimension_numbers = #tpu.dot_dimension_numbers<[1], [0], [0], [1], [0, 0, 1, 1], [], []>} : vector<16x5xf32>, vector<5x8xf32>, vector<16x8xf32> -> vector<16x8xf32>
    %543 = arith.addf %541, %542 : vector<16x8xf32>
    %544 = arith.mulf %527, %475 : vector<2x5xf32>
    %cst_227 = arith.constant 1.000000e+00 : f32
    %545 = vector.broadcast %cst_227 : f32 to vector<2x5xf32>
    %546 = arith.subf %545, %527 : vector<2x5xf32>
    %547 = arith.mulf %546, %476 : vector<2x5xf32>
    %548 = arith.addf %544, %547 : vector<2x5xf32>
    %549 = arith.addf %475, %476 : vector<2x5xf32>
    %550 = arith.subf %549, %548 : vector<2x5xf32>
    %cst_228 = arith.constant dense<0.000000e+00> : vector<2x8xf32>
    %551 = tpu.matmul %548, %471, %cst_228 {dimension_numbers = #tpu.dot_dimension_numbers<[1], [0], [0], [1], [0, 0, 1, 1], [], []>} : vector<2x5xf32>, vector<5x8xf32>, vector<2x8xf32> -> vector<2x8xf32>
    %cst_229 = arith.constant dense<0.000000e+00> : vector<2x8xf32>
    %552 = tpu.matmul %550, %474, %cst_229 {dimension_numbers = #tpu.dot_dimension_numbers<[1], [0], [0], [1], [0, 0, 1, 1], [], []>} : vector<2x5xf32>, vector<5x8xf32>, vector<2x8xf32> -> vector<2x8xf32>
    %553 = arith.addf %551, %552 : vector<2x8xf32>
    %c6_i32 = arith.constant 6 : i32
    %554 = arith.index_cast %c6_i32 : i32 to index
    %c0_230 = arith.constant 0 : index
    %c0_231 = arith.constant 0 : index
    %555 = vector.load %arg1[%554, %c0_230, %c0_231] : memref<8x8x5xf32, #tpu.memory_space<vmem>>, vector<1x8x5xf32>
    %556 = vector.shape_cast %555 : vector<1x8x5xf32> to vector<8x5xf32>
    %557 = arith.index_cast %c6_i32 : i32 to index
    %c0_232 = arith.constant 0 : index
    %c0_233 = arith.constant 0 : index
    %558 = vector.load %arg2[%557, %c0_232, %c0_233] : memref<8x8x5xf32, #tpu.memory_space<vmem>>, vector<1x8x5xf32>
    %559 = vector.shape_cast %558 : vector<1x8x5xf32> to vector<8x5xf32>
    %560 = arith.index_cast %c6_i32 : i32 to index
    %c0_234 = arith.constant 0 : index
    %c0_235 = arith.constant 0 : index
    %561 = vector.load %arg3[%560, %c0_234, %c0_235] : memref<8x5x8xf32, #tpu.memory_space<vmem>>, vector<1x5x8xf32>
    %562 = vector.shape_cast %561 : vector<1x5x8xf32> to vector<5x8xf32>
    %563 = arith.index_cast %c6_i32 : i32 to index
    %c0_236 = arith.constant 0 : index
    %c0_237 = arith.constant 0 : index
    %564 = vector.load %arg4[%563, %c0_236, %c0_237] : memref<8x5x8xf32, #tpu.memory_space<vmem>>, vector<1x5x8xf32>
    %565 = vector.shape_cast %564 : vector<1x5x8xf32> to vector<5x8xf32>
    %cst_238 = arith.constant dense<0.000000e+00> : vector<2x5xf32>
    %566 = tpu.matmul %553, %556, %cst_238 {dimension_numbers = #tpu.dot_dimension_numbers<[1], [0], [0], [1], [0, 0, 1, 1], [], []>} : vector<2x8xf32>, vector<8x5xf32>, vector<2x5xf32> -> vector<2x5xf32>
    %cst_239 = arith.constant dense<0.000000e+00> : vector<2x5xf32>
    %567 = tpu.matmul %553, %559, %cst_239 {dimension_numbers = #tpu.dot_dimension_numbers<[1], [0], [0], [1], [0, 0, 1, 1], [], []>} : vector<2x8xf32>, vector<8x5xf32>, vector<2x5xf32> -> vector<2x5xf32>
    %568 = arith.subf %567, %566 : vector<2x5xf32>
    %cst_240 = arith.constant 1.000000e+02 : f32
    %569 = vector.broadcast %cst_240 : f32 to vector<2x5xf32>
    %570 = arith.mulf %569, %568 : vector<2x5xf32>
    %cst_241 = arith.constant 0.000000e+00 : f32
    %571 = vector.broadcast %cst_241 : f32 to vector<2x5xf32>
    %572 = arith.cmpf olt, %570, %571 : vector<2x5xf32>
    %cst_242 = arith.constant -1.000000e+00 : f32
    %cst_243 = arith.constant 1.000000e+00 : f32
    %573 = vector.broadcast %cst_242 : f32 to vector<2x5xf32>
    %574 = vector.broadcast %cst_243 : f32 to vector<2x5xf32>
    %575 = arith.select %572, %573, %574 : vector<2x5xi1>, vector<2x5xf32>
    %576 = math.absf %570 : vector<2x5xf32>
    %cst_244 = arith.constant 2.41421366 : f32
    %577 = vector.broadcast %cst_244 : f32 to vector<2x5xf32>
    %578 = arith.cmpf ogt, %576, %577 : vector<2x5xf32>
    %cst_245 = arith.constant 0.414213568 : f32
    %579 = vector.broadcast %cst_245 : f32 to vector<2x5xf32>
    %580 = arith.cmpf ogt, %576, %579 : vector<2x5xf32>
    %cst_246 = arith.constant dense<true> : vector<2x5xi1>
    %581 = arith.xori %578, %cst_246 : vector<2x5xi1>
    %582 = arith.andi %580, %581 : vector<2x5xi1>
    %cst_247 = arith.constant 1.000000e+00 : f32
    %583 = vector.broadcast %cst_247 : f32 to vector<2x5xf32>
    %584 = arith.select %578, %576, %583 : vector<2x5xi1>, vector<2x5xf32>
    %cst_248 = arith.constant -1.000000e+00 : f32
    %585 = vector.broadcast %cst_248 : f32 to vector<2x5xf32>
    %586 = arith.divf %585, %584 : vector<2x5xf32>
    %cst_249 = arith.constant 1.000000e+00 : f32
    %587 = vector.broadcast %cst_249 : f32 to vector<2x5xf32>
    %588 = arith.subf %576, %587 : vector<2x5xf32>
    %cst_250 = arith.constant 1.000000e+00 : f32
    %589 = vector.broadcast %cst_250 : f32 to vector<2x5xf32>
    %590 = arith.addf %576, %589 : vector<2x5xf32>
    %591 = arith.divf %588, %590 : vector<2x5xf32>
    %592 = arith.select %582, %591, %576 : vector<2x5xi1>, vector<2x5xf32>
    %593 = arith.select %578, %586, %592 : vector<2x5xi1>, vector<2x5xf32>
    %cst_251 = arith.constant 0.785398185 : f32
    %cst_252 = arith.constant 0.000000e+00 : f32
    %594 = vector.broadcast %cst_251 : f32 to vector<2x5xf32>
    %595 = vector.broadcast %cst_252 : f32 to vector<2x5xf32>
    %596 = arith.select %582, %594, %595 : vector<2x5xi1>, vector<2x5xf32>
    %cst_253 = arith.constant 1.57079637 : f32
    %597 = vector.broadcast %cst_253 : f32 to vector<2x5xf32>
    %598 = arith.select %578, %597, %596 : vector<2x5xi1>, vector<2x5xf32>
    %599 = arith.mulf %593, %593 : vector<2x5xf32>
    %cst_254 = arith.constant 0.0805374458 : f32
    %600 = vector.broadcast %cst_254 : f32 to vector<2x5xf32>
    %601 = arith.mulf %600, %599 : vector<2x5xf32>
    %cst_255 = arith.constant 0.138776854 : f32
    %602 = vector.broadcast %cst_255 : f32 to vector<2x5xf32>
    %603 = arith.subf %601, %602 : vector<2x5xf32>
    %604 = arith.mulf %603, %599 : vector<2x5xf32>
    %cst_256 = arith.constant 0.199777111 : f32
    %605 = vector.broadcast %cst_256 : f32 to vector<2x5xf32>
    %606 = arith.addf %604, %605 : vector<2x5xf32>
    %607 = arith.mulf %606, %599 : vector<2x5xf32>
    %cst_257 = arith.constant 0.333329499 : f32
    %608 = vector.broadcast %cst_257 : f32 to vector<2x5xf32>
    %609 = arith.subf %607, %608 : vector<2x5xf32>
    %610 = arith.mulf %609, %599 : vector<2x5xf32>
    %611 = arith.mulf %610, %593 : vector<2x5xf32>
    %612 = arith.addf %611, %593 : vector<2x5xf32>
    %613 = arith.addf %598, %612 : vector<2x5xf32>
    %614 = arith.mulf %575, %613 : vector<2x5xf32>
    %cst_258 = arith.constant 0.318309873 : f32
    %615 = vector.broadcast %cst_258 : f32 to vector<2x5xf32>
    %616 = arith.mulf %614, %615 : vector<2x5xf32>
    %cst_259 = arith.constant 5.000000e-01 : f32
    %617 = vector.broadcast %cst_259 : f32 to vector<2x5xf32>
    %618 = arith.addf %616, %617 : vector<2x5xf32>
    %cst_260 = arith.constant dense<0.000000e+00> : vector<16x5xf32>
    %619 = tpu.matmul %543, %556, %cst_260 {dimension_numbers = #tpu.dot_dimension_numbers<[1], [0], [0], [1], [0, 0, 1, 1], [], []>} : vector<16x8xf32>, vector<8x5xf32>, vector<16x5xf32> -> vector<16x5xf32>
    %cst_261 = arith.constant dense<0.000000e+00> : vector<16x5xf32>
    %620 = tpu.matmul %543, %559, %cst_261 {dimension_numbers = #tpu.dot_dimension_numbers<[1], [0], [0], [1], [0, 0, 1, 1], [], []>} : vector<16x8xf32>, vector<8x5xf32>, vector<16x5xf32> -> vector<16x5xf32>
    %621 = vector.shape_cast %618 : vector<2x5xf32> to vector<2x1x5xf32>
    %622 = vector.shape_cast %621 : vector<2x1x5xf32> to vector<2x1x5xf32>
    %623 = vector.broadcast %622 : vector<2x1x5xf32> to vector<2x8x5xf32>
    %624 = vector.shape_cast %623 : vector<2x8x5xf32> to vector<16x5xf32>
    %625 = arith.mulf %624, %619 : vector<16x5xf32>
    %cst_262 = arith.constant 1.000000e+00 : f32
    %626 = vector.broadcast %cst_262 : f32 to vector<16x5xf32>
    %627 = arith.subf %626, %624 : vector<16x5xf32>
    %628 = arith.mulf %627, %620 : vector<16x5xf32>
    %629 = arith.addf %625, %628 : vector<16x5xf32>
    %630 = arith.addf %619, %620 : vector<16x5xf32>
    %631 = arith.subf %630, %629 : vector<16x5xf32>
    %cst_263 = arith.constant dense<0.000000e+00> : vector<16x8xf32>
    %632 = tpu.matmul %631, %565, %cst_263 {dimension_numbers = #tpu.dot_dimension_numbers<[1], [0], [0], [1], [0, 0, 1, 1], [], []>} : vector<16x5xf32>, vector<5x8xf32>, vector<16x8xf32> -> vector<16x8xf32>
    %cst_264 = arith.constant dense<0.000000e+00> : vector<16x8xf32>
    %633 = tpu.matmul %629, %562, %cst_264 {dimension_numbers = #tpu.dot_dimension_numbers<[1], [0], [0], [1], [0, 0, 1, 1], [], []>} : vector<16x5xf32>, vector<5x8xf32>, vector<16x8xf32> -> vector<16x8xf32>
    %634 = arith.addf %632, %633 : vector<16x8xf32>
    %635 = arith.mulf %618, %566 : vector<2x5xf32>
    %cst_265 = arith.constant 1.000000e+00 : f32
    %636 = vector.broadcast %cst_265 : f32 to vector<2x5xf32>
    %637 = arith.subf %636, %618 : vector<2x5xf32>
    %638 = arith.mulf %637, %567 : vector<2x5xf32>
    %639 = arith.addf %635, %638 : vector<2x5xf32>
    %640 = arith.addf %566, %567 : vector<2x5xf32>
    %641 = arith.subf %640, %639 : vector<2x5xf32>
    %cst_266 = arith.constant dense<0.000000e+00> : vector<2x8xf32>
    %642 = tpu.matmul %639, %562, %cst_266 {dimension_numbers = #tpu.dot_dimension_numbers<[1], [0], [0], [1], [0, 0, 1, 1], [], []>} : vector<2x5xf32>, vector<5x8xf32>, vector<2x8xf32> -> vector<2x8xf32>
    %cst_267 = arith.constant dense<0.000000e+00> : vector<2x8xf32>
    %643 = tpu.matmul %641, %565, %cst_267 {dimension_numbers = #tpu.dot_dimension_numbers<[1], [0], [0], [1], [0, 0, 1, 1], [], []>} : vector<2x5xf32>, vector<5x8xf32>, vector<2x8xf32> -> vector<2x8xf32>
    %644 = arith.addf %642, %643 : vector<2x8xf32>
    %c7_i32 = arith.constant 7 : i32
    %645 = arith.index_cast %c7_i32 : i32 to index
    %c0_268 = arith.constant 0 : index
    %c0_269 = arith.constant 0 : index
    %646 = vector.load %arg1[%645, %c0_268, %c0_269] : memref<8x8x5xf32, #tpu.memory_space<vmem>>, vector<1x8x5xf32>
    %647 = vector.shape_cast %646 : vector<1x8x5xf32> to vector<8x5xf32>
    %648 = arith.index_cast %c7_i32 : i32 to index
    %c0_270 = arith.constant 0 : index
    %c0_271 = arith.constant 0 : index
    %649 = vector.load %arg2[%648, %c0_270, %c0_271] : memref<8x8x5xf32, #tpu.memory_space<vmem>>, vector<1x8x5xf32>
    %650 = vector.shape_cast %649 : vector<1x8x5xf32> to vector<8x5xf32>
    %651 = arith.index_cast %c7_i32 : i32 to index
    %c0_272 = arith.constant 0 : index
    %c0_273 = arith.constant 0 : index
    %652 = vector.load %arg3[%651, %c0_272, %c0_273] : memref<8x5x8xf32, #tpu.memory_space<vmem>>, vector<1x5x8xf32>
    %653 = vector.shape_cast %652 : vector<1x5x8xf32> to vector<5x8xf32>
    %654 = arith.index_cast %c7_i32 : i32 to index
    %c0_274 = arith.constant 0 : index
    %c0_275 = arith.constant 0 : index
    %655 = vector.load %arg4[%654, %c0_274, %c0_275] : memref<8x5x8xf32, #tpu.memory_space<vmem>>, vector<1x5x8xf32>
    %656 = vector.shape_cast %655 : vector<1x5x8xf32> to vector<5x8xf32>
    %cst_276 = arith.constant dense<0.000000e+00> : vector<2x5xf32>
    %657 = tpu.matmul %644, %647, %cst_276 {dimension_numbers = #tpu.dot_dimension_numbers<[1], [0], [0], [1], [0, 0, 1, 1], [], []>} : vector<2x8xf32>, vector<8x5xf32>, vector<2x5xf32> -> vector<2x5xf32>
    %cst_277 = arith.constant dense<0.000000e+00> : vector<2x5xf32>
    %658 = tpu.matmul %644, %650, %cst_277 {dimension_numbers = #tpu.dot_dimension_numbers<[1], [0], [0], [1], [0, 0, 1, 1], [], []>} : vector<2x8xf32>, vector<8x5xf32>, vector<2x5xf32> -> vector<2x5xf32>
    %659 = arith.subf %658, %657 : vector<2x5xf32>
    %cst_278 = arith.constant 1.000000e+02 : f32
    %660 = vector.broadcast %cst_278 : f32 to vector<2x5xf32>
    %661 = arith.mulf %660, %659 : vector<2x5xf32>
    %cst_279 = arith.constant 0.000000e+00 : f32
    %662 = vector.broadcast %cst_279 : f32 to vector<2x5xf32>
    %663 = arith.cmpf olt, %661, %662 : vector<2x5xf32>
    %cst_280 = arith.constant -1.000000e+00 : f32
    %cst_281 = arith.constant 1.000000e+00 : f32
    %664 = vector.broadcast %cst_280 : f32 to vector<2x5xf32>
    %665 = vector.broadcast %cst_281 : f32 to vector<2x5xf32>
    %666 = arith.select %663, %664, %665 : vector<2x5xi1>, vector<2x5xf32>
    %667 = math.absf %661 : vector<2x5xf32>
    %cst_282 = arith.constant 2.41421366 : f32
    %668 = vector.broadcast %cst_282 : f32 to vector<2x5xf32>
    %669 = arith.cmpf ogt, %667, %668 : vector<2x5xf32>
    %cst_283 = arith.constant 0.414213568 : f32
    %670 = vector.broadcast %cst_283 : f32 to vector<2x5xf32>
    %671 = arith.cmpf ogt, %667, %670 : vector<2x5xf32>
    %cst_284 = arith.constant dense<true> : vector<2x5xi1>
    %672 = arith.xori %669, %cst_284 : vector<2x5xi1>
    %673 = arith.andi %671, %672 : vector<2x5xi1>
    %cst_285 = arith.constant 1.000000e+00 : f32
    %674 = vector.broadcast %cst_285 : f32 to vector<2x5xf32>
    %675 = arith.select %669, %667, %674 : vector<2x5xi1>, vector<2x5xf32>
    %cst_286 = arith.constant -1.000000e+00 : f32
    %676 = vector.broadcast %cst_286 : f32 to vector<2x5xf32>
    %677 = arith.divf %676, %675 : vector<2x5xf32>
    %cst_287 = arith.constant 1.000000e+00 : f32
    %678 = vector.broadcast %cst_287 : f32 to vector<2x5xf32>
    %679 = arith.subf %667, %678 : vector<2x5xf32>
    %cst_288 = arith.constant 1.000000e+00 : f32
    %680 = vector.broadcast %cst_288 : f32 to vector<2x5xf32>
    %681 = arith.addf %667, %680 : vector<2x5xf32>
    %682 = arith.divf %679, %681 : vector<2x5xf32>
    %683 = arith.select %673, %682, %667 : vector<2x5xi1>, vector<2x5xf32>
    %684 = arith.select %669, %677, %683 : vector<2x5xi1>, vector<2x5xf32>
    %cst_289 = arith.constant 0.785398185 : f32
    %cst_290 = arith.constant 0.000000e+00 : f32
    %685 = vector.broadcast %cst_289 : f32 to vector<2x5xf32>
    %686 = vector.broadcast %cst_290 : f32 to vector<2x5xf32>
    %687 = arith.select %673, %685, %686 : vector<2x5xi1>, vector<2x5xf32>
    %cst_291 = arith.constant 1.57079637 : f32
    %688 = vector.broadcast %cst_291 : f32 to vector<2x5xf32>
    %689 = arith.select %669, %688, %687 : vector<2x5xi1>, vector<2x5xf32>
    %690 = arith.mulf %684, %684 : vector<2x5xf32>
    %cst_292 = arith.constant 0.0805374458 : f32
    %691 = vector.broadcast %cst_292 : f32 to vector<2x5xf32>
    %692 = arith.mulf %691, %690 : vector<2x5xf32>
    %cst_293 = arith.constant 0.138776854 : f32
    %693 = vector.broadcast %cst_293 : f32 to vector<2x5xf32>
    %694 = arith.subf %692, %693 : vector<2x5xf32>
    %695 = arith.mulf %694, %690 : vector<2x5xf32>
    %cst_294 = arith.constant 0.199777111 : f32
    %696 = vector.broadcast %cst_294 : f32 to vector<2x5xf32>
    %697 = arith.addf %695, %696 : vector<2x5xf32>
    %698 = arith.mulf %697, %690 : vector<2x5xf32>
    %cst_295 = arith.constant 0.333329499 : f32
    %699 = vector.broadcast %cst_295 : f32 to vector<2x5xf32>
    %700 = arith.subf %698, %699 : vector<2x5xf32>
    %701 = arith.mulf %700, %690 : vector<2x5xf32>
    %702 = arith.mulf %701, %684 : vector<2x5xf32>
    %703 = arith.addf %702, %684 : vector<2x5xf32>
    %704 = arith.addf %689, %703 : vector<2x5xf32>
    %705 = arith.mulf %666, %704 : vector<2x5xf32>
    %cst_296 = arith.constant 0.318309873 : f32
    %706 = vector.broadcast %cst_296 : f32 to vector<2x5xf32>
    %707 = arith.mulf %705, %706 : vector<2x5xf32>
    %cst_297 = arith.constant 5.000000e-01 : f32
    %708 = vector.broadcast %cst_297 : f32 to vector<2x5xf32>
    %709 = arith.addf %707, %708 : vector<2x5xf32>
    %cst_298 = arith.constant dense<0.000000e+00> : vector<16x5xf32>
    %710 = tpu.matmul %634, %647, %cst_298 {dimension_numbers = #tpu.dot_dimension_numbers<[1], [0], [0], [1], [0, 0, 1, 1], [], []>} : vector<16x8xf32>, vector<8x5xf32>, vector<16x5xf32> -> vector<16x5xf32>
    %cst_299 = arith.constant dense<0.000000e+00> : vector<16x5xf32>
    %711 = tpu.matmul %634, %650, %cst_299 {dimension_numbers = #tpu.dot_dimension_numbers<[1], [0], [0], [1], [0, 0, 1, 1], [], []>} : vector<16x8xf32>, vector<8x5xf32>, vector<16x5xf32> -> vector<16x5xf32>
    %712 = vector.shape_cast %709 : vector<2x5xf32> to vector<2x1x5xf32>
    %713 = vector.shape_cast %712 : vector<2x1x5xf32> to vector<2x1x5xf32>
    %714 = vector.broadcast %713 : vector<2x1x5xf32> to vector<2x8x5xf32>
    %715 = vector.shape_cast %714 : vector<2x8x5xf32> to vector<16x5xf32>
    %716 = arith.mulf %715, %710 : vector<16x5xf32>
    %cst_300 = arith.constant 1.000000e+00 : f32
    %717 = vector.broadcast %cst_300 : f32 to vector<16x5xf32>
    %718 = arith.subf %717, %715 : vector<16x5xf32>
    %719 = arith.mulf %718, %711 : vector<16x5xf32>
    %720 = arith.addf %716, %719 : vector<16x5xf32>
    %721 = arith.addf %710, %711 : vector<16x5xf32>
    %722 = arith.subf %721, %720 : vector<16x5xf32>
    %cst_301 = arith.constant dense<0.000000e+00> : vector<16x8xf32>
    %723 = tpu.matmul %722, %656, %cst_301 {dimension_numbers = #tpu.dot_dimension_numbers<[1], [0], [0], [1], [0, 0, 1, 1], [], []>} : vector<16x5xf32>, vector<5x8xf32>, vector<16x8xf32> -> vector<16x8xf32>
    %cst_302 = arith.constant dense<0.000000e+00> : vector<16x8xf32>
    %724 = tpu.matmul %720, %653, %cst_302 {dimension_numbers = #tpu.dot_dimension_numbers<[1], [0], [0], [1], [0, 0, 1, 1], [], []>} : vector<16x5xf32>, vector<5x8xf32>, vector<16x8xf32> -> vector<16x8xf32>
    %725 = arith.addf %723, %724 : vector<16x8xf32>
    %726 = arith.mulf %709, %657 : vector<2x5xf32>
    %cst_303 = arith.constant 1.000000e+00 : f32
    %727 = vector.broadcast %cst_303 : f32 to vector<2x5xf32>
    %728 = arith.subf %727, %709 : vector<2x5xf32>
    %729 = arith.mulf %728, %658 : vector<2x5xf32>
    %730 = arith.addf %726, %729 : vector<2x5xf32>
    %731 = arith.addf %657, %658 : vector<2x5xf32>
    %732 = arith.subf %731, %730 : vector<2x5xf32>
    %cst_304 = arith.constant dense<0.000000e+00> : vector<2x8xf32>
    %733 = tpu.matmul %730, %653, %cst_304 {dimension_numbers = #tpu.dot_dimension_numbers<[1], [0], [0], [1], [0, 0, 1, 1], [], []>} : vector<2x5xf32>, vector<5x8xf32>, vector<2x8xf32> -> vector<2x8xf32>
    %cst_305 = arith.constant dense<0.000000e+00> : vector<2x8xf32>
    %734 = tpu.matmul %732, %656, %cst_305 {dimension_numbers = #tpu.dot_dimension_numbers<[1], [0], [0], [1], [0, 0, 1, 1], [], []>} : vector<2x5xf32>, vector<5x8xf32>, vector<2x8xf32> -> vector<2x8xf32>
    %735 = arith.addf %733, %734 : vector<2x8xf32>
    %c8_i32 = arith.constant 8 : i32
    %c0_306 = arith.constant 0 : index
    %c0_307 = arith.constant 0 : index
    %736 = vector.load %arg6[%c0_306, %c0_307] : memref<2x8xf32, #tpu.memory_space<vmem>>, vector<2x8xf32>
    tpu.vector_store %arg6[%c0_306, %c0_307], %735 {strides = array<i32>} : memref<2x8xf32, #tpu.memory_space<vmem>>, vector<2x8xf32>,
    %c0_308 = arith.constant 0 : index
    %c0_309 = arith.constant 0 : index
    %737 = vector.load %arg7[%c0_308, %c0_309] : memref<16x8xf32, #tpu.memory_space<vmem>>, vector<16x8xf32>
    tpu.vector_store %arg7[%c0_308, %c0_309], %725 {strides = array<i32>} : memref<16x8xf32, #tpu.memory_space<vmem>>, vector<16x8xf32>,
    return
  }
  func.func @transform_0(%arg0: i32) -> (i32, i32, i32) {
    %c0_i32 = arith.constant 0 : i32
    %c0_i32_0 = arith.constant 0 : i32
    %c0_i32_1 = arith.constant 0 : i32
    %c0_i32_2 = arith.constant 0 : i32
    return %c0_i32, %c0_i32_0, %c0_i32_1 : i32, i32, i32
  }
  func.func @transform_1(%arg0: i32) -> (i32, i32, i32) {
    %c0_i32 = arith.constant 0 : i32
    %c0_i32_0 = arith.constant 0 : i32
    %c0_i32_1 = arith.constant 0 : i32
    %c0_i32_2 = arith.constant 0 : i32
    return %c0_i32, %c0_i32_0, %c0_i32_1 : i32, i32, i32
  }
  func.func @transform_2(%arg0: i32) -> (i32, i32, i32) {
    %c0_i32 = arith.constant 0 : i32
    %c0_i32_0 = arith.constant 0 : i32
    %c0_i32_1 = arith.constant 0 : i32
    %c0_i32_2 = arith.constant 0 : i32
    return %c0_i32, %c0_i32_0, %c0_i32_1 : i32, i32, i32
  }
  func.func @transform_3(%arg0: i32) -> (i32, i32, i32) {
    %c0_i32 = arith.constant 0 : i32
    %c0_i32_0 = arith.constant 0 : i32
    %c0_i32_1 = arith.constant 0 : i32
    %c0_i32_2 = arith.constant 0 : i32
    return %c0_i32, %c0_i32_0, %c0_i32_1 : i32, i32, i32
  }
  func.func @transform_4(%arg0: i32) -> (i32, i32) {
    %c0_i32 = arith.constant 0 : i32
    %c0_i32_0 = arith.constant 0 : i32
    return %arg0, %c0_i32 : i32, i32
  }
  func.func @transform_5(%arg0: i32) -> (i32, i32) {
    %c0_i32 = arith.constant 0 : i32
    %c0_i32_0 = arith.constant 0 : i32
    return %arg0, %c0_i32 : i32, i32
  }
  func.func @transform_6(%arg0: i32) -> (i32, i32) {
    %c0_i32 = arith.constant 0 : i32
    %c0_i32_0 = arith.constant 0 : i32
    return %arg0, %c0_i32 : i32, i32
  }
}

</mosaic_0001>

<bundles_post_ra>
// kernel: tpu_custom_call.1
= control target key start
LH: loop header
LB: loop body
LE: loop exit
PB: predicated region body
PF: predicated region fallthrough
CT: control target
= control target key end

     0   :  { %12 = vsyncpa [#allocation3], 0  ;;  %s7276_s0 = inlined_call_operand.hbm [shape: f32[8,8,5], index: 0, kind: input, shape index: {}]   ;;  %s7277_s1 = inlined_call_operand.hbm [shape: f32[8,8,5], index: 1, kind: input, shape index: {}]   ;;  %s7278_s2 = inlined_call_operand.hbm [shape: f32[8,5,8], index: 2, kind: input, shape index: {}]   ;;  %s7279_s3 = inlined_call_operand.hbm [shape: f32[8,5,8], index: 3, kind: input, shape index: {}]   ;;  %s7280_s4 = inlined_call_operand.hbm [shape: f32[2,8], index: 4, kind: input, shape index: {}]   ;;  %s7281_s5 = inlined_call_operand.hbm [shape: f32[2,8], index: 5, kind: output, shape index: {0}]   ;;  %s7282_s6 = inlined_call_operand.hbm [shape: f32[16,8], index: 6, kind: output, shape index: {1}]  }
   0x1   :  { %13 = vsyncpa [#allocation6], 0 }
   0x2   :  { %14 = vsyncpa [#allocation9], 0 }
   0x3   :  { %15 = vsyncpa [#allocation4], 0 }
   0x4   :  { %16 = vsyncpa [#allocation13], 0  ;;  %s6652_s21 = smov [#allocation5]   ;;  %s6653_s23 = smov [#allocation8]  }
   0x5   :  { %s34_s22 = sshll.u32 %s6652_s21, 4  ;;  %s58_s24 = sshll.u32 %s6653_s23, 4  ;;  %s35_s22 = int_to_ptr.vmem [resolvable:$true] %s34_s22  ;;  %s6701_s24 = int_to_ptr.vmem [resolvable:$true] %s58_s24 }
   0x6   :  { %s6488_s27 = scalar_lea.hbm %s7277_s1, 1024 }
   0x7   :  { %p6489_p0 = scmp.ne.s32.totalorder %s7277_s1, %s6488_s27  ;;  %p6492_p1 = scmp.lt.u32.totalorder %s6488_s27, %s7277_s1 }
   0x9   :  { %p6494_p2 = pnand %p6492_p1, %p6489_p0 }
   0xb   :  { %6497 = shalt.err (!%p6494_p2)
}
   0xc   :  { %s6498_s8 = scalar_lea.vmem %s35_s22, 1024  ;;  %p6503_p4 = scmp.lt.s32.totalorder %s35_s22, %s35_s22 }
   0xd   :  { %p6499_p3 = scmp.ne.s32.totalorder %s35_s22, %s6498_s8  ;;  %p6504_p5 = scmp.lt.s32.totalorder %s6498_s8, %s6498_s8 }
   0xf   :  { %p6505_p6 = por %p6504_p5, %p6503_p4 }
  0x11   :  { %p6506_p7 = pnand %p6505_p6, %p6499_p3 }
  0x13   :  { %6509 = shalt.err (!%p6506_p7)
}
  0x14   :  { %s6654_s9 = smov 128   ;;  %s6655_s10 = smov 8  }
  0x15   :  { %40 = dma.hbm_to_vmem [thread:$0]  %s7277_s1, 1024, %s35_s22, [#allocation6], %s6654_s9, %s6654_s9, %s6655_s10  }
  0x16   :  { %s6510_s15 = scalar_lea.hbm %s7279_s3, 1024 }
  0x17   :  { %p6511_p8 = scmp.ne.s32.totalorder %s7279_s3, %s6510_s15  ;;  %p6514_p9 = scmp.lt.u32.totalorder %s6510_s15, %s7279_s3 }
  0x19   :  { %p6516_p10 = pnand %p6514_p9, %p6511_p8 }
  0x1b   :  { %6519 = shalt.err (!%p6516_p10)
}
  0x1c   :  { %s6520_s20 = scalar_lea.vmem %s6701_s24, 1024  ;;  %p6525_p12 = scmp.lt.s32.totalorder %s6701_s24, %s6701_s24 }
  0x1d   :  { %p6521_p11 = scmp.ne.s32.totalorder %s6701_s24, %s6520_s20  ;;  %p6526_p13 = scmp.lt.s32.totalorder %s6520_s20, %s6520_s20 }
  0x1f   :  { %p6527_p0 = por %p6526_p13, %p6525_p12 }
  0x21   :  { %p6528_p1 = pnand %p6527_p0, %p6521_p11 }
  0x23   :  { %6531 = shalt.err (!%p6528_p1)
}
  0x24   :  { %64 = dma.hbm_to_vmem [thread:$0]  %s7279_s3, 1024, %s6701_s24, [#allocation9], %s6654_s9, %s6654_s9, %s6655_s10  }
  0x25   :  { %s6656_s22 = smov [#allocation2]   ;;  %s6657_s25 = smov [#allocation7]  }
  0x26   :  { %s22_s23 = sshll.u32 %s6656_s22, 4  ;;  %s46_s26 = sshll.u32 %s6657_s25, 4  ;;  %s23_s23 = int_to_ptr.vmem [resolvable:$true] %s22_s23  ;;  %s6738_s26 = int_to_ptr.vmem [resolvable:$true] %s46_s26 }
  0x27   :  { %s6532_s29 = scalar_lea.hbm %s7276_s0, 1024 }
  0x28   :  { %p6533_p2 = scmp.ne.s32.totalorder %s7276_s0, %s6532_s29  ;;  %p6536_p3 = scmp.lt.u32.totalorder %s6532_s29, %s7276_s0 }
  0x2a   :  { %p6538_p4 = pnand %p6536_p3, %p6533_p2 }
  0x2c   :  { %6541 = shalt.err (!%p6538_p4)
}
  0x2d   :  { %s6542_s3 = scalar_lea.vmem %s23_s23, 1024  ;;  %p6547_p6 = scmp.lt.s32.totalorder %s23_s23, %s23_s23 }
  0x2e   :  { %p6543_p5 = scmp.ne.s32.totalorder %s23_s23, %s6542_s3  ;;  %p6548_p7 = scmp.lt.s32.totalorder %s6542_s3, %s6542_s3 }
  0x30   :  { %p6549_p8 = por %p6548_p7, %p6547_p6 }
  0x32   :  { %p6550_p9 = pnand %p6549_p8, %p6543_p5 }
  0x34   :  { %6553 = shalt.err (!%p6550_p9)
}
  0x35   :  { %28 = dma.hbm_to_vmem [thread:$0]  %s7276_s0, 1024, %s23_s23, [#allocation3], %s6654_s9, %s6654_s9, %s6655_s10  }
  0x36   :  { %s6554_s15 = scalar_lea.hbm %s7278_s2, 1024 }
  0x37   :  { %p6555_p10 = scmp.ne.s32.totalorder %s7278_s2, %s6554_s15  ;;  %p6558_p11 = scmp.lt.u32.totalorder %s6554_s15, %s7278_s2 }
  0x39   :  { %p6560_p12 = pnand %p6558_p11, %p6555_p10 }
  0x3b   :  { %6563 = shalt.err (!%p6560_p12)
}
  0x3c   :  { %s6564_s20 = scalar_lea.vmem %s6738_s26, 1024  ;;  %p6569_p0 = scmp.lt.s32.totalorder %s6738_s26, %s6738_s26 }
  0x3d   :  { %p6565_p13 = scmp.ne.s32.totalorder %s6738_s26, %s6564_s20  ;;  %p6570_p1 = scmp.lt.s32.totalorder %s6564_s20, %s6564_s20 }
  0x3f   :  { %p6571_p2 = por %p6570_p1, %p6569_p0 }
  0x41   :  { %p6572_p3 = pnand %p6571_p2, %p6565_p13 }
  0x43   :  { %6575 = shalt.err (!%p6572_p3)
}
  0x44   :  { %52 = dma.hbm_to_vmem [thread:$0]  %s7278_s2, 1024, %s6738_s26, [#allocation6], %s6654_s9, %s6654_s9, %s6655_s10  }
  0x45   :  { %s6658_s21 = smov [#allocation10]   ;;  %s6576_s27 = scalar_lea.hbm %s7280_s4, 32 }
  0x46   :  { %s71_s22 = sshll.u32 %s6658_s21, 4  ;;  %p6577_p4 = scmp.ne.s32.totalorder %s7280_s4, %s6576_s27  ;;  %s72_s22 = int_to_ptr.vmem [resolvable:$true] %s71_s22 }
  0x47   :  { %p6580_p5 = scmp.lt.u32.totalorder %s6576_s27, %s7280_s4 }
  0x49   :  { %p6582_p6 = pnand %p6580_p5, %p6577_p4 }
  0x4b   :  { %6585 = shalt.err (!%p6582_p6)
}
  0x4c   :  { %s6586_s8 = scalar_lea.vmem %s72_s22, 32  ;;  %p6591_p8 = scmp.lt.s32.totalorder %s72_s22, %s72_s22 }
  0x4d   :  { %p6587_p7 = scmp.ne.s32.totalorder %s72_s22, %s6586_s8  ;;  %p6592_p9 = scmp.lt.s32.totalorder %s6586_s8, %s6586_s8 }
  0x4f   :  { %p6593_p10 = por %p6592_p9, %p6591_p8 }
  0x51   :  { %p6594_p11 = pnand %p6593_p10, %p6587_p7 }
  0x53   :  { %6597 = shalt.err (!%p6594_p11)
}
  0x54   :  { %74 = dma.hbm_to_vmem [thread:$0]  %s7280_s4, 32, %s72_s22, [#allocation9]  }
  0x55   :  { %6642 = dma.done.wait [#allocation3], 1024  }
  0x56   :  { %6643 = vsyncadd [#allocation3], 4294966272 }
  0x57   :  { %6644 = dma.done.wait [#allocation6], 2048  }
  0x58   :  { %6645 = vsyncadd [#allocation6], 4294965248 }
  0x59   :  { %6646 = dma.done.wait [#allocation9], 1056  }
  0x5a   :  { %6647 = vsyncadd [#allocation9], 4294966240  ;;  %v91_v0 = vlaneseq  ;;  %v6659_v1 = vmov 0.0   ;;  %vm6660_vm0 = vmmov 0   ;;  %vm101_vm2 = vcmask 64512   ;;  %v97_v4 = vld [vmem:[#allocation2] sm:$0xff] }
  0x5b   :  { %6090 = vmatprep.subr.mxu0 %v6659_v1  ;;  %6095 = vmatprep.subr.mxu1 %v6659_v1  ;;  %v98_v5 = vld [vmem:[#allocation5] sm:$0xff]  ;;  %vm484_vm3 = vcmask 1044480   ;;  %vm6661_vm6 = vmmov 1   ;;  %v6662_v41 = vmov 1966171168   ;;  %v6663_v49 = vmov 1.0  }
  0x5c   :  { %6092 = vmatprep.mubr.msk.f32.mxu0 %vm6660_vm0, %v6659_v1  ;;  %6097 = vmatprep.mubr.msk.f32.mxu1 %vm6660_vm0, %v6659_v1  ;;  %v6793_v2 = vshrl.u32 %v91_v0, 7  ;;  %v94_v3 = vand.u32 127, %v91_v0  ;;  %v90_v6 = vld [vmem:[#allocation10] sm:$0x3]  ;;  %v434_v42 = vunpack.c.l.s4 %v6662_v41  ;;  %vm477_vm10 = vcmask 39936   ;;  %s6664_s4 = smov [#allocation11]  }
  0x5d   :  { %6091 = vmatpush3.msra.mxu0 %v97_v4  ;;  %6096 = vmatpush3.msra.mxu1 %v98_v5  ;;  %v6806_v8 = vld [vmem:[#allocation8] sm:$0x1f]  ;;  %s5751_s11 = sshll.u32 %s6664_s4, 4  ;;  %s5752_s11 = int_to_ptr.vmem [resolvable:$true] %s5751_s11 }
  0x5e   :  { %vm95_vm1 = vcmp.eq.s32.totalorder %v6793_v2, %v94_v3  ;;  %6093 = vmatmul.mubr.msk.f32.vlgmr.msra.gmra.mrb[0].mxu0 %vm101_vm2, %v90_v6  ;;  %6098 = vmatmul.mubr.msk.f32.vlgmr.msra.gmra.mrb[0].mxu1 %vm101_vm2, %v90_v6  ;;  %v6811_v9 = vld [vmem:[#allocation7] sm:$0x1f]  ;;  %v435_v47 = vunpack.c.0.s8 %v434_v42  ;;  %v6839_v55 = vsub.s32 0, %v6793_v2  ;;  %s6598_s3 = scalar_lea.vmem %s5752_s11, 32  ;;  %p6603_p13 = scmp.lt.s32.totalorder %s5752_s11, %s5752_s11 }
  0x5f   :  { %v96_v7 = vsel %vm95_vm1, 1.0, %v6659_v1  ;;  %6100 = vmatprep.subr.mxu0 %v97_v4  ;;  %6105 = vmatprep.subr.mxu1 %v98_v5  ;;  %p6599_p12 = scmp.ne.s32.totalorder %s5752_s11, %s6598_s3  ;;  %p6604_p0 = scmp.lt.s32.totalorder %s6598_s3, %s6598_s3 }
  0x60   :  { %6102 = vmatprep.mubr.msk.f32.mxu0 %vm101_vm2, %v96_v7  ;;  %6101 = vmatpush3.msra.mxu0 %v97_v4  ;;  %v6836_v52 = vsub.s32 %v435_v47, %v6793_v2 }
  0x61   :  { %6106 = vmatpush3.msra.mxu1 %v98_v5  ;;  %6107 = vmatprep.mubr.msk.f32.mxu1 %vm101_vm2, %v96_v7  ;;  %p6605_p1 = por %p6604_p0, %p6603_p13 }
  0x62   :  { %6103 = vmatmul.mubr.msk.f32.vlgmr.msra.gmra.mrb[2].mxu0 %vm101_vm2, %v96_v7  ;;  %6108 = vmatmul.mubr.msk.f32.vlgmr.msra.gmra.mrb[2].mxu1 %vm101_vm2, %v96_v7 }
  0x63   :  { %6120 = vmatprep.subr.mxu1 %v6659_v1  ;;  %6122 = vmatprep.mubr.msk.f32.mxu1 %vm6660_vm0, %v6659_v1  ;;  %p6606_p2 = pnand %p6605_p1, %p6599_p12 }
  0x64   :  { %6121 = vmatpush3.msk.msra.mxu1 %vm484_vm3, %v6806_v8  ;;  %6110 = vmatprep.subr.msk.mxu0 %vm484_vm3, %v6811_v9 }
  0x65   :  { %6125 = vmatprep.subr.mxu1 %v6659_v1  ;;  %6111 = vmatpush3.msk.msra.mxu0 %vm484_vm3, %v6811_v9 }
  0x66   :  { %6115 = vmatprep.subr.msk.mxu0 %vm484_vm3, %v6806_v8 }
 0x131   :  { %v171_v10 = vpop.f32.mrb[0].mxu0  ;;  %v241_v11 = vpop.f32.mrb[0].mxu1 }
 0x132   :  { %v245_v12 = vsub.f32 %v241_v11, %v171_v10  ;;  %v6819_v13 = vadd.f32 %v241_v11, %v171_v10  ;;  %v6094_v14 = vpop.f32.mrb[1].mxu0  ;;  %v6099_v15 = vpop.f32.mrb[1].mxu1 }
 0x134   :  { %v246_v16 = vmul.f32 100.0, %v245_v12 }
 0x135   :  { %v6104_v17 = vpop.f32.mrb[2].mxu0  ;;  %v6821_v18 = vpop.f32.mrb[2].mxu1 }
 0x136   :  { %v249_v19 = vand.u32 2147483647, %v246_v16  ;;  %v348_v20 = vpop.f32.mrb[3].mxu0  ;;  %v6824_v21 = vadd.f32 %v6821_v18, %v6104_v17  ;;  %v423_v22 = vpop.f32.mrb[3].mxu1  ;;  %vm247_vm9 = vcmp.lt.f32.partialorder %v246_v16, 0.0  ;;  %v802_v16 = vld [vmem:[#allocation5 + $0x8] sm:$0xff] }
 0x137   :  { %v6826_v23 = vadd.f32 %v423_v22, %v348_v20  ;;  %v248_v50 = vsel %vm247_vm9, -1.0, %v6663_v49 }
 0x138   :  { %vm250_vm4 = vcmp.gt.f32.partialorder %v249_v19, 2.4142137  ;;  %v258_v24 = vadd.f32 1.0, %v249_v19  ;;  %vm251_vm5 = vcmp.gt.f32.partialorder %v249_v19, 0.41421357  ;;  %v5780_v27 = vadd.f32 -1.0, %v249_v19 }
 0x139   :  { %v254_v25 = vsel %vm250_vm4, %v249_v19, 1.0  ;;  %vm252_vm7 = vmxor %vm250_vm4, %vm6661_vm6 }
 0x13a   :  { %6456 = vrcp.f32 %v254_v25  ;;  %vm253_vm8 = vmand %vm251_vm5, %vm252_vm7 }
 0x13b   :  { %6458 = vrcp.f32 %v258_v24  ;;  %v263_v43 = vsel %vm253_vm8, 0.7853982, %v6659_v1 }
 0x13c   :  { %v264_v46 = vsel %vm250_vm4, 1.5707964, %v263_v43 }
 0x144   :  { %v6457_v26 = vpop.eup %6456 }
 0x145   :  { %v6459_v28 = vpop.eup %6458  ;;  %v256_v29 = vmul.f32 -1.0, %v6457_v26 }
 0x146   :  { %v260_v30 = vmul.f32 %v6459_v28, %v5780_v27 }
 0x148   :  { %v261_v31 = vsel %vm253_vm8, %v260_v30, %v249_v19 }
 0x149   :  { %v262_v32 = vsel %vm250_vm4, %v256_v29, %v261_v31 }
 0x14a   :  { %v265_v33 = vmul.f32 %v262_v32, %v262_v32 }
 0x14c   :  { %v266_v34 = vmul.f32 0.080537446, %v265_v33 }
 0x14e   :  { %v5781_v35 = vadd.f32 -0.13877685, %v266_v34 }
 0x150   :  { %v268_v36 = vmul.f32 %v5781_v35, %v265_v33 }
 0x152   :  { %v269_v37 = vadd.f32 0.19977711, %v268_v36 }
 0x154   :  { %v270_v38 = vmul.f32 %v269_v37, %v265_v33 }
 0x156   :  { %v5782_v39 = vadd.f32 -0.3333295, %v270_v38 }
 0x158   :  { %v272_v40 = vmul.f32 %v5782_v39, %v265_v33 }
 0x15a   :  { %v273_v44 = vmul.f32 %v272_v40, %v262_v32 }
 0x15c   :  { %v274_v45 = vadd.f32 %v273_v44, %v262_v32 }
 0x15e   :  { %v275_v48 = vadd.f32 %v274_v45, %v264_v46 }
 0x160   :  { %v276_v51 = vmul.f32 %v275_v48, %v248_v50 }
 0x162   :  { %v277_v53 = vmul.f32 0.31830987, %v276_v51 }
 0x164   :  { %v278_v54 = vadd.f32 0.5, %v277_v53 }
 0x166   :  { %v647_v56 = vmul.f32 %v278_v54, %v171_v10  ;;  %v648_v57 = vsub.f32 1.0, %v278_v54  ;;  %v439_v58 = vrot.slane %v278_v54, %v6836_v52 }
 0x168   :  { %v649_v59 = vmul.f32 %v648_v57, %v241_v11  ;;  %v440_v60 = vcombine.high %v439_v58, %v439_v58  ;;  %v447_v61 = vrot.slane %v439_v58, %v6836_v52 }
 0x16a   :  { %v650_v62 = vadd.f32 %v649_v59, %v647_v56  ;;  %v454_v63 = vrot.slane %v440_v60, %v6836_v52  ;;  %v458_v0 = vrot.slane %v447_v61, %v6839_v55 }
 0x16c   :  { %v652_v3 = vsub.f32 %v6819_v13, %v650_v62  ;;  %v462_v4 = vrot.slane %v454_v63, %v6839_v55  ;;  %v465_v2 = vmul.f32 %v458_v0, %v348_v20  ;;  %v467_v5 = vsub.f32 1.0, %v458_v0  ;;  %v6877_v20 = vld [vmem:[#allocation8 + $0x8] sm:$0x1f] }
 0x16e   :  { %v466_v6 = vmul.f32 %v6104_v17, %v462_v4  ;;  %v468_v7 = vsub.f32 1.0, %v462_v4  ;;  %v469_v10 = vmul.f32 %v467_v5, %v423_v22  ;;  %6123 = vmatmul.mubr.msk.f32.vlgmr.msra.gmra.mrb[4].mxu1 %vm477_vm10, %v652_v3 }
 0x16f   :  { %6126 = vmatpush3.msk.msra.mxu1 %vm484_vm3, %v6811_v9  ;;  %6127 = vmatprep.mubr.msk.f32.mxu1 %vm6660_vm0, %v6659_v1  ;;  %v800_v9 = vld [vmem:[#allocation2 + $0x8] sm:$0xff] }
 0x170   :  { %v470_v11 = vmul.f32 %v6821_v18, %v468_v7  ;;  %v471_v12 = vadd.f32 %v469_v10, %v465_v2  ;;  %6135 = vmatprep.subr.mxu1 %v6659_v1 }
 0x172   :  { %v472_v13 = vadd.f32 %v470_v11, %v466_v6  ;;  %v475_v14 = vsub.f32 %v6826_v23, %v471_v12  ;;  %6112 = vmatprep.mubr.msk.f32.mxu0 %vm477_vm10, %v471_v12 }
 0x174   :  { %v476_v15 = vsub.f32 %v6824_v21, %v472_v13  ;;  %6113 = vmatmul.mubr.msk.f32.vlgmr.msra.gmra.mrb[4].mxu0 %vm477_vm10, %v472_v13  ;;  %v6882_v21 = vld [vmem:[#allocation7 + $0x8] sm:$0x1f] }
 0x175   :  { %6117 = vmatprep.mubr.msk.f32.mxu0 %vm477_vm10, %v475_v14  ;;  %6116 = vmatpush3.msk.msra.mxu0 %vm484_vm3, %v6806_v8 }
 0x176   :  { %6128 = vmatmul.mubr.msk.f32.vlgmr.msra.gmra.mrb[4].mxu1 %vm477_vm10, %v650_v62  ;;  %6130 = vmatprep.subr.mxu0 %v6659_v1 }
 0x177   :  { %6136 = vmatpush3.msra.mxu1 %v802_v16  ;;  %6137 = vmatprep.mubr.msk.f32.mxu1 %vm6660_vm0, %v6659_v1 }
 0x178   :  { %6145 = vmatprep.subr.mxu1 %v802_v16 }
 0x17c   :  { %6118 = vmatmul.mubr.msk.f32.vlgmr.msra.gmra.mrb[4].mxu0 %vm477_vm10, %v476_v15 }
 0x17d   :  { %6131 = vmatpush3.msra.mxu0 %v800_v9  ;;  %6132 = vmatprep.mubr.msk.f32.mxu0 %vm6660_vm0, %v6659_v1 }
 0x17e   :  { %6140 = vmatprep.subr.mxu0 %v800_v9 }
 0x249   :  { %v795_v17 = vpop.f32.mrb[4].mxu1 }
 0x24a   :  { %v6129_v18 = vpop.f32.mrb[5].mxu1  ;;  %6133 = vmatmul.mubr.msk.f32.vlgmr.msra.gmra.mrb[6].mxu0 %vm101_vm2, %v795_v17  ;;  %6138 = vmatmul.mubr.msk.f32.vlgmr.msra.gmra.mrb[6].mxu1 %vm101_vm2, %v795_v17 }
 0x24b   :  { %6141 = vmatpush3.msra.mxu0 %v800_v9  ;;  %6146 = vmatpush3.msra.mxu1 %v802_v16 }
 0x24c   :  { %6160 = vmatprep.subr.mxu1 %v6659_v1  ;;  %6150 = vmatprep.subr.msk.mxu0 %vm484_vm3, %v6882_v21 }
 0x24f   :  { %v6119_v8 = vpop.f32.mrb[4].mxu0 }
 0x250   :  { %v638_v19 = vpop.f32.mrb[5].mxu0 }
 0x251   :  { %6142 = vmatprep.mubr.msk.f32.mxu0 %vm101_vm2, %v638_v19  ;;  %6147 = vmatprep.mubr.msk.f32.mxu1 %vm101_vm2, %v638_v19 }
 0x252   :  { %6143 = vmatmul.mubr.msk.f32.vlgmr.msra.gmra.mrb[8].mxu0 %vm101_vm2, %v6119_v8  ;;  %6148 = vmatmul.mubr.msk.f32.vlgmr.msra.gmra.mrb[8].mxu1 %vm101_vm2, %v6119_v8 }
 0x253   :  { %6162 = vmatprep.mubr.msk.f32.mxu1 %vm6660_vm0, %v6659_v1  ;;  %6161 = vmatpush3.msk.msra.mxu1 %vm484_vm3, %v6877_v20 }
 0x254   :  { %6165 = vmatprep.subr.mxu1 %v6659_v1  ;;  %6151 = vmatpush3.msk.msra.mxu0 %vm484_vm3, %v6882_v21 }
 0x255   :  { %6155 = vmatprep.subr.msk.mxu0 %vm484_vm3, %v6877_v20 }
 0x31d   :  { %v876_v22 = vpop.f32.mrb[6].mxu0  ;;  %v946_v23 = vpop.f32.mrb[6].mxu1 }
 0x31e   :  { %v950_v24 = vsub.f32 %v946_v23, %v876_v22  ;;  %v1357_v25 = vadd.f32 %v946_v23, %v876_v22  ;;  %v6134_v26 = vpop.f32.mrb[7].mxu0  ;;  %v6139_v27 = vpop.f32.mrb[7].mxu1 }
 0x320   :  { %v951_v28 = vmul.f32 100.0, %v950_v24 }
 0x322   :  { %v954_v29 = vand.u32 2147483647, %v951_v28  ;;  %vm952_vm15 = vcmp.lt.f32.partialorder %v951_v28, 0.0 }
 0x323   :  { %v953_v61 = vsel %vm952_vm15, -1.0, %v6663_v49 }
 0x324   :  { %vm955_vm11 = vcmp.gt.f32.partialorder %v954_v29, 2.4142137  ;;  %v963_v30 = vadd.f32 1.0, %v954_v29  ;;  %vm956_vm12 = vcmp.gt.f32.partialorder %v954_v29, 0.41421357  ;;  %v5799_v39 = vadd.f32 -1.0, %v954_v29 }
 0x325   :  { %v959_v31 = vsel %vm955_vm11, %v954_v29, 1.0  ;;  %v6144_v32 = vpop.f32.mrb[8].mxu0  ;;  %v6149_v33 = vpop.f32.mrb[8].mxu1  ;;  %vm957_vm13 = vmxor %vm955_vm11, %vm6661_vm6 }
 0x326   :  { %6460 = vrcp.f32 %v959_v31  ;;  %v6891_v34 = vadd.f32 %v6149_v33, %v6144_v32  ;;  %v1056_v35 = vpop.f32.mrb[9].mxu0  ;;  %v1131_v36 = vpop.f32.mrb[9].mxu1  ;;  %vm958_vm14 = vmand %vm956_vm12, %vm957_vm13 }
 0x327   :  { %6462 = vrcp.f32 %v963_v30  ;;  %v1181_v37 = vadd.f32 %v1131_v36, %v1056_v35  ;;  %v968_v56 = vsel %vm958_vm14, 0.7853982, %v6659_v1  ;;  %v6937_v30 = vld [vmem:[#allocation7 + $0x10] sm:$0x1f] }
 0x328   :  { %v969_v59 = vsel %vm955_vm11, 1.5707964, %v968_v56 }
 0x330   :  { %v6461_v38 = vpop.eup %6460 }
 0x331   :  { %v6463_v40 = vpop.eup %6462  ;;  %v961_v41 = vmul.f32 -1.0, %v6461_v38 }
 0x332   :  { %v965_v42 = vmul.f32 %v6463_v40, %v5799_v39 }
 0x334   :  { %v966_v43 = vsel %vm958_vm14, %v965_v42, %v954_v29  ;;  %v6932_v29 = vld [vmem:[#allocation8 + $0x10] sm:$0x1f] }
 0x335   :  { %v967_v44 = vsel %vm955_vm11, %v961_v41, %v966_v43 }
 0x336   :  { %v970_v45 = vmul.f32 %v967_v44, %v967_v44 }
 0x338   :  { %v971_v46 = vmul.f32 0.080537446, %v970_v45 }
 0x33a   :  { %v5800_v47 = vadd.f32 -0.13877685, %v971_v46 }
 0x33c   :  { %v973_v48 = vmul.f32 %v5800_v47, %v970_v45 }
 0x33e   :  { %v974_v50 = vadd.f32 0.19977711, %v973_v48 }
 0x340   :  { %v975_v51 = vmul.f32 %v974_v50, %v970_v45 }
 0x342   :  { %v5801_v53 = vadd.f32 -0.3333295, %v975_v51 }
 0x344   :  { %v977_v54 = vmul.f32 %v5801_v53, %v970_v45 }
 0x346   :  { %v978_v57 = vmul.f32 %v977_v54, %v967_v44 }
 0x348   :  { %v979_v58 = vadd.f32 %v978_v57, %v967_v44 }
 0x34a   :  { %v980_v60 = vadd.f32 %v979_v58, %v969_v59 }
 0x34c   :  { %v981_v62 = vmul.f32 %v980_v60, %v953_v61 }
 0x34e   :  { %v982_v63 = vmul.f32 0.31830987, %v981_v62 }
 0x350   :  { %v983_v0 = vadd.f32 0.5, %v982_v63 }
 0x352   :  { %v1353_v3 = vmul.f32 %v983_v0, %v876_v22  ;;  %v1354_v4 = vsub.f32 1.0, %v983_v0  ;;  %v1147_v2 = vrot.slane %v983_v0, %v6836_v52 }
 0x354   :  { %v1355_v5 = vmul.f32 %v1354_v4, %v946_v23  ;;  %v1148_v6 = vcombine.high %v1147_v2, %v1147_v2  ;;  %v1155_v7 = vrot.slane %v1147_v2, %v6836_v52 }
 0x356   :  { %v1356_v10 = vadd.f32 %v1355_v5, %v1353_v3  ;;  %v1162_v11 = vrot.slane %v1148_v6, %v6836_v52  ;;  %v1166_v12 = vrot.slane %v1155_v7, %v6839_v55 }
 0x358   :  { %v1358_v13 = vsub.f32 %v1357_v25, %v1356_v10  ;;  %v1170_v14 = vrot.slane %v1162_v11, %v6839_v55  ;;  %v1173_v15 = vmul.f32 %v1166_v12, %v1056_v35  ;;  %v1175_v16 = vsub.f32 1.0, %v1166_v12  ;;  %v1508_v25 = vld [vmem:[#allocation5 + $0x10] sm:$0xff] }
 0x35a   :  { %v1174_v9 = vmul.f32 %v6144_v32, %v1170_v14  ;;  %v1176_v17 = vsub.f32 1.0, %v1170_v14  ;;  %v1177_v18 = vmul.f32 %v1175_v16, %v1131_v36  ;;  %6163 = vmatmul.mubr.msk.f32.vlgmr.msra.gmra.mrb[10].mxu1 %vm477_vm10, %v1358_v13 }
 0x35b   :  { %6166 = vmatpush3.msk.msra.mxu1 %vm484_vm3, %v6882_v21  ;;  %6167 = vmatprep.mubr.msk.f32.mxu1 %vm6660_vm0, %v6659_v1  ;;  %v1506_v21 = vld [vmem:[#allocation2 + $0x10] sm:$0xff] }
 0x35c   :  { %v1178_v8 = vmul.f32 %v6149_v33, %v1176_v17  ;;  %v1179_v19 = vadd.f32 %v1177_v18, %v1173_v15  ;;  %6175 = vmatprep.subr.mxu1 %v6659_v1 }
 0x35e   :  { %v1180_v22 = vadd.f32 %v1178_v8, %v1174_v9  ;;  %v1183_v23 = vsub.f32 %v1181_v37, %v1179_v19  ;;  %6152 = vmatprep.mubr.msk.f32.mxu0 %vm477_vm10, %v1179_v19 }
 0x360   :  { %v1184_v24 = vsub.f32 %v6891_v34, %v1180_v22  ;;  %6153 = vmatmul.mubr.msk.f32.vlgmr.msra.gmra.mrb[10].mxu0 %vm477_vm10, %v1180_v22 }
 0x361   :  { %6157 = vmatprep.mubr.msk.f32.mxu0 %vm477_vm10, %v1183_v23  ;;  %6156 = vmatpush3.msk.msra.mxu0 %vm484_vm3, %v6877_v20 }
 0x362   :  { %6168 = vmatmul.mubr.msk.f32.vlgmr.msra.gmra.mrb[10].mxu1 %vm477_vm10, %v1356_v10  ;;  %6170 = vmatprep.subr.mxu0 %v6659_v1 }
 0x363   :  { %6176 = vmatpush3.msra.mxu1 %v1508_v25  ;;  %6177 = vmatprep.mubr.msk.f32.mxu1 %vm6660_vm0, %v6659_v1 }
 0x364   :  { %6185 = vmatprep.subr.mxu1 %v1508_v25 }
 0x368   :  { %6158 = vmatmul.mubr.msk.f32.vlgmr.msra.gmra.mrb[10].mxu0 %vm477_vm10, %v1184_v24 }
 0x369   :  { %6171 = vmatpush3.msra.mxu0 %v1506_v21  ;;  %6172 = vmatprep.mubr.msk.f32.mxu0 %vm6660_vm0, %v6659_v1 }
 0x36a   :  { %6180 = vmatprep.subr.mxu0 %v1506_v21 }
 0x435   :  { %v1501_v26 = vpop.f32.mrb[10].mxu1 }
 0x436   :  { %v6169_v27 = vpop.f32.mrb[11].mxu1  ;;  %6173 = vmatmul.mubr.msk.f32.vlgmr.msra.gmra.mrb[12].mxu0 %vm101_vm2, %v1501_v26  ;;  %6178 = vmatmul.mubr.msk.f32.vlgmr.msra.gmra.mrb[12].mxu1 %vm101_vm2, %v1501_v26 }
 0x437   :  { %6181 = vmatpush3.msra.mxu0 %v1506_v21  ;;  %6186 = vmatpush3.msra.mxu1 %v1508_v25 }
 0x438   :  { %6200 = vmatprep.subr.mxu1 %v6659_v1  ;;  %6190 = vmatprep.subr.msk.mxu0 %vm484_vm3, %v6937_v30 }
 0x43b   :  { %v6159_v20 = vpop.f32.mrb[10].mxu0 }
 0x43c   :  { %v1344_v28 = vpop.f32.mrb[11].mxu0 }
 0x43d   :  { %6182 = vmatprep.mubr.msk.f32.mxu0 %vm101_vm2, %v1344_v28  ;;  %6187 = vmatprep.mubr.msk.f32.mxu1 %vm101_vm2, %v1344_v28 }
 0x43e   :  { %6183 = vmatmul.mubr.msk.f32.vlgmr.msra.gmra.mrb[14].mxu0 %vm101_vm2, %v6159_v20  ;;  %6188 = vmatmul.mubr.msk.f32.vlgmr.msra.gmra.mrb[14].mxu1 %vm101_vm2, %v6159_v20 }
 0x43f   :  { %6202 = vmatprep.mubr.msk.f32.mxu1 %vm6660_vm0, %v6659_v1  ;;  %6201 = vmatpush3.msk.msra.mxu1 %vm484_vm3, %v6932_v29 }
 0x440   :  { %6205 = vmatprep.subr.mxu1 %v6659_v1  ;;  %6191 = vmatpush3.msk.msra.mxu0 %vm484_vm3, %v6937_v30 }
 0x441   :  { %6195 = vmatprep.subr.msk.mxu0 %vm484_vm3, %v6932_v29 }
 0x509   :  { %v1582_v31 = vpop.f32.mrb[12].mxu0  ;;  %v1652_v32 = vpop.f32.mrb[12].mxu1 }
 0x50a   :  { %v1656_v33 = vsub.f32 %v1652_v32, %v1582_v31  ;;  %v2063_v34 = vadd.f32 %v1652_v32, %v1582_v31  ;;  %v6174_v35 = vpop.f32.mrb[13].mxu0  ;;  %v6179_v36 = vpop.f32.mrb[13].mxu1 }
 0x50c   :  { %v1657_v37 = vmul.f32 100.0, %v1656_v33 }
 0x50e   :  { %v1660_v38 = vand.u32 2147483647, %v1657_v37  ;;  %vm1658_vm8 = vcmp.lt.f32.partialorder %v1657_v37, 0.0 }
 0x50f   :  { %v1659_v7 = vsel %vm1658_vm8, -1.0, %v6663_v49 }
 0x510   :  { %vm1661_vm1 = vcmp.gt.f32.partialorder %v1660_v38, 2.4142137  ;;  %v1669_v39 = vadd.f32 1.0, %v1660_v38  ;;  %vm1662_vm4 = vcmp.gt.f32.partialorder %v1660_v38, 0.41421357  ;;  %v5818_v48 = vadd.f32 -1.0, %v1660_v38 }
 0x511   :  { %v1665_v40 = vsel %vm1661_vm1, %v1660_v38, 1.0  ;;  %v6184_v41 = vpop.f32.mrb[14].mxu0  ;;  %v6189_v42 = vpop.f32.mrb[14].mxu1  ;;  %vm1663_vm5 = vmxor %vm1661_vm1, %vm6661_vm6 }
 0x512   :  { %6464 = vrcp.f32 %v1665_v40  ;;  %v6946_v43 = vadd.f32 %v6189_v42, %v6184_v41  ;;  %v1762_v44 = vpop.f32.mrb[15].mxu0  ;;  %v1837_v45 = vpop.f32.mrb[15].mxu1  ;;  %vm1664_vm7 = vmand %vm1662_vm4, %vm1663_vm5 }
 0x513   :  { %6466 = vrcp.f32 %v1669_v39  ;;  %v1887_v46 = vadd.f32 %v1837_v45, %v1762_v44  ;;  %v1674_v3 = vsel %vm1664_vm7, 0.7853982, %v6659_v1  ;;  %v6992_v39 = vld [vmem:[#allocation7 + $0x18] sm:$0x1f] }
 0x514   :  { %v1675_v5 = vsel %vm1661_vm1, 1.5707964, %v1674_v3 }
 0x51c   :  { %v6465_v47 = vpop.eup %6464 }
 0x51d   :  { %v6467_v50 = vpop.eup %6466  ;;  %v1667_v51 = vmul.f32 -1.0, %v6465_v47 }
 0x51e   :  { %v1671_v53 = vmul.f32 %v6467_v50, %v5818_v48 }
 0x520   :  { %v1672_v54 = vsel %vm1664_vm7, %v1671_v53, %v1660_v38  ;;  %v6987_v38 = vld [vmem:[#allocation8 + $0x18] sm:$0x1f] }
 0x521   :  { %v1673_v56 = vsel %vm1661_vm1, %v1667_v51, %v1672_v54 }
 0x522   :  { %v1676_v57 = vmul.f32 %v1673_v56, %v1673_v56 }
 0x524   :  { %v1677_v58 = vmul.f32 0.080537446, %v1676_v57 }
 0x526   :  { %v5819_v59 = vadd.f32 -0.13877685, %v1677_v58 }
 0x528   :  { %v1679_v60 = vmul.f32 %v5819_v59, %v1676_v57 }
 0x52a   :  { %v1680_v61 = vadd.f32 0.19977711, %v1679_v60 }
 0x52c   :  { %v1681_v62 = vmul.f32 %v1680_v61, %v1676_v57 }
 0x52e   :  { %v5820_v63 = vadd.f32 -0.3333295, %v1681_v62 }
 0x530   :  { %v1683_v0 = vmul.f32 %v5820_v63, %v1676_v57 }
 0x532   :  { %v1684_v4 = vmul.f32 %v1683_v0, %v1673_v56 }
 0x534   :  { %v1685_v2 = vadd.f32 %v1684_v4, %v1673_v56 }
 0x536   :  { %v1686_v6 = vadd.f32 %v1685_v2, %v1675_v5 }
 0x538   :  { %v1687_v10 = vmul.f32 %v1686_v6, %v1659_v7 }
 0x53a   :  { %v1688_v11 = vmul.f32 0.31830987, %v1687_v10 }
 0x53c   :  { %v1689_v12 = vadd.f32 0.5, %v1688_v11 }
 0x53e   :  { %v2059_v13 = vmul.f32 %v1689_v12, %v1582_v31  ;;  %v2060_v14 = vsub.f32 1.0, %v1689_v12  ;;  %v1853_v15 = vrot.slane %v1689_v12, %v6836_v52 }
 0x540   :  { %v2061_v16 = vmul.f32 %v2060_v14, %v1652_v32  ;;  %v1854_v9 = vcombine.high %v1853_v15, %v1853_v15  ;;  %v1861_v17 = vrot.slane %v1853_v15, %v6836_v52 }
 0x542   :  { %v2062_v18 = vadd.f32 %v2061_v16, %v2059_v13  ;;  %v1868_v8 = vrot.slane %v1854_v9, %v6836_v52  ;;  %v1872_v19 = vrot.slane %v1861_v17, %v6839_v55 }
 0x544   :  { %v2064_v22 = vsub.f32 %v2063_v34, %v2062_v18  ;;  %v1876_v23 = vrot.slane %v1868_v8, %v6839_v55  ;;  %v1879_v24 = vmul.f32 %v1872_v19, %v1762_v44  ;;  %v1881_v25 = vsub.f32 1.0, %v1872_v19  ;;  %v2214_v34 = vld [vmem:[#allocation5 + $0x18] sm:$0xff] }
 0x546   :  { %v1880_v21 = vmul.f32 %v6184_v41, %v1876_v23  ;;  %v1882_v26 = vsub.f32 1.0, %v1876_v23  ;;  %v1883_v27 = vmul.f32 %v1881_v25, %v1837_v45  ;;  %6203 = vmatmul.mubr.msk.f32.vlgmr.msra.gmra.mrb[16].mxu1 %vm477_vm10, %v2064_v22 }
 0x547   :  { %6206 = vmatpush3.msk.msra.mxu1 %vm484_vm3, %v6937_v30  ;;  %6207 = vmatprep.mubr.msk.f32.mxu1 %vm6660_vm0, %v6659_v1  ;;  %v2212_v30 = vld [vmem:[#allocation2 + $0x18] sm:$0xff] }
 0x548   :  { %v1884_v20 = vmul.f32 %v6189_v42, %v1882_v26  ;;  %v1885_v28 = vadd.f32 %v1883_v27, %v1879_v24  ;;  %6215 = vmatprep.subr.mxu1 %v6659_v1 }
 0x54a   :  { %v1886_v31 = vadd.f32 %v1884_v20, %v1880_v21  ;;  %v1889_v32 = vsub.f32 %v1887_v46, %v1885_v28  ;;  %6192 = vmatprep.mubr.msk.f32.mxu0 %vm477_vm10, %v1885_v28 }
 0x54c   :  { %v1890_v33 = vsub.f32 %v6946_v43, %v1886_v31  ;;  %6193 = vmatmul.mubr.msk.f32.vlgmr.msra.gmra.mrb[16].mxu0 %vm477_vm10, %v1886_v31 }
 0x54d   :  { %6197 = vmatprep.mubr.msk.f32.mxu0 %vm477_vm10, %v1889_v32  ;;  %6196 = vmatpush3.msk.msra.mxu0 %vm484_vm3, %v6932_v29 }
 0x54e   :  { %6208 = vmatmul.mubr.msk.f32.vlgmr.msra.gmra.mrb[16].mxu1 %vm477_vm10, %v2062_v18  ;;  %6210 = vmatprep.subr.mxu0 %v6659_v1 }
 0x54f   :  { %6216 = vmatpush3.msra.mxu1 %v2214_v34  ;;  %6217 = vmatprep.mubr.msk.f32.mxu1 %vm6660_vm0, %v6659_v1 }
 0x550   :  { %6225 = vmatprep.subr.mxu1 %v2214_v34 }
 0x554   :  { %6198 = vmatmul.mubr.msk.f32.vlgmr.msra.gmra.mrb[16].mxu0 %vm477_vm10, %v1890_v33 }
 0x555   :  { %6211 = vmatpush3.msra.mxu0 %v2212_v30  ;;  %6212 = vmatprep.mubr.msk.f32.mxu0 %vm6660_vm0, %v6659_v1 }
 0x556   :  { %6220 = vmatprep.subr.mxu0 %v2212_v30 }
 0x621   :  { %v2207_v35 = vpop.f32.mrb[16].mxu1 }
 0x622   :  { %v6209_v36 = vpop.f32.mrb[17].mxu1  ;;  %6213 = vmatmul.mubr.msk.f32.vlgmr.msra.gmra.mrb[18].mxu0 %vm101_vm2, %v2207_v35  ;;  %6218 = vmatmul.mubr.msk.f32.vlgmr.msra.gmra.mrb[18].mxu1 %vm101_vm2, %v2207_v35 }
 0x623   :  { %6221 = vmatpush3.msra.mxu0 %v2212_v30  ;;  %6226 = vmatpush3.msra.mxu1 %v2214_v34 }
 0x624   :  { %6240 = vmatprep.subr.mxu1 %v6659_v1  ;;  %6230 = vmatprep.subr.msk.mxu0 %vm484_vm3, %v6992_v39 }
 0x627   :  { %v6199_v29 = vpop.f32.mrb[16].mxu0 }
 0x628   :  { %v2050_v37 = vpop.f32.mrb[17].mxu0 }
 0x629   :  { %6222 = vmatprep.mubr.msk.f32.mxu0 %vm101_vm2, %v2050_v37  ;;  %6227 = vmatprep.mubr.msk.f32.mxu1 %vm101_vm2, %v2050_v37 }
 0x62a   :  { %6223 = vmatmul.mubr.msk.f32.vlgmr.msra.gmra.mrb[20].mxu0 %vm101_vm2, %v6199_v29  ;;  %6228 = vmatmul.mubr.msk.f32.vlgmr.msra.gmra.mrb[20].mxu1 %vm101_vm2, %v6199_v29 }
 0x62b   :  { %6242 = vmatprep.mubr.msk.f32.mxu1 %vm6660_vm0, %v6659_v1  ;;  %6241 = vmatpush3.msk.msra.mxu1 %vm484_vm3, %v6987_v38 }
 0x62c   :  { %6245 = vmatprep.subr.mxu1 %v6659_v1  ;;  %6231 = vmatpush3.msk.msra.mxu0 %vm484_vm3, %v6992_v39 }
 0x62d   :  { %6235 = vmatprep.subr.msk.mxu0 %vm484_vm3, %v6987_v38 }
 0x6f5   :  { %v2288_v40 = vpop.f32.mrb[18].mxu0  ;;  %v2358_v41 = vpop.f32.mrb[18].mxu1 }
 0x6f6   :  { %v2362_v42 = vsub.f32 %v2358_v41, %v2288_v40  ;;  %v2769_v43 = vadd.f32 %v2358_v41, %v2288_v40  ;;  %v6214_v44 = vpop.f32.mrb[19].mxu0  ;;  %v6219_v45 = vpop.f32.mrb[19].mxu1 }
 0x6f8   :  { %v2363_v46 = vmul.f32 100.0, %v2362_v42 }
 0x6fa   :  { %v2366_v47 = vand.u32 2147483647, %v2363_v46  ;;  %vm2364_vm14 = vcmp.lt.f32.partialorder %v2363_v46, 0.0 }
 0x6fb   :  { %v2365_v17 = vsel %vm2364_vm14, -1.0, %v6663_v49 }
 0x6fc   :  { %vm2367_vm9 = vcmp.gt.f32.partialorder %v2366_v47, 2.4142137  ;;  %v2375_v48 = vadd.f32 1.0, %v2366_v47  ;;  %vm2368_vm11 = vcmp.gt.f32.partialorder %v2366_v47, 0.41421357  ;;  %v5837_v60 = vadd.f32 -1.0, %v2366_v47 }
 0x6fd   :  { %v2371_v50 = vsel %vm2367_vm9, %v2366_v47, 1.0  ;;  %v6224_v51 = vpop.f32.mrb[20].mxu0  ;;  %v6229_v53 = vpop.f32.mrb[20].mxu1  ;;  %vm2369_vm12 = vmxor %vm2367_vm9, %vm6661_vm6 }
 0x6fe   :  { %6468 = vrcp.f32 %v2371_v50  ;;  %v7001_v54 = vadd.f32 %v6229_v53, %v6224_v51  ;;  %v2468_v56 = vpop.f32.mrb[21].mxu0  ;;  %v2543_v57 = vpop.f32.mrb[21].mxu1  ;;  %vm2370_vm13 = vmand %vm2368_vm11, %vm2369_vm12 }
 0x6ff   :  { %6470 = vrcp.f32 %v2375_v48  ;;  %v2593_v58 = vadd.f32 %v2543_v57, %v2468_v56  ;;  %v2380_v13 = vsel %vm2370_vm13, 0.7853982, %v6659_v1  ;;  %v7047_v48 = vld [vmem:[#allocation7 + $0x20] sm:$0x1f] }
 0x700   :  { %v2381_v16 = vsel %vm2367_vm9, 1.5707964, %v2380_v13 }
 0x708   :  { %v6469_v59 = vpop.eup %6468 }
 0x709   :  { %v6471_v61 = vpop.eup %6470  ;;  %v2373_v62 = vmul.f32 -1.0, %v6469_v59 }
 0x70a   :  { %v2377_v63 = vmul.f32 %v6471_v61, %v5837_v60 }
 0x70c   :  { %v2378_v0 = vsel %vm2370_vm13, %v2377_v63, %v2366_v47  ;;  %v7042_v47 = vld [vmem:[#allocation8 + $0x20] sm:$0x1f] }
 0x70d   :  { %v2379_v3 = vsel %vm2367_vm9, %v2373_v62, %v2378_v0 }
 0x70e   :  { %v2382_v4 = vmul.f32 %v2379_v3, %v2379_v3 }
 0x710   :  { %v2383_v2 = vmul.f32 0.080537446, %v2382_v4 }
 0x712   :  { %v5838_v5 = vadd.f32 -0.13877685, %v2383_v2 }
 0x714   :  { %v2385_v6 = vmul.f32 %v5838_v5, %v2382_v4 }
 0x716   :  { %v2386_v7 = vadd.f32 0.19977711, %v2385_v6 }
 0x718   :  { %v2387_v10 = vmul.f32 %v2386_v7, %v2382_v4 }
 0x71a   :  { %v5839_v11 = vadd.f32 -0.3333295, %v2387_v10 }
 0x71c   :  { %v2389_v12 = vmul.f32 %v5839_v11, %v2382_v4 }
 0x71e   :  { %v2390_v14 = vmul.f32 %v2389_v12, %v2379_v3 }
 0x720   :  { %v2391_v15 = vadd.f32 %v2390_v14, %v2379_v3 }
 0x722   :  { %v2392_v9 = vadd.f32 %v2391_v15, %v2381_v16 }
 0x724   :  { %v2393_v18 = vmul.f32 %v2392_v9, %v2365_v17 }
 0x726   :  { %v2394_v8 = vmul.f32 0.31830987, %v2393_v18 }
 0x728   :  { %v2395_v19 = vadd.f32 0.5, %v2394_v8 }
 0x72a   :  { %v2765_v22 = vmul.f32 %v2395_v19, %v2288_v40  ;;  %v2766_v23 = vsub.f32 1.0, %v2395_v19  ;;  %v2559_v24 = vrot.slane %v2395_v19, %v6836_v52 }
 0x72c   :  { %v2767_v25 = vmul.f32 %v2766_v23, %v2358_v41  ;;  %v2560_v21 = vcombine.high %v2559_v24, %v2559_v24  ;;  %v2567_v26 = vrot.slane %v2559_v24, %v6836_v52 }
 0x72e   :  { %v2768_v27 = vadd.f32 %v2767_v25, %v2765_v22  ;;  %v2574_v20 = vrot.slane %v2560_v21, %v6836_v52  ;;  %v2578_v28 = vrot.slane %v2567_v26, %v6839_v55 }
 0x730   :  { %v2770_v31 = vsub.f32 %v2769_v43, %v2768_v27  ;;  %v2582_v32 = vrot.slane %v2574_v20, %v6839_v55  ;;  %v2585_v33 = vmul.f32 %v2578_v28, %v2468_v56  ;;  %v2587_v34 = vsub.f32 1.0, %v2578_v28  ;;  %v2920_v43 = vld [vmem:[#allocation5 + $0x20] sm:$0xff] }
 0x732   :  { %v2586_v30 = vmul.f32 %v6224_v51, %v2582_v32  ;;  %v2588_v35 = vsub.f32 1.0, %v2582_v32  ;;  %v2589_v36 = vmul.f32 %v2587_v34, %v2543_v57  ;;  %6243 = vmatmul.mubr.msk.f32.vlgmr.msra.gmra.mrb[22].mxu1 %vm477_vm10, %v2770_v31 }
 0x733   :  { %6246 = vmatpush3.msk.msra.mxu1 %vm484_vm3, %v6992_v39  ;;  %6247 = vmatprep.mubr.msk.f32.mxu1 %vm6660_vm0, %v6659_v1  ;;  %v2918_v39 = vld [vmem:[#allocation2 + $0x20] sm:$0xff] }
 0x734   :  { %v2590_v29 = vmul.f32 %v6229_v53, %v2588_v35  ;;  %v2591_v37 = vadd.f32 %v2589_v36, %v2585_v33  ;;  %6255 = vmatprep.subr.mxu1 %v6659_v1 }
 0x736   :  { %v2592_v40 = vadd.f32 %v2590_v29, %v2586_v30  ;;  %v2595_v41 = vsub.f32 %v2593_v58, %v2591_v37  ;;  %6232 = vmatprep.mubr.msk.f32.mxu0 %vm477_vm10, %v2591_v37 }
 0x738   :  { %v2596_v42 = vsub.f32 %v7001_v54, %v2592_v40  ;;  %6233 = vmatmul.mubr.msk.f32.vlgmr.msra.gmra.mrb[22].mxu0 %vm477_vm10, %v2592_v40 }
 0x739   :  { %6237 = vmatprep.mubr.msk.f32.mxu0 %vm477_vm10, %v2595_v41  ;;  %6236 = vmatpush3.msk.msra.mxu0 %vm484_vm3, %v6987_v38 }
 0x73a   :  { %6248 = vmatmul.mubr.msk.f32.vlgmr.msra.gmra.mrb[22].mxu1 %vm477_vm10, %v2768_v27  ;;  %6250 = vmatprep.subr.mxu0 %v6659_v1 }
 0x73b   :  { %6256 = vmatpush3.msra.mxu1 %v2920_v43  ;;  %6257 = vmatprep.mubr.msk.f32.mxu1 %vm6660_vm0, %v6659_v1 }
 0x73c   :  { %6265 = vmatprep.subr.mxu1 %v2920_v43 }
 0x740   :  { %6238 = vmatmul.mubr.msk.f32.vlgmr.msra.gmra.mrb[22].mxu0 %vm477_vm10, %v2596_v42 }
 0x741   :  { %6251 = vmatpush3.msra.mxu0 %v2918_v39  ;;  %6252 = vmatprep.mubr.msk.f32.mxu0 %vm6660_vm0, %v6659_v1 }
 0x742   :  { %6260 = vmatprep.subr.mxu0 %v2918_v39 }
 0x80d   :  { %v2913_v44 = vpop.f32.mrb[22].mxu1 }
 0x80e   :  { %v6249_v45 = vpop.f32.mrb[23].mxu1  ;;  %6253 = vmatmul.mubr.msk.f32.vlgmr.msra.gmra.mrb[24].mxu0 %vm101_vm2, %v2913_v44  ;;  %6258 = vmatmul.mubr.msk.f32.vlgmr.msra.gmra.mrb[24].mxu1 %vm101_vm2, %v2913_v44 }
 0x80f   :  { %6261 = vmatpush3.msra.mxu0 %v2918_v39  ;;  %6266 = vmatpush3.msra.mxu1 %v2920_v43 }
 0x810   :  { %6280 = vmatprep.subr.mxu1 %v6659_v1  ;;  %6270 = vmatprep.subr.msk.mxu0 %vm484_vm3, %v7047_v48 }
 0x813   :  { %v6239_v38 = vpop.f32.mrb[22].mxu0 }
 0x814   :  { %v2756_v46 = vpop.f32.mrb[23].mxu0 }
 0x815   :  { %6262 = vmatprep.mubr.msk.f32.mxu0 %vm101_vm2, %v2756_v46  ;;  %6267 = vmatprep.mubr.msk.f32.mxu1 %vm101_vm2, %v2756_v46 }
 0x816   :  { %6263 = vmatmul.mubr.msk.f32.vlgmr.msra.gmra.mrb[26].mxu0 %vm101_vm2, %v6239_v38  ;;  %6268 = vmatmul.mubr.msk.f32.vlgmr.msra.gmra.mrb[26].mxu1 %vm101_vm2, %v6239_v38 }
 0x817   :  { %6282 = vmatprep.mubr.msk.f32.mxu1 %vm6660_vm0, %v6659_v1  ;;  %6281 = vmatpush3.msk.msra.mxu1 %vm484_vm3, %v7042_v47 }
 0x818   :  { %6285 = vmatprep.subr.mxu1 %v6659_v1  ;;  %6271 = vmatpush3.msk.msra.mxu0 %vm484_vm3, %v7047_v48 }
 0x819   :  { %6275 = vmatprep.subr.msk.mxu0 %vm484_vm3, %v7042_v47 }
 0x8e1   :  { %v2994_v50 = vpop.f32.mrb[24].mxu0  ;;  %v3064_v51 = vpop.f32.mrb[24].mxu1 }
 0x8e2   :  { %v3068_v53 = vsub.f32 %v3064_v51, %v2994_v50  ;;  %v3475_v54 = vadd.f32 %v3064_v51, %v2994_v50  ;;  %v6254_v56 = vpop.f32.mrb[25].mxu0  ;;  %v6259_v57 = vpop.f32.mrb[25].mxu1 }
 0x8e4   :  { %v3069_v58 = vmul.f32 100.0, %v3068_v53 }
 0x8e6   :  { %v3072_v59 = vand.u32 2147483647, %v3069_v58  ;;  %vm3070_vm7 = vcmp.lt.f32.partialorder %v3069_v58, 0.0 }
 0x8e7   :  { %v3071_v26 = vsel %vm3070_vm7, -1.0, %v6663_v49 }
 0x8e8   :  { %vm3073_vm15 = vcmp.gt.f32.partialorder %v3072_v59, 2.4142137  ;;  %v3081_v60 = vadd.f32 1.0, %v3072_v59  ;;  %vm3074_vm1 = vcmp.gt.f32.partialorder %v3072_v59, 0.41421357  ;;  %v5856_v6 = vadd.f32 -1.0, %v3072_v59 }
 0x8e9   :  { %v3077_v61 = vsel %vm3073_vm15, %v3072_v59, 1.0  ;;  %v6264_v62 = vpop.f32.mrb[26].mxu0  ;;  %v6269_v63 = vpop.f32.mrb[26].mxu1  ;;  %vm3075_vm4 = vmxor %vm3073_vm15, %vm6661_vm6 }
 0x8ea   :  { %6472 = vrcp.f32 %v3077_v61  ;;  %v7056_v0 = vadd.f32 %v6269_v63, %v6264_v62  ;;  %v3174_v3 = vpop.f32.mrb[27].mxu0  ;;  %v3249_v4 = vpop.f32.mrb[27].mxu1  ;;  %vm3076_vm5 = vmand %vm3074_vm1, %vm3075_vm4 }
 0x8eb   :  { %6474 = vrcp.f32 %v3081_v60  ;;  %v3299_v2 = vadd.f32 %v3249_v4, %v3174_v3  ;;  %v3086_v22 = vsel %vm3076_vm5, 0.7853982, %v6659_v1  ;;  %v7102_v60 = vld [vmem:[#allocation7 + $0x28] sm:$0x1f] }
 0x8ec   :  { %v3087_v25 = vsel %vm3073_vm15, 1.5707964, %v3086_v22 }
 0x8f4   :  { %v6473_v5 = vpop.eup %6472 }
 0x8f5   :  { %v6475_v7 = vpop.eup %6474  ;;  %v3079_v10 = vmul.f32 -1.0, %v6473_v5 }
 0x8f6   :  { %v3083_v11 = vmul.f32 %v6475_v7, %v5856_v6 }
 0x8f8   :  { %v3084_v12 = vsel %vm3076_vm5, %v3083_v11, %v3072_v59  ;;  %v7097_v59 = vld [vmem:[#allocation8 + $0x28] sm:$0x1f] }
 0x8f9   :  { %v3085_v13 = vsel %vm3073_vm15, %v3079_v10, %v3084_v12 }
 0x8fa   :  { %v3088_v14 = vmul.f32 %v3085_v13, %v3085_v13 }
 0x8fc   :  { %v3089_v15 = vmul.f32 0.080537446, %v3088_v14 }
 0x8fe   :  { %v5857_v16 = vadd.f32 -0.13877685, %v3089_v15 }
 0x900   :  { %v3091_v9 = vmul.f32 %v5857_v16, %v3088_v14 }
 0x902   :  { %v3092_v17 = vadd.f32 0.19977711, %v3091_v9 }
 0x904   :  { %v3093_v18 = vmul.f32 %v3092_v17, %v3088_v14 }
 0x906   :  { %v5858_v8 = vadd.f32 -0.3333295, %v3093_v18 }
 0x908   :  { %v3095_v19 = vmul.f32 %v5858_v8, %v3088_v14 }
 0x90a   :  { %v3096_v23 = vmul.f32 %v3095_v19, %v3085_v13 }
 0x90c   :  { %v3097_v24 = vadd.f32 %v3096_v23, %v3085_v13 }
 0x90e   :  { %v3098_v21 = vadd.f32 %v3097_v24, %v3087_v25 }
 0x910   :  { %v3099_v27 = vmul.f32 %v3098_v21, %v3071_v26 }
 0x912   :  { %v3100_v20 = vmul.f32 0.31830987, %v3099_v27 }
 0x914   :  { %v3101_v28 = vadd.f32 0.5, %v3100_v20 }
 0x916   :  { %v3471_v31 = vmul.f32 %v3101_v28, %v2994_v50  ;;  %v3472_v32 = vsub.f32 1.0, %v3101_v28  ;;  %v3265_v33 = vrot.slane %v3101_v28, %v6836_v52 }
 0x918   :  { %v3473_v34 = vmul.f32 %v3472_v32, %v3064_v51  ;;  %v3266_v30 = vcombine.high %v3265_v33, %v3265_v33  ;;  %v3273_v35 = vrot.slane %v3265_v33, %v6836_v52 }
 0x91a   :  { %v3474_v36 = vadd.f32 %v3473_v34, %v3471_v31  ;;  %v3280_v29 = vrot.slane %v3266_v30, %v6836_v52  ;;  %v3284_v37 = vrot.slane %v3273_v35, %v6839_v55 }
 0x91c   :  { %v3476_v40 = vsub.f32 %v3475_v54, %v3474_v36  ;;  %v3288_v41 = vrot.slane %v3280_v29, %v6839_v55  ;;  %v3291_v42 = vmul.f32 %v3284_v37, %v3174_v3  ;;  %v3293_v43 = vsub.f32 1.0, %v3284_v37  ;;  %v3626_v54 = vld [vmem:[#allocation5 + $0x28] sm:$0xff] }
 0x91e   :  { %v3292_v39 = vmul.f32 %v6264_v62, %v3288_v41  ;;  %v3294_v44 = vsub.f32 1.0, %v3288_v41  ;;  %v3295_v45 = vmul.f32 %v3293_v43, %v3249_v4  ;;  %6283 = vmatmul.mubr.msk.f32.vlgmr.msra.gmra.mrb[28].mxu1 %vm477_vm10, %v3476_v40 }
 0x91f   :  { %6286 = vmatpush3.msk.msra.mxu1 %vm484_vm3, %v7047_v48  ;;  %6287 = vmatprep.mubr.msk.f32.mxu1 %vm6660_vm0, %v6659_v1  ;;  %v3624_v48 = vld [vmem:[#allocation2 + $0x28] sm:$0xff] }
 0x920   :  { %v3296_v38 = vmul.f32 %v6269_v63, %v3294_v44  ;;  %v3297_v46 = vadd.f32 %v3295_v45, %v3291_v42  ;;  %6295 = vmatprep.subr.mxu1 %v6659_v1 }
 0x922   :  { %v3298_v50 = vadd.f32 %v3296_v38, %v3292_v39  ;;  %v3301_v51 = vsub.f32 %v3299_v2, %v3297_v46  ;;  %6272 = vmatprep.mubr.msk.f32.mxu0 %vm477_vm10, %v3297_v46 }
 0x924   :  { %v3302_v53 = vsub.f32 %v7056_v0, %v3298_v50  ;;  %6273 = vmatmul.mubr.msk.f32.vlgmr.msra.gmra.mrb[28].mxu0 %vm477_vm10, %v3298_v50 }
 0x925   :  { %6277 = vmatprep.mubr.msk.f32.mxu0 %vm477_vm10, %v3301_v51  ;;  %6276 = vmatpush3.msk.msra.mxu0 %vm484_vm3, %v7042_v47 }
 0x926   :  { %6288 = vmatmul.mubr.msk.f32.vlgmr.msra.gmra.mrb[28].mxu1 %vm477_vm10, %v3474_v36  ;;  %6290 = vmatprep.subr.mxu0 %v6659_v1 }
 0x927   :  { %6296 = vmatpush3.msra.mxu1 %v3626_v54  ;;  %6297 = vmatprep.mubr.msk.f32.mxu1 %vm6660_vm0, %v6659_v1 }
 0x928   :  { %6305 = vmatprep.subr.mxu1 %v3626_v54 }
 0x92c   :  { %6278 = vmatmul.mubr.msk.f32.vlgmr.msra.gmra.mrb[28].mxu0 %vm477_vm10, %v3302_v53 }
 0x92d   :  { %6291 = vmatpush3.msra.mxu0 %v3624_v48  ;;  %6292 = vmatprep.mubr.msk.f32.mxu0 %vm6660_vm0, %v6659_v1 }
 0x92e   :  { %6300 = vmatprep.subr.mxu0 %v3624_v48 }
 0x9f9   :  { %v3619_v56 = vpop.f32.mrb[28].mxu1 }
 0x9fa   :  { %v6289_v57 = vpop.f32.mrb[29].mxu1  ;;  %6293 = vmatmul.mubr.msk.f32.vlgmr.msra.gmra.mrb[30].mxu0 %vm101_vm2, %v3619_v56  ;;  %6298 = vmatmul.mubr.msk.f32.vlgmr.msra.gmra.mrb[30].mxu1 %vm101_vm2, %v3619_v56 }
 0x9fb   :  { %6301 = vmatpush3.msra.mxu0 %v3624_v48  ;;  %6306 = vmatpush3.msra.mxu1 %v3626_v54 }
 0x9fc   :  { %6320 = vmatprep.subr.mxu1 %v6659_v1  ;;  %6310 = vmatprep.subr.msk.mxu0 %vm484_vm3, %v7102_v60 }
 0x9ff   :  { %v6279_v47 = vpop.f32.mrb[28].mxu0 }
 0xa00   :  { %v3462_v58 = vpop.f32.mrb[29].mxu0 }
 0xa01   :  { %6302 = vmatprep.mubr.msk.f32.mxu0 %vm101_vm2, %v3462_v58  ;;  %6307 = vmatprep.mubr.msk.f32.mxu1 %vm101_vm2, %v3462_v58 }
 0xa02   :  { %6303 = vmatmul.mubr.msk.f32.vlgmr.msra.gmra.mrb[32].mxu0 %vm101_vm2, %v6279_v47  ;;  %6308 = vmatmul.mubr.msk.f32.vlgmr.msra.gmra.mrb[32].mxu1 %vm101_vm2, %v6279_v47 }
 0xa03   :  { %6322 = vmatprep.mubr.msk.f32.mxu1 %vm6660_vm0, %v6659_v1  ;;  %6321 = vmatpush3.msk.msra.mxu1 %vm484_vm3, %v7097_v59 }
 0xa04   :  { %6325 = vmatprep.subr.mxu1 %v6659_v1  ;;  %6311 = vmatpush3.msk.msra.mxu0 %vm484_vm3, %v7102_v60 }
 0xa05   :  { %6315 = vmatprep.subr.msk.mxu0 %vm484_vm3, %v7097_v59 }
 0xacd   :  { %v3700_v61 = vpop.f32.mrb[30].mxu0  ;;  %v3770_v62 = vpop.f32.mrb[30].mxu1 }
 0xace   :  { %v3774_v63 = vsub.f32 %v3770_v62, %v3700_v61  ;;  %v4181_v0 = vadd.f32 %v3770_v62, %v3700_v61  ;;  %v6294_v3 = vpop.f32.mrb[31].mxu0  ;;  %v6299_v4 = vpop.f32.mrb[31].mxu1 }
 0xad0   :  { %v3775_v2 = vmul.f32 100.0, %v3774_v63 }
 0xad2   :  { %v3778_v5 = vand.u32 2147483647, %v3775_v2  ;;  %vm3776_vm13 = vcmp.lt.f32.partialorder %v3775_v2, 0.0 }
 0xad3   :  { %v3777_v35 = vsel %vm3776_vm13, -1.0, %v6663_v49 }
 0xad4   :  { %vm3779_vm8 = vcmp.gt.f32.partialorder %v3778_v5, 2.4142137  ;;  %v3787_v6 = vadd.f32 1.0, %v3778_v5  ;;  %vm3780_vm9 = vcmp.gt.f32.partialorder %v3778_v5, 0.41421357  ;;  %v5875_v9 = vadd.f32 -1.0, %v3778_v5 }
 0xad5   :  { %v3783_v7 = vsel %vm3779_vm8, %v3778_v5, 1.0  ;;  %v6304_v10 = vpop.f32.mrb[32].mxu0  ;;  %v6309_v11 = vpop.f32.mrb[32].mxu1  ;;  %vm3781_vm11 = vmxor %vm3779_vm8, %vm6661_vm6 }
 0xad6   :  { %6476 = vrcp.f32 %v3783_v7  ;;  %v7111_v12 = vadd.f32 %v6309_v11, %v6304_v10  ;;  %v3880_v13 = vpop.f32.mrb[33].mxu0  ;;  %v3955_v14 = vpop.f32.mrb[33].mxu1  ;;  %vm3782_vm12 = vmand %vm3780_vm9, %vm3781_vm11 }
 0xad7   :  { %6478 = vrcp.f32 %v3787_v6  ;;  %v4005_v15 = vadd.f32 %v3955_v14, %v3880_v13  ;;  %v3792_v31 = vsel %vm3782_vm12, 0.7853982, %v6659_v1  ;;  %v7157_v6 = vld [vmem:[#allocation7 + $0x30] sm:$0x1f] }
 0xad8   :  { %v3793_v34 = vsel %vm3779_vm8, 1.5707964, %v3792_v31 }
 0xae0   :  { %v6477_v16 = vpop.eup %6476 }
 0xae1   :  { %v6479_v17 = vpop.eup %6478  ;;  %v3785_v18 = vmul.f32 -1.0, %v6477_v16 }
 0xae2   :  { %v3789_v8 = vmul.f32 %v6479_v17, %v5875_v9 }
 0xae4   :  { %v3790_v19 = vsel %vm3782_vm12, %v3789_v8, %v3778_v5  ;;  %v7152_v5 = vld [vmem:[#allocation8 + $0x30] sm:$0x1f] }
 0xae5   :  { %v3791_v22 = vsel %vm3779_vm8, %v3785_v18, %v3790_v19 }
 0xae6   :  { %v3794_v23 = vmul.f32 %v3791_v22, %v3791_v22 }
 0xae8   :  { %v3795_v24 = vmul.f32 0.080537446, %v3794_v23 }
 0xaea   :  { %v5876_v25 = vadd.f32 -0.13877685, %v3795_v24 }
 0xaec   :  { %v3797_v21 = vmul.f32 %v5876_v25, %v3794_v23 }
 0xaee   :  { %v3798_v26 = vadd.f32 0.19977711, %v3797_v21 }
 0xaf0   :  { %v3799_v27 = vmul.f32 %v3798_v26, %v3794_v23 }
 0xaf2   :  { %v5877_v20 = vadd.f32 -0.3333295, %v3799_v27 }
 0xaf4   :  { %v3801_v28 = vmul.f32 %v5877_v20, %v3794_v23 }
 0xaf6   :  { %v3802_v32 = vmul.f32 %v3801_v28, %v3791_v22 }
 0xaf8   :  { %v3803_v33 = vadd.f32 %v3802_v32, %v3791_v22 }
 0xafa   :  { %v3804_v30 = vadd.f32 %v3803_v33, %v3793_v34 }
 0xafc   :  { %v3805_v36 = vmul.f32 %v3804_v30, %v3777_v35 }
 0xafe   :  { %v3806_v29 = vmul.f32 0.31830987, %v3805_v36 }
 0xb00   :  { %v3807_v37 = vadd.f32 0.5, %v3806_v29 }
 0xb02   :  { %v4177_v40 = vmul.f32 %v3807_v37, %v3700_v61  ;;  %v4178_v41 = vsub.f32 1.0, %v3807_v37  ;;  %v3971_v42 = vrot.slane %v3807_v37, %v6836_v52 }
 0xb04   :  { %v4179_v43 = vmul.f32 %v4178_v41, %v3770_v62  ;;  %v3972_v39 = vcombine.high %v3971_v42, %v3971_v42  ;;  %v3979_v44 = vrot.slane %v3971_v42, %v6836_v52 }
 0xb06   :  { %v4180_v45 = vadd.f32 %v4179_v43, %v4177_v40  ;;  %v3986_v38 = vrot.slane %v3972_v39, %v6836_v52  ;;  %v3990_v46 = vrot.slane %v3979_v44, %v6839_v55 }
 0xb08   :  { %v4182_v50 = vsub.f32 %v4181_v0, %v4180_v45  ;;  %v3994_v51 = vrot.slane %v3986_v38, %v6839_v55  ;;  %v3997_v53 = vmul.f32 %v3990_v46, %v3880_v13  ;;  %v3999_v54 = vsub.f32 1.0, %v3990_v46  ;;  %v4332_v0 = vld [vmem:[#allocation5 + $0x30] sm:$0xff] }
 0xb0a   :  { %v3998_v48 = vmul.f32 %v6304_v10, %v3994_v51  ;;  %v4000_v56 = vsub.f32 1.0, %v3994_v51  ;;  %v4001_v57 = vmul.f32 %v3999_v54, %v3955_v14  ;;  %6323 = vmatmul.mubr.msk.f32.vlgmr.msra.gmra.mrb[34].mxu1 %vm477_vm10, %v4182_v50 }
 0xb0b   :  { %6326 = vmatpush3.msk.msra.mxu1 %vm484_vm3, %v7102_v60  ;;  %6327 = vmatprep.mubr.msk.f32.mxu1 %vm6660_vm0, %v6659_v1  ;;  %v4330_v60 = vld [vmem:[#allocation2 + $0x30] sm:$0xff] }
 0xb0c   :  { %v4002_v47 = vmul.f32 %v6309_v11, %v4000_v56  ;;  %v4003_v58 = vadd.f32 %v4001_v57, %v3997_v53  ;;  %6335 = vmatprep.subr.mxu1 %v6659_v1 }
 0xb0e   :  { %v4004_v61 = vadd.f32 %v4002_v47, %v3998_v48  ;;  %v4007_v62 = vsub.f32 %v4005_v15, %v4003_v58  ;;  %6312 = vmatprep.mubr.msk.f32.mxu0 %vm477_vm10, %v4003_v58 }
 0xb10   :  { %v4008_v63 = vsub.f32 %v7111_v12, %v4004_v61  ;;  %6313 = vmatmul.mubr.msk.f32.vlgmr.msra.gmra.mrb[34].mxu0 %vm477_vm10, %v4004_v61 }
 0xb11   :  { %6317 = vmatprep.mubr.msk.f32.mxu0 %vm477_vm10, %v4007_v62  ;;  %6316 = vmatpush3.msk.msra.mxu0 %vm484_vm3, %v7097_v59 }
 0xb12   :  { %6328 = vmatmul.mubr.msk.f32.vlgmr.msra.gmra.mrb[34].mxu1 %vm477_vm10, %v4180_v45  ;;  %6330 = vmatprep.subr.mxu0 %v6659_v1 }
 0xb13   :  { %6336 = vmatpush3.msra.mxu1 %v4332_v0  ;;  %6337 = vmatprep.mubr.msk.f32.mxu1 %vm6660_vm0, %v6659_v1 }
 0xb14   :  { %6345 = vmatprep.subr.mxu1 %v4332_v0 }
 0xb18   :  { %6318 = vmatmul.mubr.msk.f32.vlgmr.msra.gmra.mrb[34].mxu0 %vm477_vm10, %v4008_v63 }
 0xb19   :  { %6331 = vmatpush3.msra.mxu0 %v4330_v60  ;;  %6332 = vmatprep.mubr.msk.f32.mxu0 %vm6660_vm0, %v6659_v1 }
 0xb1a   :  { %6340 = vmatprep.subr.mxu0 %v4330_v60 }
 0xbe5   :  { %v4325_v3 = vpop.f32.mrb[34].mxu1 }
 0xbe6   :  { %v6329_v4 = vpop.f32.mrb[35].mxu1  ;;  %6333 = vmatmul.mubr.msk.f32.vlgmr.msra.gmra.mrb[36].mxu0 %vm101_vm2, %v4325_v3  ;;  %6338 = vmatmul.mubr.msk.f32.vlgmr.msra.gmra.mrb[36].mxu1 %vm101_vm2, %v4325_v3 }
 0xbe7   :  { %6341 = vmatpush3.msra.mxu0 %v4330_v60  ;;  %6346 = vmatpush3.msra.mxu1 %v4332_v0 }
 0xbe8   :  { %6360 = vmatprep.subr.mxu1 %v6659_v1  ;;  %6350 = vmatprep.subr.msk.mxu0 %vm484_vm3, %v7157_v6 }
 0xbeb   :  { %v6319_v59 = vpop.f32.mrb[34].mxu0 }
 0xbec   :  { %v4168_v2 = vpop.f32.mrb[35].mxu0 }
 0xbed   :  { %6342 = vmatprep.mubr.msk.f32.mxu0 %vm101_vm2, %v4168_v2  ;;  %6347 = vmatprep.mubr.msk.f32.mxu1 %vm101_vm2, %v4168_v2 }
 0xbee   :  { %6343 = vmatmul.mubr.msk.f32.vlgmr.msra.gmra.mrb[38].mxu0 %vm101_vm2, %v6319_v59  ;;  %6348 = vmatmul.mubr.msk.f32.vlgmr.msra.gmra.mrb[38].mxu1 %vm101_vm2, %v6319_v59 }
 0xbef   :  { %6362 = vmatprep.mubr.msk.f32.mxu1 %vm6660_vm0, %v6659_v1  ;;  %6361 = vmatpush3.msk.msra.mxu1 %vm484_vm3, %v7152_v5 }
 0xbf0   :  { %6365 = vmatprep.subr.mxu1 %v6659_v1  ;;  %6351 = vmatpush3.msk.msra.mxu0 %vm484_vm3, %v7157_v6 }
 0xbf1   :  { %6355 = vmatprep.subr.msk.mxu0 %vm484_vm3, %v7152_v5 }
 0xcb9   :  { %v4406_v7 = vpop.f32.mrb[36].mxu0  ;;  %v4476_v10 = vpop.f32.mrb[36].mxu1 }
 0xcba   :  { %v4480_v11 = vsub.f32 %v4476_v10, %v4406_v7  ;;  %v4887_v12 = vadd.f32 %v4476_v10, %v4406_v7  ;;  %v6334_v13 = vpop.f32.mrb[37].mxu0  ;;  %v6339_v14 = vpop.f32.mrb[37].mxu1 }
 0xcbc   :  { %v4481_v15 = vmul.f32 100.0, %v4480_v11 }
 0xcbe   :  { %v4484_v16 = vand.u32 2147483647, %v4481_v15  ;;  %vm4482_vm5 = vcmp.lt.f32.partialorder %v4481_v15, 0.0 }
 0xcbf   :  { %v4483_v44 = vsel %vm4482_vm5, -1.0, %v6663_v49 }
 0xcc0   :  { %vm4485_vm14 = vcmp.gt.f32.partialorder %v4484_v16, 2.4142137  ;;  %v4493_v9 = vadd.f32 1.0, %v4484_v16  ;;  %vm4486_vm15 = vcmp.gt.f32.partialorder %v4484_v16, 0.41421357  ;;  %v5894_v21 = vadd.f32 -1.0, %v4484_v16 }
 0xcc1   :  { %v4489_v17 = vsel %vm4485_vm14, %v4484_v16, 1.0  ;;  %v6344_v18 = vpop.f32.mrb[38].mxu0  ;;  %v6349_v8 = vpop.f32.mrb[38].mxu1  ;;  %vm4487_vm1 = vmxor %vm4485_vm14, %vm6661_vm6 }
 0xcc2   :  { %6480 = vrcp.f32 %v4489_v17  ;;  %v7166_v19 = vadd.f32 %v6349_v8, %v6344_v18  ;;  %v4586_v22 = vpop.f32.mrb[39].mxu0  ;;  %v4661_v23 = vpop.f32.mrb[39].mxu1  ;;  %vm4488_vm4 = vmand %vm4486_vm15, %vm4487_vm1 }
 0xcc3   :  { %6482 = vrcp.f32 %v4493_v9  ;;  %v4711_v24 = vadd.f32 %v4661_v23, %v4586_v22  ;;  %v4498_v40 = vsel %vm4488_vm4, 0.7853982, %v6659_v1  ;;  %v7212_v9 = vld [vmem:[#allocation7 + $0x38] sm:$0x1f] }
 0xcc4   :  { %v4499_v43 = vsel %vm4485_vm14, 1.5707964, %v4498_v40 }
 0xccc   :  { %v6481_v25 = vpop.eup %6480 }
 0xccd   :  { %v6483_v26 = vpop.eup %6482  ;;  %v4491_v27 = vmul.f32 -1.0, %v6481_v25 }
 0xcce   :  { %v4495_v20 = vmul.f32 %v6483_v26, %v5894_v21 }
 0xcd0   :  { %v4496_v28 = vsel %vm4488_vm4, %v4495_v20, %v4484_v16  ;;  %v7207_v16 = vld [vmem:[#allocation8 + $0x38] sm:$0x1f] }
 0xcd1   :  { %v4497_v31 = vsel %vm4485_vm14, %v4491_v27, %v4496_v28 }
 0xcd2   :  { %v4500_v32 = vmul.f32 %v4497_v31, %v4497_v31 }
 0xcd4   :  { %v4501_v33 = vmul.f32 0.080537446, %v4500_v32 }
 0xcd6   :  { %v5895_v34 = vadd.f32 -0.13877685, %v4501_v33 }
 0xcd8   :  { %v4503_v30 = vmul.f32 %v5895_v34, %v4500_v32 }
 0xcda   :  { %v4504_v35 = vadd.f32 0.19977711, %v4503_v30 }
 0xcdc   :  { %v4505_v36 = vmul.f32 %v4504_v35, %v4500_v32 }
 0xcde   :  { %v5896_v29 = vadd.f32 -0.3333295, %v4505_v36 }
 0xce0   :  { %v4507_v37 = vmul.f32 %v5896_v29, %v4500_v32 }
 0xce2   :  { %v4508_v41 = vmul.f32 %v4507_v37, %v4497_v31 }
 0xce4   :  { %v4509_v42 = vadd.f32 %v4508_v41, %v4497_v31 }
 0xce6   :  { %v4510_v39 = vadd.f32 %v4509_v42, %v4499_v43 }
 0xce8   :  { %v4511_v45 = vmul.f32 %v4510_v39, %v4483_v44 }
 0xcea   :  { %v4512_v38 = vmul.f32 0.31830987, %v4511_v45 }
 0xcec   :  { %v4513_v46 = vadd.f32 0.5, %v4512_v38 }
 0xcee   :  { %v4883_v50 = vmul.f32 %v4513_v46, %v4406_v7  ;;  %v4884_v51 = vsub.f32 1.0, %v4513_v46  ;;  %v4677_v53 = vrot.slane %v4513_v46, %v6836_v52 }
 0xcf0   :  { %v4885_v54 = vmul.f32 %v4884_v51, %v4476_v10  ;;  %v4678_v48 = vcombine.high %v4677_v53, %v4677_v53  ;;  %v4685_v56 = vrot.slane %v4677_v53, %v6836_v52 }
 0xcf2   :  { %v4886_v57 = vadd.f32 %v4885_v54, %v4883_v50  ;;  %v4692_v47 = vrot.slane %v4678_v48, %v6836_v52  ;;  %v4696_v58 = vrot.slane %v4685_v56, %v6839_v55 }
 0xcf4   :  { %v4888_v61 = vsub.f32 %v4887_v12, %v4886_v57  ;;  %v4700_v62 = vrot.slane %v4692_v47, %v6839_v55  ;;  %v4703_v63 = vmul.f32 %v4696_v58, %v4586_v22  ;;  %v4705_v0 = vsub.f32 1.0, %v4696_v58  ;;  %v5038_v12 = vld [vmem:[#allocation5 + $0x38] sm:$0xff] }
 0xcf6   :  { %v4704_v60 = vmul.f32 %v6344_v18, %v4700_v62  ;;  %v4706_v3 = vsub.f32 1.0, %v4700_v62  ;;  %v4707_v4 = vmul.f32 %v4705_v0, %v4661_v23  ;;  %6363 = vmatmul.mubr.msk.f32.vlgmr.msra.gmra.mrb[40].mxu1 %vm477_vm10, %v4888_v61 }
 0xcf7   :  { %6366 = vmatpush3.msk.msra.mxu1 %vm484_vm3, %v7157_v6  ;;  %6367 = vmatprep.mubr.msk.f32.mxu1 %vm6660_vm0, %v6659_v1  ;;  %v5036_v6 = vld [vmem:[#allocation2 + $0x38] sm:$0xff] }
 0xcf8   :  { %v4708_v59 = vmul.f32 %v6349_v8, %v4706_v3  ;;  %v4709_v2 = vadd.f32 %v4707_v4, %v4703_v63  ;;  %6375 = vmatprep.subr.mxu1 %v6659_v1 }
 0xcfa   :  { %v4710_v7 = vadd.f32 %v4708_v59, %v4704_v60  ;;  %v4713_v10 = vsub.f32 %v4711_v24, %v4709_v2  ;;  %6352 = vmatprep.mubr.msk.f32.mxu0 %vm477_vm10, %v4709_v2 }
 0xcfc   :  { %v4714_v11 = vsub.f32 %v7166_v19, %v4710_v7  ;;  %6353 = vmatmul.mubr.msk.f32.vlgmr.msra.gmra.mrb[40].mxu0 %vm477_vm10, %v4710_v7 }
 0xcfd   :  { %6357 = vmatprep.mubr.msk.f32.mxu0 %vm477_vm10, %v4713_v10  ;;  %6356 = vmatpush3.msk.msra.mxu0 %vm484_vm3, %v7152_v5 }
 0xcfe   :  { %6368 = vmatmul.mubr.msk.f32.vlgmr.msra.gmra.mrb[40].mxu1 %vm477_vm10, %v4886_v57  ;;  %6370 = vmatprep.subr.mxu0 %v6659_v1 }
 0xcff   :  { %6376 = vmatpush3.msra.mxu1 %v5038_v12  ;;  %6377 = vmatprep.mubr.msk.f32.mxu1 %vm6660_vm0, %v6659_v1 }
 0xd00   :  { %6385 = vmatprep.subr.mxu1 %v5038_v12 }
 0xd04   :  { %6358 = vmatmul.mubr.msk.f32.vlgmr.msra.gmra.mrb[40].mxu0 %vm477_vm10, %v4714_v11 }
 0xd05   :  { %6371 = vmatpush3.msra.mxu0 %v5036_v6  ;;  %6372 = vmatprep.mubr.msk.f32.mxu0 %vm6660_vm0, %v6659_v1 }
 0xd06   :  { %6380 = vmatprep.subr.mxu0 %v5036_v6 }
 0xdd1   :  { %v5031_v13 = vpop.f32.mrb[40].mxu1 }
 0xdd2   :  { %v6369_v14 = vpop.f32.mrb[41].mxu1  ;;  %6373 = vmatmul.mubr.msk.f32.vlgmr.msra.gmra.mrb[42].mxu0 %vm101_vm2, %v5031_v13  ;;  %6378 = vmatmul.mubr.msk.f32.vlgmr.msra.gmra.mrb[42].mxu1 %vm101_vm2, %v5031_v13 }
 0xdd3   :  { %6381 = vmatpush3.msra.mxu0 %v5036_v6  ;;  %6386 = vmatpush3.msra.mxu1 %v5038_v12 }
 0xdd4   :  { %6400 = vmatprep.subr.mxu1 %v6659_v1  ;;  %6390 = vmatprep.subr.msk.mxu0 %vm484_vm3, %v7212_v9 }
 0xdd7   :  { %v6359_v5 = vpop.f32.mrb[40].mxu0 }
 0xdd8   :  { %v4874_v15 = vpop.f32.mrb[41].mxu0 }
 0xdd9   :  { %6382 = vmatprep.mubr.msk.f32.mxu0 %vm101_vm2, %v4874_v15  ;;  %6387 = vmatprep.mubr.msk.f32.mxu1 %vm101_vm2, %v4874_v15 }
 0xdda   :  { %6383 = vmatmul.mubr.msk.f32.vlgmr.msra.gmra.mrb[44].mxu0 %vm101_vm2, %v6359_v5  ;;  %6388 = vmatmul.mubr.msk.f32.vlgmr.msra.gmra.mrb[44].mxu1 %vm101_vm2, %v6359_v5 }
 0xddb   :  { %6402 = vmatprep.mubr.msk.f32.mxu1 %vm6660_vm0, %v6659_v1  ;;  %6401 = vmatpush3.msk.msra.mxu1 %vm484_vm3, %v7207_v16 }
 0xddc   :  { %6405 = vmatprep.subr.mxu1 %v6659_v1  ;;  %6391 = vmatpush3.msk.msra.mxu0 %vm484_vm3, %v7212_v9 }
 0xddd   :  { %6395 = vmatprep.subr.msk.mxu0 %vm484_vm3, %v7207_v16 }
 0xea5   :  { %v5112_v17 = vpop.f32.mrb[42].mxu0  ;;  %v5182_v18 = vpop.f32.mrb[42].mxu1 }
 0xea6   :  { %v5186_v8 = vsub.f32 %v5182_v18, %v5112_v17  ;;  %v5593_v19 = vadd.f32 %v5182_v18, %v5112_v17  ;;  %v6374_v22 = vpop.f32.mrb[43].mxu0  ;;  %v6379_v23 = vpop.f32.mrb[43].mxu1 }
 0xea8   :  { %v5187_v24 = vmul.f32 100.0, %v5186_v8 }
 0xeaa   :  { %v5190_v25 = vand.u32 2147483647, %v5187_v24 }
 0xeac   :  { %vm5191_vm7 = vcmp.gt.f32.partialorder %v5190_v25, 2.4142137  ;;  %v5199_v21 = vadd.f32 1.0, %v5190_v25  ;;  %vm5192_vm8 = vcmp.gt.f32.partialorder %v5190_v25, 0.41421357  ;;  %v5913_v30 = vadd.f32 -1.0, %v5190_v25 }
 0xead   :  { %v5195_v26 = vsel %vm5191_vm7, %v5190_v25, 1.0  ;;  %v6384_v27 = vpop.f32.mrb[44].mxu0  ;;  %v6389_v20 = vpop.f32.mrb[44].mxu1  ;;  %vm5193_vm9 = vmxor %vm5191_vm7, %vm6661_vm6  ;;  %vm5188_vm6 = vcmp.lt.f32.partialorder %v5187_v24, 0.0 }
 0xeae   :  { %6484 = vrcp.f32 %v5195_v26  ;;  %v7221_v28 = vadd.f32 %v6389_v20, %v6384_v27  ;;  %v5292_v31 = vpop.f32.mrb[45].mxu0  ;;  %v5367_v32 = vpop.f32.mrb[45].mxu1  ;;  %vm5194_vm11 = vmand %vm5192_vm8, %vm5193_vm9  ;;  %v5189_v56 = vsel %vm5188_vm6, -1.0, %v6663_v49 }
 0xeaf   :  { %6486 = vrcp.f32 %v5199_v21  ;;  %v5417_v33 = vadd.f32 %v5367_v32, %v5292_v31  ;;  %v5204_v50 = vsel %vm5194_vm11, 0.7853982, %v6659_v1 }
 0xeb0   :  { %v5205_v54 = vsel %vm5191_vm7, 1.5707964, %v5204_v50 }
 0xeb8   :  { %v6485_v34 = vpop.eup %6484 }
 0xeb9   :  { %v6487_v35 = vpop.eup %6486  ;;  %v5197_v36 = vmul.f32 -1.0, %v6485_v34 }
 0xeba   :  { %v5201_v29 = vmul.f32 %v6487_v35, %v5913_v30 }
 0xebc   :  { %v5202_v37 = vsel %vm5194_vm11, %v5201_v29, %v5190_v25 }
 0xebd   :  { %v5203_v40 = vsel %vm5191_vm7, %v5197_v36, %v5202_v37 }
 0xebe   :  { %v5206_v41 = vmul.f32 %v5203_v40, %v5203_v40 }
 0xec0   :  { %v5207_v42 = vmul.f32 0.080537446, %v5206_v41 }
 0xec2   :  { %v5914_v43 = vadd.f32 -0.13877685, %v5207_v42 }
 0xec4   :  { %v5209_v39 = vmul.f32 %v5914_v43, %v5206_v41 }
 0xec6   :  { %v5210_v44 = vadd.f32 0.19977711, %v5209_v39 }
 0xec8   :  { %v5211_v45 = vmul.f32 %v5210_v44, %v5206_v41 }
 0xeca   :  { %v5915_v38 = vadd.f32 -0.3333295, %v5211_v45 }
 0xecc   :  { %v5213_v46 = vmul.f32 %v5915_v38, %v5206_v41 }
 0xece   :  { %v5214_v51 = vmul.f32 %v5213_v46, %v5203_v40 }
 0xed0   :  { %v5215_v53 = vadd.f32 %v5214_v51, %v5203_v40 }
 0xed2   :  { %v5216_v48 = vadd.f32 %v5215_v53, %v5205_v54 }
 0xed4   :  { %v5217_v57 = vmul.f32 %v5216_v48, %v5189_v56 }
 0xed6   :  { %v5218_v47 = vmul.f32 0.31830987, %v5217_v57 }
 0xed8   :  { %v5219_v58 = vadd.f32 0.5, %v5218_v47 }
 0xeda   :  { %v5589_v61 = vmul.f32 %v5219_v58, %v5112_v17  ;;  %v5590_v62 = vsub.f32 1.0, %v5219_v58  ;;  %v5383_v63 = vrot.slane %v5219_v58, %v6836_v52 }
 0xedc   :  { %v5591_v0 = vmul.f32 %v5590_v62, %v5182_v18  ;;  %v5384_v60 = vcombine.high %v5383_v63, %v5383_v63  ;;  %v5391_v3 = vrot.slane %v5383_v63, %v6836_v52 }
 0xede   :  { %v5592_v4 = vadd.f32 %v5591_v0, %v5589_v61  ;;  %v5398_v59 = vrot.slane %v5384_v60, %v6836_v52  ;;  %v5402_v2 = vrot.slane %v5391_v3, %v6839_v55 }
 0xee0   :  { %v5594_v7 = vsub.f32 %v5593_v19, %v5592_v4  ;;  %v5406_v10 = vrot.slane %v5398_v59, %v6839_v55  ;;  %v5409_v49 = vmul.f32 %v5402_v2, %v5292_v31  ;;  %v5411_v11 = vsub.f32 1.0, %v5402_v2 }
 0xee2   :  { %v5410_v12 = vmul.f32 %v6384_v27, %v5406_v10  ;;  %v5412_v6 = vsub.f32 1.0, %v5406_v10  ;;  %v5413_v13 = vmul.f32 %v5411_v11, %v5367_v32  ;;  %6403 = vmatmul.mubr.msk.f32.vlgmr.msra.gmra.mrb[46].mxu1 %vm477_vm10, %v5594_v7 }
 0xee3   :  { %6406 = vmatpush3.msk.msra.mxu1 %vm484_vm3, %v7212_v9  ;;  %6407 = vmatprep.mubr.msk.f32.mxu1 %vm6660_vm0, %v6659_v1  ;;  %vm5741_vm0 = vcmask 58368  }
 0xee4   :  { %v5414_v14 = vmul.f32 %v6389_v20, %v5412_v6  ;;  %v5415_v52 = vadd.f32 %v5413_v13, %v5409_v49 }
 0xee6   :  { %v5416_v5 = vadd.f32 %v5414_v14, %v5410_v12  ;;  %v5419_v15 = vsub.f32 %v5417_v33, %v5415_v52  ;;  %6392 = vmatprep.mubr.msk.f32.mxu0 %vm477_vm10, %v5415_v52 }
 0xee8   :  { %v5420_v55 = vsub.f32 %v7221_v28, %v5416_v5  ;;  %6393 = vmatmul.mubr.msk.f32.vlgmr.msra.gmra.mrb[46].mxu0 %vm477_vm10, %v5416_v5 }
 0xee9   :  { %6396 = vmatpush3.msk.msra.mxu0 %vm484_vm3, %v7207_v16  ;;  %6397 = vmatprep.mubr.msk.f32.mxu0 %vm477_vm10, %v5419_v15 }
 0xeea   :  { %6408 = vmatmul.mubr.msk.f32.vlgmr.msra.gmra.mrb[46].mxu1 %vm477_vm10, %v5592_v4 }
 0xef0   :  { %6398 = vmatmul.mubr.msk.f32.vlgmr.msra.gmra.mrb[46].mxu0 %vm477_vm10, %v5420_v55 }
 0xfbd   :  { %v5737_v1 = vpop.f32.mrb[46].mxu1 }
 0xfbe   :  { %v6409_v9 = vpop.f32.mrb[47].mxu1  ;;  %5742 = vst.msk [vmem:[#allocation11] sm:$0x3] %vm5741_vm0, %v5737_v1 }
 0xfbf   :  { %6609 = shalt.err (!%p6606_p2)
}
 0xfc0   :  { %s6610_s13 = scalar_lea.hbm %s7281_s5, 32 }
 0xfc1   :  { %p6611_p3 = scmp.ne.s32.totalorder %s7281_s5, %s6610_s13  ;;  %p6614_p4 = scmp.lt.u32.totalorder %s6610_s13, %s7281_s5 }
 0xfc3   :  { %p6616_p5 = pnand %p6614_p4, %p6611_p3 }
 0xfc5   :  { %6619 = shalt.err (!%p6616_p5)
}
 0xfc6   :  { %5754 = dma.vmem_to_hbm [thread:$0]  %s5752_s11, 32, %s7281_s5, [#allocation4]   ;;  %v6399_v16 = vpop.f32.mrb[46].mxu0 }
 0xfc7   :  { %s6665_s20 = smov [#allocation12]   ;;  %5744 = vst.msk [vmem:[#allocation12 + $0x8] sm:$0xff] %vm101_vm2, %v6399_v16  ;;  %v5580_v17 = vpop.f32.mrb[47].mxu0 }
 0xfc8   :  { %s5760_s0 = sshll.u32 %s6665_s20, 4  ;;  %5743 = vst.msk [vmem:[#allocation12] sm:$0xff] %vm101_vm2, %v5580_v17  ;;  %s5761_s0 = int_to_ptr.vmem [resolvable:$true] %s5760_s0 }
 0xfc9   :  { %s6620_s1 = scalar_lea.vmem %s5761_s0, 256  ;;  %p6625_p7 = scmp.lt.s32.totalorder %s5761_s0, %s5761_s0 }
 0xfca   :  { %p6621_p6 = scmp.ne.s32.totalorder %s5761_s0, %s6620_s1  ;;  %p6626_p8 = scmp.lt.s32.totalorder %s6620_s1, %s6620_s1 }
 0xfcc   :  { %p6627_p9 = por %p6626_p8, %p6625_p7 }
 0xfce   :  { %p6628_p10 = pnand %p6627_p9, %p6621_p6 }
 0xfd0   :  { %6631 = shalt.err (!%p6628_p10)
}
 0xfd1   :  { %s6632_s5 = scalar_lea.hbm %s7282_s6, 256 }
 0xfd2   :  { %p6633_p11 = scmp.ne.s32.totalorder %s7282_s6, %s6632_s5  ;;  %p6636_p12 = scmp.lt.u32.totalorder %s6632_s5, %s7282_s6 }
 0xfd4   :  { %p6638_p13 = pnand %p6636_p12, %p6633_p11 }
 0xfd6   :  { %6641 = shalt.err (!%p6638_p13)
}
 0xfd7   :  { %5766 = dma.vmem_to_hbm [thread:$0]  %s5761_s0, 256, %s7282_s6, [#allocation13], %s6654_s9, %s6654_s9, %s6655_s10  }
 0xfd8   :  { %6648 = dma.done.wait [#allocation4], 32  }
 0xfd9   :  { %6649 = vsyncadd [#allocation4], 4294967264 }
 0xfda   :  { %6650 = dma.done.wait [#allocation13], 256  }
 0xfdb   :  { %6651 = vsyncadd [#allocation13], 4294967040 }
 0xfdc   :  { %5773 = vsyncpa [#allocation3], 1 }
 0xfdd   :  { %5774 = vsyncpa [#allocation6], 1 }
 0xfde   :  { %5775 = vsyncpa [#allocation9], 1 }
 0xfdf   :  { %5776 = vsyncpa [#allocation4], 1 }
 0xfe0   :  { %5777 = vsyncpa [#allocation13], 1 }

</bundles_post_ra>
